<compile_context>
chip_gen: v7x
topology: tpu7x:2x2x1
jax: 0.10.0
libtpu: 0.0.40
codegen_flags: <defaults>
</compile_context>

<pallas_src>
import math

import jax
import jax.numpy as jnp
from jax.experimental import pallas as pl
from jax.experimental.pallas import tpu as pltpu


def _vmem_limit_bytes():
    """Per-generation VMEM limit with headroom (v7x: 64 MiB phys; v5e/v6e: 128 MiB)."""
    default = 64 * 1024 * 1024
    try:
        info = pltpu.get_tpu_info()
    except Exception:
        return default
    phys = None
    for name in ("vmem_capacity_bytes", "vmem_size_bytes", "vmem_bytes"):
        phys = getattr(info, name, None)
        if phys:
            break
    if not phys:
        return default
    # ~12 MiB headroom for I/O double buffers + compiler-internal scratch; cap at 100 MiB.
    return int(max(32 * 1024 * 1024, min(int(phys) - 12 * 1024 * 1024, 100 * 1024 * 1024)))


def _make_kernel(num_head: int, key_dim: int, c: int, matmul_dtype):
    d = key_dim

    def kernel(x_ref, mask_ref, bias_ref, wqkvg_ref, bg_ref, wo_ref, bo_ref,
               out_ref, wa_ref):
        # ---- fused projection: one full-width 2-D matmul on the MXU -----------------
        x = x_ref[0, 0].astype(matmul_dtype)                         # (n, c)
        proj = jax.lax.dot_general(
            x, wqkvg_ref[...],
            dimension_numbers=(((1,), (0,)), ((), ())),
            preferred_element_type=jnp.float32)                      # (n, 4c) f32
        # Column layout: [Q_all | K_all | V_all | G_all], head-major inside each group;
        # 1/sqrt(d) is pre-folded into the Q columns (no logits scaling below).

        mask_bias = 1e9 * (mask_ref[0, 0] - 1.0)                     # (1, n_k), f32

        # ---- per-head attention core (statically unrolled; one (n,n) block live) ----
        for h0 in range(num_head):
            lo = h0 * d
            q = proj[:, lo:lo + d].astype(matmul_dtype)              # (n, d)
            k = proj[:, c + lo:c + lo + d].astype(matmul_dtype)      # (n, d)
            v = proj[:, 2 * c + lo:2 * c + lo + d].astype(matmul_dtype)
            g = proj[:, 3 * c + lo:3 * c + lo + d]                   # (n, d), f32

            logits = jax.lax.dot_general(
                q, k, dimension_numbers=(((1,), (1,)), ((), ())),
                preferred_element_type=jnp.float32)                  # (n, n)
            logits = logits + mask_bias + bias_ref[0, h0].astype(jnp.float32)

            # Numerically stable softmax, f32; normalization deferred to the (n, d) pv.
            # Fully-masked rows degrade to a uniform distribution (same as the reference).
            mx = jnp.max(logits, axis=-1, keepdims=True)
            p = jnp.exp(logits - mx)
            l = jnp.sum(p, axis=-1, keepdims=True)                   # (n, 1)

            pv = jax.lax.dot_general(
                p.astype(matmul_dtype), v,
                dimension_numbers=(((1,), (0,)), ((), ())),
                preferred_element_type=jnp.float32)                  # (n, d)
            pv = pv * pl.reciprocal(l, approx=False)

            gate = jax.nn.sigmoid(g + bg_ref[:, lo:lo + d])          # (n, d), f32
            wa_ref[:, lo:lo + d] = (gate * pv).astype(wa_ref.dtype)

        # ---- head merge folded into one K=c output matmul ---------------------------
        out = jax.lax.dot_general(
            wa_ref[...], wo_ref[...],
            dimension_numbers=(((1,), (0,)), ((), ())),
            preferred_element_type=jnp.float32)                      # (n, out_padded)
        out_ref[0, 0] = (out + bo_ref[...]).astype(out_ref.dtype)

    return kernel


def attention_ffb(in_data, mask, nonbatched_bias, params, num_head, *,
                  matmul_dtype=jnp.bfloat16, bias_dtype=jnp.bfloat16):
    """in_data: (b0, b1, n, c); mask: (b0, b1, n); nonbatched_bias: (b0, n, n, h)."""
    b0, b1, n, c = in_data.shape
    d = c // num_head
    scaling = 1.0 / math.sqrt(d)
    out_dim = params["o_w"].shape[1]
    # Lane-dense output stores: pad the output columns to a multiple of 128.
    out_p = out_dim if out_dim % 128 == 0 else ((out_dim + 127) // 128) * 128

    # ---- one-time, wrapper-side weight layout (all relayout kept out of the kernel) ----
    wq = params["qkv_w"][:, 0 * c:1 * c] * scaling       # fold 1/sqrt(d) into Q columns
    wk = params["qkv_w"][:, 1 * c:2 * c]
    wv = params["qkv_w"][:, 2 * c:3 * c]
    wqkvg = jnp.concatenate([wq, wk, wv, params["g_w"]], axis=1).astype(matmul_dtype)

    bg = params["g_b"].reshape(1, c).astype(jnp.float32)             # (1, c)
    wo = params["o_w"]                                               # (c, out)
    bo = params["o_b"].reshape(1, out_dim)
    if out_p != out_dim:
        wo = jnp.pad(wo, ((0, 0), (0, out_p - out_dim)))
        bo = jnp.pad(bo, ((0, 0), (0, out_p - out_dim)))
    wo = wo.astype(matmul_dtype)
    bo = bo.astype(jnp.float32)

    mask4 = mask.reshape(b0, b1, 1, n).astype(jnp.float32)           # (b0, b1, 1, n)
    bias_bhqk = jnp.transpose(nonbatched_bias, (0, 3, 1, 2))         # (b0, h, q, k)
    if bias_dtype is not None:
        bias_bhqk = bias_bhqk.astype(bias_dtype)

    kernel = _make_kernel(num_head, d, c, matmul_dtype)

    def build(single_buffer_constants: bool):
        kw = dict(pipeline_mode=pl.Buffered(1)) if single_buffer_constants else {}
        in_specs = [
            pl.BlockSpec((1, 1, n, c), lambda i, j: (i, j, 0, 0)),             # x
            pl.BlockSpec((1, 1, 1, n), lambda i, j: (i, j, 0, 0)),             # key mask
            pl.BlockSpec((1, num_head, n, n), lambda i, j: (i, 0, 0, 0), **kw),  # pair bias (resident over b1)
            pl.BlockSpec((c, 4 * c), lambda i, j: (0, 0), **kw),               # fused [Q|K|V|G] weights
            pl.BlockSpec((1, c), lambda i, j: (0, 0), **kw),                   # gating bias
            pl.BlockSpec((c, out_p), lambda i, j: (0, 0), **kw),               # o_w (lane-padded)
            pl.BlockSpec((1, out_p), lambda i, j: (0, 0), **kw),               # o_b (lane-padded)
        ]
        return pl.pallas_call(
            kernel,
            out_shape=jax.ShapeDtypeStruct((b0, b1, n, out_p), in_data.dtype),
            grid_spec=pltpu.PrefetchScalarGridSpec(
                num_scalar_prefetch=0,
                grid=(b0, b1),
                in_specs=in_specs,
                out_specs=pl.BlockSpec((1, 1, n, out_p), lambda i, j: (i, j, 0, 0)),
                scratch_shapes=[pltpu.VMEM((n, c), matmul_dtype)],   # gated per-head wa
            ),
            compiler_params=pltpu.CompilerParams(
                dimension_semantics=("parallel", "parallel"),
                vmem_limit_bytes=_vmem_limit_bytes()),
        )

    args = (in_data, mask4, bias_bhqk, wqkvg, bg, wo, bo)
    try:
        out = build(True)(*args)
    except Exception:
        # pipeline_mode=pl.Buffered(1) (single-buffering of grid-constant blocks) is not
        # supported on every JAX/Mosaic version; fall back to default double-buffering.
        out = build(False)(*args)

    if out_p != out_dim:
        out = out[..., :out_dim]
    return out


def reference_forward(in_data, mask, nonbatched_bias, params, num_head):
    """Plain-JAX reference reproducing the PyTorch forward semantics."""
    b0, b1, n, c = in_data.shape
    d = c // num_head
    scaling = 1.0 / math.sqrt(d)

    qkv = jnp.einsum("...nc,ck->...nk", in_data, params["qkv_w"])
    q, k, v = jnp.split(qkv, 3, axis=-1)

    def split_heads(t):
        return t.reshape(b0, b1, n, num_head, d).transpose(0, 1, 3, 2, 4)

    q, k, v = map(split_heads, (q, k, v))                       # (b0,b1,h,n,d)
    logits = jnp.einsum("...hqd,...hkd->...hqk", q, k) * scaling
    mask_bias = 1e9 * (mask - 1.0)[:, :, None, None, :]
    pair_bias = jnp.transpose(nonbatched_bias, (0, 3, 1, 2))[:, None]  # (b0,1,h,q,k)
    weights = jax.nn.softmax(logits + mask_bias + pair_bias, axis=-1)
    wa = jnp.einsum("...hqk,...hkd->...hqd", weights, v)
    wa = wa.transpose(0, 1, 3, 2, 4).reshape(b0, b1, n, c)

    gate = jax.nn.sigmoid(
        jnp.einsum("...nc,ck->...nk", in_data, params["g_w"]) + params["g_b"])
    wa = gate * wa
    return jnp.einsum("...nc,co->...no", wa, params["o_w"]) + params["o_b"]


if __name__ == "__main__":
    # Small shapes consistent with the module's forward.
    b0, b1, n = 2, 3, 16
    num_head, key_dim = 4, 8
    c = num_head * key_dim          # key_dim * num_head = value_dim * num_head
    output_dim = 32

    key = jax.random.PRNGKey(0)
    k_x, k_m, k_b, k_qkv, k_g, k_o, k_ob = jax.random.split(key, 7)

    in_data = jax.random.normal(k_x, (b0, b1, n, c), dtype=jnp.float32)
    mask = (jax.random.uniform(k_m, (b0, b1, n)) > 0.3).astype(jnp.float32)
    mask = mask.at[..., 0].set(1.0)  # avoid fully-masked rows
    nonbatched_bias = 0.5 * jax.random.normal(
        k_b, (b0, n, n, num_head), dtype=jnp.float32)

    # Deterministic parameter init (shapes from __init__; synthetic, not a checkpoint).
    params = {
        "qkv_w": jax.random.normal(k_qkv, (c, 3 * c), dtype=jnp.float32)
                 * (1.0 / math.sqrt(c)),                              # glorot-ish
        "g_w": 0.1 * jax.random.normal(k_g, (c, c), dtype=jnp.float32),
        "g_b": jnp.ones((c,), dtype=jnp.float32),                     # gating_bias = ones
        "o_w": 0.1 * jax.random.normal(k_o, (c, output_dim), dtype=jnp.float32),
        "o_b": 0.1 * jax.random.normal(k_ob, (output_dim,), dtype=jnp.float32),
    }

    ref = reference_forward(in_data, mask, nonbatched_bias, params, num_head)

    # Structural-correctness check: full f32 operands must match the f32 reference tightly.
    out_f32 = attention_ffb(in_data, mask, nonbatched_bias, params, num_head,
                            matmul_dtype=jnp.float32, bias_dtype=jnp.float32)
    out_f32 = jax.block_until_ready(out_f32)
    assert out_f32.shape == (b0, b1, n, output_dim)
    assert jnp.allclose(out_f32, ref, atol=1e-4, rtol=1e-4), (
        float(jnp.max(jnp.abs(out_f32 - ref))))

    # Default fast path: bf16 MXU operands (f32 accumulation) + bf16 pair bias.
    # Operand rounding exceeds 1e-4, so the tolerance is relaxed accordingly.
    out = attention_ffb(in_data, mask, nonbatched_bias, params, num_head)
    out = jax.block_until_ready(out)
    assert out.shape == (b0, b1, n, output_dim)
    assert jnp.allclose(out, ref, atol=5e-2, rtol=5e-2), (
        float(jnp.max(jnp.abs(out - ref))))

    print("KERNEL_OK")
</pallas_src>

<mosaic_0001>
module attributes {stable_mosaic.version = 11 : i64} {
  func.func @kernel(%arg0: i32, %arg1: i32, %arg2: memref<1x1x16x32xf32, #tpu.memory_space<vmem>>, %arg3: memref<1x1x1x16xf32, #tpu.memory_space<vmem>>, %arg4: memref<1x4x16x16xf32, #tpu.memory_space<vmem>>, %arg5: memref<32x128xf32, #tpu.memory_space<vmem>>, %arg6: memref<1x32xf32, #tpu.memory_space<vmem>>, %arg7: memref<32x128xf32, #tpu.memory_space<vmem>>, %arg8: memref<1x128xf32, #tpu.memory_space<vmem>>, %arg9: memref<1x1x16x128xf32, #tpu.memory_space<vmem>>, %arg10: memref<16x32xf32, #tpu.memory_space<vmem>>) attributes {dimension_semantics = [#tpu.dimension_semantics<parallel>, #tpu.dimension_semantics<parallel>], iteration_bounds = array<i64: 2, 3>, scalar_prefetch = 0 : i64, scratch_operands = 1 : i64, tpu.core_type = #tpu.core_type<tc>, window_params = [{transform_indices = @transform_0, window_bounds = array<i64: 1, 1, 16, 32>}, {transform_indices = @transform_1, window_bounds = array<i64: 1, 1, 1, 16>}, {pipeline_mode = #tpu.pipeline_mode<synchronous>, transform_indices = @transform_2, window_bounds = array<i64: 1, 4, 16, 16>}, {pipeline_mode = #tpu.pipeline_mode<synchronous>, transform_indices = @transform_3, window_bounds = array<i64: 32, 128>}, {pipeline_mode = #tpu.pipeline_mode<synchronous>, transform_indices = @transform_4, window_bounds = array<i64: 1, 32>}, {pipeline_mode = #tpu.pipeline_mode<synchronous>, transform_indices = @transform_5, window_bounds = array<i64: 32, 128>}, {pipeline_mode = #tpu.pipeline_mode<synchronous>, transform_indices = @transform_6, window_bounds = array<i64: 1, 128>}, {transform_indices = @transform_7, window_bounds = array<i64: 1, 1, 16, 128>}]} {
    %c0 = arith.constant 0 : index
    %c0_0 = arith.constant 0 : index
    %c0_1 = arith.constant 0 : index
    %c0_2 = arith.constant 0 : index
    %0 = vector.load %arg2[%c0, %c0_0, %c0_1, %c0_2] : memref<1x1x16x32xf32, #tpu.memory_space<vmem>>, vector<1x1x16x32xf32>
    %1 = vector.shape_cast %0 : vector<1x1x16x32xf32> to vector<16x32xf32>
    %c0_3 = arith.constant 0 : index
    %c0_4 = arith.constant 0 : index
    %2 = vector.load %arg5[%c0_3, %c0_4] : memref<32x128xf32, #tpu.memory_space<vmem>>, vector<32x128xf32>
    %cst = arith.constant dense<0.000000e+00> : vector<16x128xf32>
    %3 = tpu.matmul %1, %2, %cst {dimension_numbers = #tpu.dot_dimension_numbers<[1], [0], [0], [1], [0, 0, 1, 1], [], []>} : vector<16x32xf32>, vector<32x128xf32>, vector<16x128xf32> -> vector<16x128xf32>
    %c0_5 = arith.constant 0 : index
    %c0_6 = arith.constant 0 : index
    %c0_7 = arith.constant 0 : index
    %c0_8 = arith.constant 0 : index
    %4 = vector.load %arg3[%c0_5, %c0_6, %c0_7, %c0_8] : memref<1x1x1x16xf32, #tpu.memory_space<vmem>>, vector<1x1x1x16xf32>
    %5 = vector.shape_cast %4 : vector<1x1x1x16xf32> to vector<1x16xf32>
    %cst_9 = arith.constant 1.000000e+00 : f32
    %6 = vector.broadcast %cst_9 : f32 to vector<1x16xf32>
    %7 = arith.subf %5, %6 : vector<1x16xf32>
    %cst_10 = arith.constant 1.000000e+09 : f32
    %8 = vector.broadcast %cst_10 : f32 to vector<1x16xf32>
    %9 = arith.mulf %8, %7 : vector<1x16xf32>
    %10 = vector.extract_strided_slice %3 {offsets = [0, 0], sizes = [16, 8], strides = [1, 1]} : vector<16x128xf32> to vector<16x8xf32>
    %11 = vector.extract_strided_slice %3 {offsets = [0, 32], sizes = [16, 8], strides = [1, 1]} : vector<16x128xf32> to vector<16x8xf32>
    %12 = vector.extract_strided_slice %3 {offsets = [0, 64], sizes = [16, 8], strides = [1, 1]} : vector<16x128xf32> to vector<16x8xf32>
    %13 = vector.extract_strided_slice %3 {offsets = [0, 96], sizes = [16, 8], strides = [1, 1]} : vector<16x128xf32> to vector<16x8xf32>
    %cst_11 = arith.constant dense<0.000000e+00> : vector<16x16xf32>
    %14 = tpu.matmul %10, %11, %cst_11 {dimension_numbers = #tpu.dot_dimension_numbers<[1], [1], [0], [0], [0, 0, 1, 0], [], []>} : vector<16x8xf32>, vector<16x8xf32>, vector<16x16xf32> -> vector<16x16xf32>
    %15 = vector.broadcast %9 : vector<1x16xf32> to vector<16x16xf32>
    %16 = arith.addf %14, %15 : vector<16x16xf32>
    %c0_12 = arith.constant 0 : index
    %c0_13 = arith.constant 0 : index
    %c0_14 = arith.constant 0 : index
    %c0_15 = arith.constant 0 : index
    %17 = vector.load %arg4[%c0_12, %c0_13, %c0_14, %c0_15] : memref<1x4x16x16xf32, #tpu.memory_space<vmem>>, vector<1x1x16x16xf32>
    %18 = vector.shape_cast %17 : vector<1x1x16x16xf32> to vector<16x16xf32>
    %19 = arith.addf %16, %18 : vector<16x16xf32>
    %cst_16 = arith.constant dense<0xFF800000> : vector<16xf32>
    %20 = vector.multi_reduction <maximumf>, %19, %cst_16 [1] : vector<16x16xf32> to vector<16xf32>
    %21 = vector.shape_cast %20 : vector<16xf32> to vector<16x1xf32>
    %22 = vector.broadcast %21 : vector<16x1xf32> to vector<16x16xf32>
    %23 = arith.subf %19, %22 : vector<16x16xf32>
    %24 = math.exp %23 : vector<16x16xf32>
    %cst_17 = arith.constant dense<0.000000e+00> : vector<16xf32>
    %25 = vector.multi_reduction <add>, %24, %cst_17 [1] : vector<16x16xf32> to vector<16xf32>
    %26 = vector.shape_cast %25 : vector<16xf32> to vector<16x1xf32>
    %cst_18 = arith.constant dense<0.000000e+00> : vector<16x8xf32>
    %27 = tpu.matmul %24, %12, %cst_18 {dimension_numbers = #tpu.dot_dimension_numbers<[1], [0], [0], [1], [0, 0, 1, 1], [], []>} : vector<16x16xf32>, vector<16x8xf32>, vector<16x8xf32> -> vector<16x8xf32>
    %28 = tpu.reciprocal %26 : vector<16x1xf32> -> vector<16x1xf32>
    %29 = vector.broadcast %28 : vector<16x1xf32> to vector<16x8xf32>
    %30 = arith.mulf %27, %29 : vector<16x8xf32>
    %c0_19 = arith.constant 0 : index
    %c0_20 = arith.constant 0 : index
    %31 = vector.load %arg6[%c0_19, %c0_20] : memref<1x32xf32, #tpu.memory_space<vmem>>, vector<1x8xf32>
    %32 = vector.broadcast %31 : vector<1x8xf32> to vector<16x8xf32>
    %33 = arith.addf %13, %32 : vector<16x8xf32>
    %34 = arith.negf %33 : vector<16x8xf32>
    %35 = math.exp %34 : vector<16x8xf32>
    %cst_21 = arith.constant 1.000000e+00 : f32
    %36 = vector.broadcast %cst_21 : f32 to vector<16x8xf32>
    %37 = arith.addf %36, %35 : vector<16x8xf32>
    %38 = arith.divf %36, %37 : vector<16x8xf32>
    %39 = arith.mulf %38, %30 : vector<16x8xf32>
    %c0_22 = arith.constant 0 : index
    %c0_23 = arith.constant 0 : index
    %40 = vector.load %arg10[%c0_22, %c0_23] : memref<16x32xf32, #tpu.memory_space<vmem>>, vector<16x8xf32>
    tpu.vector_store %arg10[%c0_22, %c0_23], %39 {strides = array<i32>} : memref<16x32xf32, #tpu.memory_space<vmem>>, vector<16x8xf32>,
    %41 = vector.extract_strided_slice %3 {offsets = [0, 8], sizes = [16, 8], strides = [1, 1]} : vector<16x128xf32> to vector<16x8xf32>
    %42 = vector.extract_strided_slice %3 {offsets = [0, 40], sizes = [16, 8], strides = [1, 1]} : vector<16x128xf32> to vector<16x8xf32>
    %43 = vector.extract_strided_slice %3 {offsets = [0, 72], sizes = [16, 8], strides = [1, 1]} : vector<16x128xf32> to vector<16x8xf32>
    %44 = vector.extract_strided_slice %3 {offsets = [0, 104], sizes = [16, 8], strides = [1, 1]} : vector<16x128xf32> to vector<16x8xf32>
    %cst_24 = arith.constant dense<0.000000e+00> : vector<16x16xf32>
    %45 = tpu.matmul %41, %42, %cst_24 {dimension_numbers = #tpu.dot_dimension_numbers<[1], [1], [0], [0], [0, 0, 1, 0], [], []>} : vector<16x8xf32>, vector<16x8xf32>, vector<16x16xf32> -> vector<16x16xf32>
    %46 = vector.broadcast %9 : vector<1x16xf32> to vector<16x16xf32>
    %47 = arith.addf %45, %46 : vector<16x16xf32>
    %c0_25 = arith.constant 0 : index
    %c1 = arith.constant 1 : index
    %c0_26 = arith.constant 0 : index
    %c0_27 = arith.constant 0 : index
    %48 = vector.load %arg4[%c0_25, %c1, %c0_26, %c0_27] : memref<1x4x16x16xf32, #tpu.memory_space<vmem>>, vector<1x1x16x16xf32>
    %49 = vector.shape_cast %48 : vector<1x1x16x16xf32> to vector<16x16xf32>
    %50 = arith.addf %47, %49 : vector<16x16xf32>
    %cst_28 = arith.constant dense<0xFF800000> : vector<16xf32>
    %51 = vector.multi_reduction <maximumf>, %50, %cst_28 [1] : vector<16x16xf32> to vector<16xf32>
    %52 = vector.shape_cast %51 : vector<16xf32> to vector<16x1xf32>
    %53 = vector.broadcast %52 : vector<16x1xf32> to vector<16x16xf32>
    %54 = arith.subf %50, %53 : vector<16x16xf32>
    %55 = math.exp %54 : vector<16x16xf32>
    %cst_29 = arith.constant dense<0.000000e+00> : vector<16xf32>
    %56 = vector.multi_reduction <add>, %55, %cst_29 [1] : vector<16x16xf32> to vector<16xf32>
    %57 = vector.shape_cast %56 : vector<16xf32> to vector<16x1xf32>
    %cst_30 = arith.constant dense<0.000000e+00> : vector<16x8xf32>
    %58 = tpu.matmul %55, %43, %cst_30 {dimension_numbers = #tpu.dot_dimension_numbers<[1], [0], [0], [1], [0, 0, 1, 1], [], []>} : vector<16x16xf32>, vector<16x8xf32>, vector<16x8xf32> -> vector<16x8xf32>
    %59 = tpu.reciprocal %57 : vector<16x1xf32> -> vector<16x1xf32>
    %60 = vector.broadcast %59 : vector<16x1xf32> to vector<16x8xf32>
    %61 = arith.mulf %58, %60 : vector<16x8xf32>
    %c0_31 = arith.constant 0 : index
    %c8 = arith.constant 8 : index
    %62 = vector.load %arg6[%c0_31, %c8] : memref<1x32xf32, #tpu.memory_space<vmem>>, vector<1x8xf32>
    %63 = vector.broadcast %62 : vector<1x8xf32> to vector<16x8xf32>
    %64 = arith.addf %44, %63 : vector<16x8xf32>
    %65 = arith.negf %64 : vector<16x8xf32>
    %66 = math.exp %65 : vector<16x8xf32>
    %cst_32 = arith.constant 1.000000e+00 : f32
    %67 = vector.broadcast %cst_32 : f32 to vector<16x8xf32>
    %68 = arith.addf %67, %66 : vector<16x8xf32>
    %69 = arith.divf %67, %68 : vector<16x8xf32>
    %70 = arith.mulf %69, %61 : vector<16x8xf32>
    %c0_33 = arith.constant 0 : index
    %c8_34 = arith.constant 8 : index
    %71 = vector.load %arg10[%c0_33, %c8_34] : memref<16x32xf32, #tpu.memory_space<vmem>>, vector<16x8xf32>
    tpu.vector_store %arg10[%c0_33, %c8_34], %70 {strides = array<i32>} : memref<16x32xf32, #tpu.memory_space<vmem>>, vector<16x8xf32>,
    %72 = vector.extract_strided_slice %3 {offsets = [0, 16], sizes = [16, 8], strides = [1, 1]} : vector<16x128xf32> to vector<16x8xf32>
    %73 = vector.extract_strided_slice %3 {offsets = [0, 48], sizes = [16, 8], strides = [1, 1]} : vector<16x128xf32> to vector<16x8xf32>
    %74 = vector.extract_strided_slice %3 {offsets = [0, 80], sizes = [16, 8], strides = [1, 1]} : vector<16x128xf32> to vector<16x8xf32>
    %75 = vector.extract_strided_slice %3 {offsets = [0, 112], sizes = [16, 8], strides = [1, 1]} : vector<16x128xf32> to vector<16x8xf32>
    %cst_35 = arith.constant dense<0.000000e+00> : vector<16x16xf32>
    %76 = tpu.matmul %72, %73, %cst_35 {dimension_numbers = #tpu.dot_dimension_numbers<[1], [1], [0], [0], [0, 0, 1, 0], [], []>} : vector<16x8xf32>, vector<16x8xf32>, vector<16x16xf32> -> vector<16x16xf32>
    %77 = vector.broadcast %9 : vector<1x16xf32> to vector<16x16xf32>
    %78 = arith.addf %76, %77 : vector<16x16xf32>
    %c0_36 = arith.constant 0 : index
    %c2 = arith.constant 2 : index
    %c0_37 = arith.constant 0 : index
    %c0_38 = arith.constant 0 : index
    %79 = vector.load %arg4[%c0_36, %c2, %c0_37, %c0_38] : memref<1x4x16x16xf32, #tpu.memory_space<vmem>>, vector<1x1x16x16xf32>
    %80 = vector.shape_cast %79 : vector<1x1x16x16xf32> to vector<16x16xf32>
    %81 = arith.addf %78, %80 : vector<16x16xf32>
    %cst_39 = arith.constant dense<0xFF800000> : vector<16xf32>
    %82 = vector.multi_reduction <maximumf>, %81, %cst_39 [1] : vector<16x16xf32> to vector<16xf32>
    %83 = vector.shape_cast %82 : vector<16xf32> to vector<16x1xf32>
    %84 = vector.broadcast %83 : vector<16x1xf32> to vector<16x16xf32>
    %85 = arith.subf %81, %84 : vector<16x16xf32>
    %86 = math.exp %85 : vector<16x16xf32>
    %cst_40 = arith.constant dense<0.000000e+00> : vector<16xf32>
    %87 = vector.multi_reduction <add>, %86, %cst_40 [1] : vector<16x16xf32> to vector<16xf32>
    %88 = vector.shape_cast %87 : vector<16xf32> to vector<16x1xf32>
    %cst_41 = arith.constant dense<0.000000e+00> : vector<16x8xf32>
    %89 = tpu.matmul %86, %74, %cst_41 {dimension_numbers = #tpu.dot_dimension_numbers<[1], [0], [0], [1], [0, 0, 1, 1], [], []>} : vector<16x16xf32>, vector<16x8xf32>, vector<16x8xf32> -> vector<16x8xf32>
    %90 = tpu.reciprocal %88 : vector<16x1xf32> -> vector<16x1xf32>
    %91 = vector.broadcast %90 : vector<16x1xf32> to vector<16x8xf32>
    %92 = arith.mulf %89, %91 : vector<16x8xf32>
    %c0_42 = arith.constant 0 : index
    %c16 = arith.constant 16 : index
    %93 = vector.load %arg6[%c0_42, %c16] : memref<1x32xf32, #tpu.memory_space<vmem>>, vector<1x8xf32>
    %94 = vector.broadcast %93 : vector<1x8xf32> to vector<16x8xf32>
    %95 = arith.addf %75, %94 : vector<16x8xf32>
    %96 = arith.negf %95 : vector<16x8xf32>
    %97 = math.exp %96 : vector<16x8xf32>
    %cst_43 = arith.constant 1.000000e+00 : f32
    %98 = vector.broadcast %cst_43 : f32 to vector<16x8xf32>
    %99 = arith.addf %98, %97 : vector<16x8xf32>
    %100 = arith.divf %98, %99 : vector<16x8xf32>
    %101 = arith.mulf %100, %92 : vector<16x8xf32>
    %c0_44 = arith.constant 0 : index
    %c16_45 = arith.constant 16 : index
    %102 = vector.load %arg10[%c0_44, %c16_45] : memref<16x32xf32, #tpu.memory_space<vmem>>, vector<16x8xf32>
    tpu.vector_store %arg10[%c0_44, %c16_45], %101 {strides = array<i32>} : memref<16x32xf32, #tpu.memory_space<vmem>>, vector<16x8xf32>,
    %103 = vector.extract_strided_slice %3 {offsets = [0, 24], sizes = [16, 8], strides = [1, 1]} : vector<16x128xf32> to vector<16x8xf32>
    %104 = vector.extract_strided_slice %3 {offsets = [0, 56], sizes = [16, 8], strides = [1, 1]} : vector<16x128xf32> to vector<16x8xf32>
    %105 = vector.extract_strided_slice %3 {offsets = [0, 88], sizes = [16, 8], strides = [1, 1]} : vector<16x128xf32> to vector<16x8xf32>
    %106 = vector.extract_strided_slice %3 {offsets = [0, 120], sizes = [16, 8], strides = [1, 1]} : vector<16x128xf32> to vector<16x8xf32>
    %cst_46 = arith.constant dense<0.000000e+00> : vector<16x16xf32>
    %107 = tpu.matmul %103, %104, %cst_46 {dimension_numbers = #tpu.dot_dimension_numbers<[1], [1], [0], [0], [0, 0, 1, 0], [], []>} : vector<16x8xf32>, vector<16x8xf32>, vector<16x16xf32> -> vector<16x16xf32>
    %108 = vector.broadcast %9 : vector<1x16xf32> to vector<16x16xf32>
    %109 = arith.addf %107, %108 : vector<16x16xf32>
    %c0_47 = arith.constant 0 : index
    %c3 = arith.constant 3 : index
    %c0_48 = arith.constant 0 : index
    %c0_49 = arith.constant 0 : index
    %110 = vector.load %arg4[%c0_47, %c3, %c0_48, %c0_49] : memref<1x4x16x16xf32, #tpu.memory_space<vmem>>, vector<1x1x16x16xf32>
    %111 = vector.shape_cast %110 : vector<1x1x16x16xf32> to vector<16x16xf32>
    %112 = arith.addf %109, %111 : vector<16x16xf32>
    %cst_50 = arith.constant dense<0xFF800000> : vector<16xf32>
    %113 = vector.multi_reduction <maximumf>, %112, %cst_50 [1] : vector<16x16xf32> to vector<16xf32>
    %114 = vector.shape_cast %113 : vector<16xf32> to vector<16x1xf32>
    %115 = vector.broadcast %114 : vector<16x1xf32> to vector<16x16xf32>
    %116 = arith.subf %112, %115 : vector<16x16xf32>
    %117 = math.exp %116 : vector<16x16xf32>
    %cst_51 = arith.constant dense<0.000000e+00> : vector<16xf32>
    %118 = vector.multi_reduction <add>, %117, %cst_51 [1] : vector<16x16xf32> to vector<16xf32>
    %119 = vector.shape_cast %118 : vector<16xf32> to vector<16x1xf32>
    %cst_52 = arith.constant dense<0.000000e+00> : vector<16x8xf32>
    %120 = tpu.matmul %117, %105, %cst_52 {dimension_numbers = #tpu.dot_dimension_numbers<[1], [0], [0], [1], [0, 0, 1, 1], [], []>} : vector<16x16xf32>, vector<16x8xf32>, vector<16x8xf32> -> vector<16x8xf32>
    %121 = tpu.reciprocal %119 : vector<16x1xf32> -> vector<16x1xf32>
    %122 = vector.broadcast %121 : vector<16x1xf32> to vector<16x8xf32>
    %123 = arith.mulf %120, %122 : vector<16x8xf32>
    %c0_53 = arith.constant 0 : index
    %c24 = arith.constant 24 : index
    %124 = vector.load %arg6[%c0_53, %c24] : memref<1x32xf32, #tpu.memory_space<vmem>>, vector<1x8xf32>
    %125 = vector.broadcast %124 : vector<1x8xf32> to vector<16x8xf32>
    %126 = arith.addf %106, %125 : vector<16x8xf32>
    %127 = arith.negf %126 : vector<16x8xf32>
    %128 = math.exp %127 : vector<16x8xf32>
    %cst_54 = arith.constant 1.000000e+00 : f32
    %129 = vector.broadcast %cst_54 : f32 to vector<16x8xf32>
    %130 = arith.addf %129, %128 : vector<16x8xf32>
    %131 = arith.divf %129, %130 : vector<16x8xf32>
    %132 = arith.mulf %131, %123 : vector<16x8xf32>
    %c0_55 = arith.constant 0 : index
    %c24_56 = arith.constant 24 : index
    %133 = vector.load %arg10[%c0_55, %c24_56] : memref<16x32xf32, #tpu.memory_space<vmem>>, vector<16x8xf32>
    tpu.vector_store %arg10[%c0_55, %c24_56], %132 {strides = array<i32>} : memref<16x32xf32, #tpu.memory_space<vmem>>, vector<16x8xf32>,
    %c0_57 = arith.constant 0 : index
    %c0_58 = arith.constant 0 : index
    %134 = vector.load %arg10[%c0_57, %c0_58] : memref<16x32xf32, #tpu.memory_space<vmem>>, vector<16x32xf32>
    %c0_59 = arith.constant 0 : index
    %c0_60 = arith.constant 0 : index
    %135 = vector.load %arg7[%c0_59, %c0_60] : memref<32x128xf32, #tpu.memory_space<vmem>>, vector<32x128xf32>
    %cst_61 = arith.constant dense<0.000000e+00> : vector<16x128xf32>
    %136 = tpu.matmul %134, %135, %cst_61 {dimension_numbers = #tpu.dot_dimension_numbers<[1], [0], [0], [1], [0, 0, 1, 1], [], []>} : vector<16x32xf32>, vector<32x128xf32>, vector<16x128xf32> -> vector<16x128xf32>
    %c0_62 = arith.constant 0 : index
    %c0_63 = arith.constant 0 : index
    %137 = vector.load %arg8[%c0_62, %c0_63] : memref<1x128xf32, #tpu.memory_space<vmem>>, vector<1x128xf32>
    %138 = vector.broadcast %137 : vector<1x128xf32> to vector<16x128xf32>
    %139 = arith.addf %136, %138 : vector<16x128xf32>
    %c0_64 = arith.constant 0 : index
    %c0_65 = arith.constant 0 : index
    %c0_66 = arith.constant 0 : index
    %c0_67 = arith.constant 0 : index
    %140 = vector.load %arg9[%c0_64, %c0_65, %c0_66, %c0_67] : memref<1x1x16x128xf32, #tpu.memory_space<vmem>>, vector<1x1x16x128xf32>
    %141 = vector.shape_cast %140 : vector<1x1x16x128xf32> to vector<16x128xf32>
    %142 = vector.shape_cast %139 : vector<16x128xf32> to vector<1x1x16x128xf32>
    tpu.vector_store %arg9[%c0_64, %c0_65, %c0_66, %c0_67], %142 {strides = array<i32>} : memref<1x1x16x128xf32, #tpu.memory_space<vmem>>, vector<1x1x16x128xf32>,
    return
  }
  func.func @transform_0(%arg0: i32, %arg1: i32) -> (i32, i32, i32, i32) {
    %c0_i32 = arith.constant 0 : i32
    %c0_i32_0 = arith.constant 0 : i32
    %c0_i32_1 = arith.constant 0 : i32
    return %arg0, %arg1, %c0_i32, %c0_i32_0 : i32, i32, i32, i32
  }
  func.func @transform_1(%arg0: i32, %arg1: i32) -> (i32, i32, i32, i32) {
    %c0_i32 = arith.constant 0 : i32
    %c0_i32_0 = arith.constant 0 : i32
    %c0_i32_1 = arith.constant 0 : i32
    return %arg0, %arg1, %c0_i32, %c0_i32_0 : i32, i32, i32, i32
  }
  func.func @transform_2(%arg0: i32, %arg1: i32) -> (i32, i32, i32, i32) {
    %c0_i32 = arith.constant 0 : i32
    %c0_i32_0 = arith.constant 0 : i32
    %c0_i32_1 = arith.constant 0 : i32
    %c0_i32_2 = arith.constant 0 : i32
    return %arg0, %c0_i32, %c0_i32_0, %c0_i32_1 : i32, i32, i32, i32
  }
  func.func @transform_3(%arg0: i32, %arg1: i32) -> (i32, i32) {
    %c0_i32 = arith.constant 0 : i32
    %c0_i32_0 = arith.constant 0 : i32
    %c0_i32_1 = arith.constant 0 : i32
    return %c0_i32, %c0_i32_0 : i32, i32
  }
  func.func @transform_4(%arg0: i32, %arg1: i32) -> (i32, i32) {
    %c0_i32 = arith.constant 0 : i32
    %c0_i32_0 = arith.constant 0 : i32
    %c0_i32_1 = arith.constant 0 : i32
    return %c0_i32, %c0_i32_0 : i32, i32
  }
  func.func @transform_5(%arg0: i32, %arg1: i32) -> (i32, i32) {
    %c0_i32 = arith.constant 0 : i32
    %c0_i32_0 = arith.constant 0 : i32
    %c0_i32_1 = arith.constant 0 : i32
    return %c0_i32, %c0_i32_0 : i32, i32
  }
  func.func @transform_6(%arg0: i32, %arg1: i32) -> (i32, i32) {
    %c0_i32 = arith.constant 0 : i32
    %c0_i32_0 = arith.constant 0 : i32
    %c0_i32_1 = arith.constant 0 : i32
    return %c0_i32, %c0_i32_0 : i32, i32
  }
  func.func @transform_7(%arg0: i32, %arg1: i32) -> (i32, i32, i32, i32) {
    %c0_i32 = arith.constant 0 : i32
    %c0_i32_0 = arith.constant 0 : i32
    %c0_i32_1 = arith.constant 0 : i32
    return %arg0, %arg1, %c0_i32, %c0_i32_0 : i32, i32, i32, i32
  }
}

module attributes {stable_mosaic.version = 11 : i64} {
  func.func @kernel(%arg0: i32, %arg1: i32, %arg2: memref<1x1x16x32xf32, #tpu.memory_space<vmem>>, %arg3: memref<1x1x1x16xf32, #tpu.memory_space<vmem>>, %arg4: memref<1x4x16x16xf32, #tpu.memory_space<vmem>>, %arg5: memref<32x128xf32, #tpu.memory_space<vmem>>, %arg6: memref<1x32xf32, #tpu.memory_space<vmem>>, %arg7: memref<32x128xf32, #tpu.memory_space<vmem>>, %arg8: memref<1x128xf32, #tpu.memory_space<vmem>>, %arg9: memref<1x1x16x128xf32, #tpu.memory_space<vmem>>, %arg10: memref<16x32xf32, #tpu.memory_space<vmem>>) attributes {dimension_semantics = [#tpu.dimension_semantics<parallel>, #tpu.dimension_semantics<parallel>], iteration_bounds = array<i64: 2, 3>, scalar_prefetch = 0 : i64, scratch_operands = 1 : i64, tpu.core_type = #tpu.core_type<tc>, window_params = [{transform_indices = @transform_0, window_bounds = array<i64: 1, 1, 16, 32>}, {transform_indices = @transform_1, window_bounds = array<i64: 1, 1, 1, 16>}, {transform_indices = @transform_2, window_bounds = array<i64: 1, 4, 16, 16>}, {pipeline_mode = #tpu.pipeline_mode<synchronous>, transform_indices = @transform_3, window_bounds = array<i64: 32, 128>}, {pipeline_mode = #tpu.pipeline_mode<synchronous>, transform_indices = @transform_4, window_bounds = array<i64: 1, 32>}, {pipeline_mode = #tpu.pipeline_mode<synchronous>, transform_indices = @transform_5, window_bounds = array<i64: 32, 128>}, {pipeline_mode = #tpu.pipeline_mode<synchronous>, transform_indices = @transform_6, window_bounds = array<i64: 1, 128>}, {transform_indices = @transform_7, window_bounds = array<i64: 1, 1, 16, 128>}]} {
    %c0 = arith.constant 0 : index
    %c0_0 = arith.constant 0 : index
    %c0_1 = arith.constant 0 : index
    %c0_2 = arith.constant 0 : index
    %0 = vector.load %arg2[%c0, %c0_0, %c0_1, %c0_2] : memref<1x1x16x32xf32, #tpu.memory_space<vmem>>, vector<1x1x16x32xf32>
    %1 = vector.shape_cast %0 : vector<1x1x16x32xf32> to vector<16x32xf32>
    %c0_3 = arith.constant 0 : index
    %c0_4 = arith.constant 0 : index
    %2 = vector.load %arg5[%c0_3, %c0_4] : memref<32x128xf32, #tpu.memory_space<vmem>>, vector<32x128xf32>
    %cst = arith.constant dense<0.000000e+00> : vector<16x128xf32>
    %3 = tpu.matmul %1, %2, %cst {dimension_numbers = #tpu.dot_dimension_numbers<[1], [0], [0], [1], [0, 0, 1, 1], [], []>} : vector<16x32xf32>, vector<32x128xf32>, vector<16x128xf32> -> vector<16x128xf32>
    %c0_5 = arith.constant 0 : index
    %c0_6 = arith.constant 0 : index
    %c0_7 = arith.constant 0 : index
    %c0_8 = arith.constant 0 : index
    %4 = vector.load %arg3[%c0_5, %c0_6, %c0_7, %c0_8] : memref<1x1x1x16xf32, #tpu.memory_space<vmem>>, vector<1x1x1x16xf32>
    %5 = vector.shape_cast %4 : vector<1x1x1x16xf32> to vector<1x16xf32>
    %cst_9 = arith.constant 1.000000e+00 : f32
    %6 = vector.broadcast %cst_9 : f32 to vector<1x16xf32>
    %7 = arith.subf %5, %6 : vector<1x16xf32>
    %cst_10 = arith.constant 1.000000e+09 : f32
    %8 = vector.broadcast %cst_10 : f32 to vector<1x16xf32>
    %9 = arith.mulf %8, %7 : vector<1x16xf32>
    %10 = vector.extract_strided_slice %3 {offsets = [0, 0], sizes = [16, 8], strides = [1, 1]} : vector<16x128xf32> to vector<16x8xf32>
    %11 = vector.extract_strided_slice %3 {offsets = [0, 32], sizes = [16, 8], strides = [1, 1]} : vector<16x128xf32> to vector<16x8xf32>
    %12 = vector.extract_strided_slice %3 {offsets = [0, 64], sizes = [16, 8], strides = [1, 1]} : vector<16x128xf32> to vector<16x8xf32>
    %13 = vector.extract_strided_slice %3 {offsets = [0, 96], sizes = [16, 8], strides = [1, 1]} : vector<16x128xf32> to vector<16x8xf32>
    %cst_11 = arith.constant dense<0.000000e+00> : vector<16x16xf32>
    %14 = tpu.matmul %10, %11, %cst_11 {dimension_numbers = #tpu.dot_dimension_numbers<[1], [1], [0], [0], [0, 0, 1, 0], [], []>} : vector<16x8xf32>, vector<16x8xf32>, vector<16x16xf32> -> vector<16x16xf32>
    %15 = vector.broadcast %9 : vector<1x16xf32> to vector<16x16xf32>
    %16 = arith.addf %14, %15 : vector<16x16xf32>
    %c0_12 = arith.constant 0 : index
    %c0_13 = arith.constant 0 : index
    %c0_14 = arith.constant 0 : index
    %c0_15 = arith.constant 0 : index
    %17 = vector.load %arg4[%c0_12, %c0_13, %c0_14, %c0_15] : memref<1x4x16x16xf32, #tpu.memory_space<vmem>>, vector<1x1x16x16xf32>
    %18 = vector.shape_cast %17 : vector<1x1x16x16xf32> to vector<16x16xf32>
    %19 = arith.addf %16, %18 : vector<16x16xf32>
    %cst_16 = arith.constant dense<0xFF800000> : vector<16xf32>
    %20 = vector.multi_reduction <maximumf>, %19, %cst_16 [1] : vector<16x16xf32> to vector<16xf32>
    %21 = vector.shape_cast %20 : vector<16xf32> to vector<16x1xf32>
    %22 = vector.broadcast %21 : vector<16x1xf32> to vector<16x16xf32>
    %23 = arith.subf %19, %22 : vector<16x16xf32>
    %24 = math.exp %23 : vector<16x16xf32>
    %cst_17 = arith.constant dense<0.000000e+00> : vector<16xf32>
    %25 = vector.multi_reduction <add>, %24, %cst_17 [1] : vector<16x16xf32> to vector<16xf32>
    %26 = vector.shape_cast %25 : vector<16xf32> to vector<16x1xf32>
    %cst_18 = arith.constant dense<0.000000e+00> : vector<16x8xf32>
    %27 = tpu.matmul %24, %12, %cst_18 {dimension_numbers = #tpu.dot_dimension_numbers<[1], [0], [0], [1], [0, 0, 1, 1], [], []>} : vector<16x16xf32>, vector<16x8xf32>, vector<16x8xf32> -> vector<16x8xf32>
    %28 = tpu.reciprocal %26 : vector<16x1xf32> -> vector<16x1xf32>
    %29 = vector.broadcast %28 : vector<16x1xf32> to vector<16x8xf32>
    %30 = arith.mulf %27, %29 : vector<16x8xf32>
    %c0_19 = arith.constant 0 : index
    %c0_20 = arith.constant 0 : index
    %31 = vector.load %arg6[%c0_19, %c0_20] : memref<1x32xf32, #tpu.memory_space<vmem>>, vector<1x8xf32>
    %32 = vector.broadcast %31 : vector<1x8xf32> to vector<16x8xf32>
    %33 = arith.addf %13, %32 : vector<16x8xf32>
    %34 = arith.negf %33 : vector<16x8xf32>
    %35 = math.exp %34 : vector<16x8xf32>
    %cst_21 = arith.constant 1.000000e+00 : f32
    %36 = vector.broadcast %cst_21 : f32 to vector<16x8xf32>
    %37 = arith.addf %36, %35 : vector<16x8xf32>
    %38 = arith.divf %36, %37 : vector<16x8xf32>
    %39 = arith.mulf %38, %30 : vector<16x8xf32>
    %c0_22 = arith.constant 0 : index
    %c0_23 = arith.constant 0 : index
    %40 = vector.load %arg10[%c0_22, %c0_23] : memref<16x32xf32, #tpu.memory_space<vmem>>, vector<16x8xf32>
    tpu.vector_store %arg10[%c0_22, %c0_23], %39 {strides = array<i32>} : memref<16x32xf32, #tpu.memory_space<vmem>>, vector<16x8xf32>,
    %41 = vector.extract_strided_slice %3 {offsets = [0, 8], sizes = [16, 8], strides = [1, 1]} : vector<16x128xf32> to vector<16x8xf32>
    %42 = vector.extract_strided_slice %3 {offsets = [0, 40], sizes = [16, 8], strides = [1, 1]} : vector<16x128xf32> to vector<16x8xf32>
    %43 = vector.extract_strided_slice %3 {offsets = [0, 72], sizes = [16, 8], strides = [1, 1]} : vector<16x128xf32> to vector<16x8xf32>
    %44 = vector.extract_strided_slice %3 {offsets = [0, 104], sizes = [16, 8], strides = [1, 1]} : vector<16x128xf32> to vector<16x8xf32>
    %cst_24 = arith.constant dense<0.000000e+00> : vector<16x16xf32>
    %45 = tpu.matmul %41, %42, %cst_24 {dimension_numbers = #tpu.dot_dimension_numbers<[1], [1], [0], [0], [0, 0, 1, 0], [], []>} : vector<16x8xf32>, vector<16x8xf32>, vector<16x16xf32> -> vector<16x16xf32>
    %46 = vector.broadcast %9 : vector<1x16xf32> to vector<16x16xf32>
    %47 = arith.addf %45, %46 : vector<16x16xf32>
    %c0_25 = arith.constant 0 : index
    %c1 = arith.constant 1 : index
    %c0_26 = arith.constant 0 : index
    %c0_27 = arith.constant 0 : index
    %48 = vector.load %arg4[%c0_25, %c1, %c0_26, %c0_27] : memref<1x4x16x16xf32, #tpu.memory_space<vmem>>, vector<1x1x16x16xf32>
    %49 = vector.shape_cast %48 : vector<1x1x16x16xf32> to vector<16x16xf32>
    %50 = arith.addf %47, %49 : vector<16x16xf32>
    %cst_28 = arith.constant dense<0xFF800000> : vector<16xf32>
    %51 = vector.multi_reduction <maximumf>, %50, %cst_28 [1] : vector<16x16xf32> to vector<16xf32>
    %52 = vector.shape_cast %51 : vector<16xf32> to vector<16x1xf32>
    %53 = vector.broadcast %52 : vector<16x1xf32> to vector<16x16xf32>
    %54 = arith.subf %50, %53 : vector<16x16xf32>
    %55 = math.exp %54 : vector<16x16xf32>
    %cst_29 = arith.constant dense<0.000000e+00> : vector<16xf32>
    %56 = vector.multi_reduction <add>, %55, %cst_29 [1] : vector<16x16xf32> to vector<16xf32>
    %57 = vector.shape_cast %56 : vector<16xf32> to vector<16x1xf32>
    %cst_30 = arith.constant dense<0.000000e+00> : vector<16x8xf32>
    %58 = tpu.matmul %55, %43, %cst_30 {dimension_numbers = #tpu.dot_dimension_numbers<[1], [0], [0], [1], [0, 0, 1, 1], [], []>} : vector<16x16xf32>, vector<16x8xf32>, vector<16x8xf32> -> vector<16x8xf32>
    %59 = tpu.reciprocal %57 : vector<16x1xf32> -> vector<16x1xf32>
    %60 = vector.broadcast %59 : vector<16x1xf32> to vector<16x8xf32>
    %61 = arith.mulf %58, %60 : vector<16x8xf32>
    %c0_31 = arith.constant 0 : index
    %c8 = arith.constant 8 : index
    %62 = vector.load %arg6[%c0_31, %c8] : memref<1x32xf32, #tpu.memory_space<vmem>>, vector<1x8xf32>
    %63 = vector.broadcast %62 : vector<1x8xf32> to vector<16x8xf32>
    %64 = arith.addf %44, %63 : vector<16x8xf32>
    %65 = arith.negf %64 : vector<16x8xf32>
    %66 = math.exp %65 : vector<16x8xf32>
    %cst_32 = arith.constant 1.000000e+00 : f32
    %67 = vector.broadcast %cst_32 : f32 to vector<16x8xf32>
    %68 = arith.addf %67, %66 : vector<16x8xf32>
    %69 = arith.divf %67, %68 : vector<16x8xf32>
    %70 = arith.mulf %69, %61 : vector<16x8xf32>
    %c0_33 = arith.constant 0 : index
    %c8_34 = arith.constant 8 : index
    %71 = vector.load %arg10[%c0_33, %c8_34] : memref<16x32xf32, #tpu.memory_space<vmem>>, vector<16x8xf32>
    tpu.vector_store %arg10[%c0_33, %c8_34], %70 {strides = array<i32>} : memref<16x32xf32, #tpu.memory_space<vmem>>, vector<16x8xf32>,
    %72 = vector.extract_strided_slice %3 {offsets = [0, 16], sizes = [16, 8], strides = [1, 1]} : vector<16x128xf32> to vector<16x8xf32>
    %73 = vector.extract_strided_slice %3 {offsets = [0, 48], sizes = [16, 8], strides = [1, 1]} : vector<16x128xf32> to vector<16x8xf32>
    %74 = vector.extract_strided_slice %3 {offsets = [0, 80], sizes = [16, 8], strides = [1, 1]} : vector<16x128xf32> to vector<16x8xf32>
    %75 = vector.extract_strided_slice %3 {offsets = [0, 112], sizes = [16, 8], strides = [1, 1]} : vector<16x128xf32> to vector<16x8xf32>
    %cst_35 = arith.constant dense<0.000000e+00> : vector<16x16xf32>
    %76 = tpu.matmul %72, %73, %cst_35 {dimension_numbers = #tpu.dot_dimension_numbers<[1], [1], [0], [0], [0, 0, 1, 0], [], []>} : vector<16x8xf32>, vector<16x8xf32>, vector<16x16xf32> -> vector<16x16xf32>
    %77 = vector.broadcast %9 : vector<1x16xf32> to vector<16x16xf32>
    %78 = arith.addf %76, %77 : vector<16x16xf32>
    %c0_36 = arith.constant 0 : index
    %c2 = arith.constant 2 : index
    %c0_37 = arith.constant 0 : index
    %c0_38 = arith.constant 0 : index
    %79 = vector.load %arg4[%c0_36, %c2, %c0_37, %c0_38] : memref<1x4x16x16xf32, #tpu.memory_space<vmem>>, vector<1x1x16x16xf32>
    %80 = vector.shape_cast %79 : vector<1x1x16x16xf32> to vector<16x16xf32>
    %81 = arith.addf %78, %80 : vector<16x16xf32>
    %cst_39 = arith.constant dense<0xFF800000> : vector<16xf32>
    %82 = vector.multi_reduction <maximumf>, %81, %cst_39 [1] : vector<16x16xf32> to vector<16xf32>
    %83 = vector.shape_cast %82 : vector<16xf32> to vector<16x1xf32>
    %84 = vector.broadcast %83 : vector<16x1xf32> to vector<16x16xf32>
    %85 = arith.subf %81, %84 : vector<16x16xf32>
    %86 = math.exp %85 : vector<16x16xf32>
    %cst_40 = arith.constant dense<0.000000e+00> : vector<16xf32>
    %87 = vector.multi_reduction <add>, %86, %cst_40 [1] : vector<16x16xf32> to vector<16xf32>
    %88 = vector.shape_cast %87 : vector<16xf32> to vector<16x1xf32>
    %cst_41 = arith.constant dense<0.000000e+00> : vector<16x8xf32>
    %89 = tpu.matmul %86, %74, %cst_41 {dimension_numbers = #tpu.dot_dimension_numbers<[1], [0], [0], [1], [0, 0, 1, 1], [], []>} : vector<16x16xf32>, vector<16x8xf32>, vector<16x8xf32> -> vector<16x8xf32>
    %90 = tpu.reciprocal %88 : vector<16x1xf32> -> vector<16x1xf32>
    %91 = vector.broadcast %90 : vector<16x1xf32> to vector<16x8xf32>
    %92 = arith.mulf %89, %91 : vector<16x8xf32>
    %c0_42 = arith.constant 0 : index
    %c16 = arith.constant 16 : index
    %93 = vector.load %arg6[%c0_42, %c16] : memref<1x32xf32, #tpu.memory_space<vmem>>, vector<1x8xf32>
    %94 = vector.broadcast %93 : vector<1x8xf32> to vector<16x8xf32>
    %95 = arith.addf %75, %94 : vector<16x8xf32>
    %96 = arith.negf %95 : vector<16x8xf32>
    %97 = math.exp %96 : vector<16x8xf32>
    %cst_43 = arith.constant 1.000000e+00 : f32
    %98 = vector.broadcast %cst_43 : f32 to vector<16x8xf32>
    %99 = arith.addf %98, %97 : vector<16x8xf32>
    %100 = arith.divf %98, %99 : vector<16x8xf32>
    %101 = arith.mulf %100, %92 : vector<16x8xf32>
    %c0_44 = arith.constant 0 : index
    %c16_45 = arith.constant 16 : index
    %102 = vector.load %arg10[%c0_44, %c16_45] : memref<16x32xf32, #tpu.memory_space<vmem>>, vector<16x8xf32>
    tpu.vector_store %arg10[%c0_44, %c16_45], %101 {strides = array<i32>} : memref<16x32xf32, #tpu.memory_space<vmem>>, vector<16x8xf32>,
    %103 = vector.extract_strided_slice %3 {offsets = [0, 24], sizes = [16, 8], strides = [1, 1]} : vector<16x128xf32> to vector<16x8xf32>
    %104 = vector.extract_strided_slice %3 {offsets = [0, 56], sizes = [16, 8], strides = [1, 1]} : vector<16x128xf32> to vector<16x8xf32>
    %105 = vector.extract_strided_slice %3 {offsets = [0, 88], sizes = [16, 8], strides = [1, 1]} : vector<16x128xf32> to vector<16x8xf32>
    %106 = vector.extract_strided_slice %3 {offsets = [0, 120], sizes = [16, 8], strides = [1, 1]} : vector<16x128xf32> to vector<16x8xf32>
    %cst_46 = arith.constant dense<0.000000e+00> : vector<16x16xf32>
    %107 = tpu.matmul %103, %104, %cst_46 {dimension_numbers = #tpu.dot_dimension_numbers<[1], [1], [0], [0], [0, 0, 1, 0], [], []>} : vector<16x8xf32>, vector<16x8xf32>, vector<16x16xf32> -> vector<16x16xf32>
    %108 = vector.broadcast %9 : vector<1x16xf32> to vector<16x16xf32>
    %109 = arith.addf %107, %108 : vector<16x16xf32>
    %c0_47 = arith.constant 0 : index
    %c3 = arith.constant 3 : index
    %c0_48 = arith.constant 0 : index
    %c0_49 = arith.constant 0 : index
    %110 = vector.load %arg4[%c0_47, %c3, %c0_48, %c0_49] : memref<1x4x16x16xf32, #tpu.memory_space<vmem>>, vector<1x1x16x16xf32>
    %111 = vector.shape_cast %110 : vector<1x1x16x16xf32> to vector<16x16xf32>
    %112 = arith.addf %109, %111 : vector<16x16xf32>
    %cst_50 = arith.constant dense<0xFF800000> : vector<16xf32>
    %113 = vector.multi_reduction <maximumf>, %112, %cst_50 [1] : vector<16x16xf32> to vector<16xf32>
    %114 = vector.shape_cast %113 : vector<16xf32> to vector<16x1xf32>
    %115 = vector.broadcast %114 : vector<16x1xf32> to vector<16x16xf32>
    %116 = arith.subf %112, %115 : vector<16x16xf32>
    %117 = math.exp %116 : vector<16x16xf32>
    %cst_51 = arith.constant dense<0.000000e+00> : vector<16xf32>
    %118 = vector.multi_reduction <add>, %117, %cst_51 [1] : vector<16x16xf32> to vector<16xf32>
    %119 = vector.shape_cast %118 : vector<16xf32> to vector<16x1xf32>
    %cst_52 = arith.constant dense<0.000000e+00> : vector<16x8xf32>
    %120 = tpu.matmul %117, %105, %cst_52 {dimension_numbers = #tpu.dot_dimension_numbers<[1], [0], [0], [1], [0, 0, 1, 1], [], []>} : vector<16x16xf32>, vector<16x8xf32>, vector<16x8xf32> -> vector<16x8xf32>
    %121 = tpu.reciprocal %119 : vector<16x1xf32> -> vector<16x1xf32>
    %122 = vector.broadcast %121 : vector<16x1xf32> to vector<16x8xf32>
    %123 = arith.mulf %120, %122 : vector<16x8xf32>
    %c0_53 = arith.constant 0 : index
    %c24 = arith.constant 24 : index
    %124 = vector.load %arg6[%c0_53, %c24] : memref<1x32xf32, #tpu.memory_space<vmem>>, vector<1x8xf32>
    %125 = vector.broadcast %124 : vector<1x8xf32> to vector<16x8xf32>
    %126 = arith.addf %106, %125 : vector<16x8xf32>
    %127 = arith.negf %126 : vector<16x8xf32>
    %128 = math.exp %127 : vector<16x8xf32>
    %cst_54 = arith.constant 1.000000e+00 : f32
    %129 = vector.broadcast %cst_54 : f32 to vector<16x8xf32>
    %130 = arith.addf %129, %128 : vector<16x8xf32>
    %131 = arith.divf %129, %130 : vector<16x8xf32>
    %132 = arith.mulf %131, %123 : vector<16x8xf32>
    %c0_55 = arith.constant 0 : index
    %c24_56 = arith.constant 24 : index
    %133 = vector.load %arg10[%c0_55, %c24_56] : memref<16x32xf32, #tpu.memory_space<vmem>>, vector<16x8xf32>
    tpu.vector_store %arg10[%c0_55, %c24_56], %132 {strides = array<i32>} : memref<16x32xf32, #tpu.memory_space<vmem>>, vector<16x8xf32>,
    %c0_57 = arith.constant 0 : index
    %c0_58 = arith.constant 0 : index
    %134 = vector.load %arg10[%c0_57, %c0_58] : memref<16x32xf32, #tpu.memory_space<vmem>>, vector<16x32xf32>
    %c0_59 = arith.constant 0 : index
    %c0_60 = arith.constant 0 : index
    %135 = vector.load %arg7[%c0_59, %c0_60] : memref<32x128xf32, #tpu.memory_space<vmem>>, vector<32x128xf32>
    %cst_61 = arith.constant dense<0.000000e+00> : vector<16x128xf32>
    %136 = tpu.matmul %134, %135, %cst_61 {dimension_numbers = #tpu.dot_dimension_numbers<[1], [0], [0], [1], [0, 0, 1, 1], [], []>} : vector<16x32xf32>, vector<32x128xf32>, vector<16x128xf32> -> vector<16x128xf32>
    %c0_62 = arith.constant 0 : index
    %c0_63 = arith.constant 0 : index
    %137 = vector.load %arg8[%c0_62, %c0_63] : memref<1x128xf32, #tpu.memory_space<vmem>>, vector<1x128xf32>
    %138 = vector.broadcast %137 : vector<1x128xf32> to vector<16x128xf32>
    %139 = arith.addf %136, %138 : vector<16x128xf32>
    %c0_64 = arith.constant 0 : index
    %c0_65 = arith.constant 0 : index
    %c0_66 = arith.constant 0 : index
    %c0_67 = arith.constant 0 : index
    %140 = vector.load %arg9[%c0_64, %c0_65, %c0_66, %c0_67] : memref<1x1x16x128xf32, #tpu.memory_space<vmem>>, vector<1x1x16x128xf32>
    %141 = vector.shape_cast %140 : vector<1x1x16x128xf32> to vector<16x128xf32>
    %142 = vector.shape_cast %139 : vector<16x128xf32> to vector<1x1x16x128xf32>
    tpu.vector_store %arg9[%c0_64, %c0_65, %c0_66, %c0_67], %142 {strides = array<i32>} : memref<1x1x16x128xf32, #tpu.memory_space<vmem>>, vector<1x1x16x128xf32>,
    return
  }
  func.func @transform_0(%arg0: i32, %arg1: i32) -> (i32, i32, i32, i32) {
    %c0_i32 = arith.constant 0 : i32
    %c0_i32_0 = arith.constant 0 : i32
    %c0_i32_1 = arith.constant 0 : i32
    return %arg0, %arg1, %c0_i32, %c0_i32_0 : i32, i32, i32, i32
  }
  func.func @transform_1(%arg0: i32, %arg1: i32) -> (i32, i32, i32, i32) {
    %c0_i32 = arith.constant 0 : i32
    %c0_i32_0 = arith.constant 0 : i32
    %c0_i32_1 = arith.constant 0 : i32
    return %arg0, %arg1, %c0_i32, %c0_i32_0 : i32, i32, i32, i32
  }
  func.func @transform_2(%arg0: i32, %arg1: i32) -> (i32, i32, i32, i32) {
    %c0_i32 = arith.constant 0 : i32
    %c0_i32_0 = arith.constant 0 : i32
    %c0_i32_1 = arith.constant 0 : i32
    %c0_i32_2 = arith.constant 0 : i32
    return %arg0, %c0_i32, %c0_i32_0, %c0_i32_1 : i32, i32, i32, i32
  }
  func.func @transform_3(%arg0: i32, %arg1: i32) -> (i32, i32) {
    %c0_i32 = arith.constant 0 : i32
    %c0_i32_0 = arith.constant 0 : i32
    %c0_i32_1 = arith.constant 0 : i32
    return %c0_i32, %c0_i32_0 : i32, i32
  }
  func.func @transform_4(%arg0: i32, %arg1: i32) -> (i32, i32) {
    %c0_i32 = arith.constant 0 : i32
    %c0_i32_0 = arith.constant 0 : i32
    %c0_i32_1 = arith.constant 0 : i32
    return %c0_i32, %c0_i32_0 : i32, i32
  }
  func.func @transform_5(%arg0: i32, %arg1: i32) -> (i32, i32) {
    %c0_i32 = arith.constant 0 : i32
    %c0_i32_0 = arith.constant 0 : i32
    %c0_i32_1 = arith.constant 0 : i32
    return %c0_i32, %c0_i32_0 : i32, i32
  }
  func.func @transform_6(%arg0: i32, %arg1: i32) -> (i32, i32) {
    %c0_i32 = arith.constant 0 : i32
    %c0_i32_0 = arith.constant 0 : i32
    %c0_i32_1 = arith.constant 0 : i32
    return %c0_i32, %c0_i32_0 : i32, i32
  }
  func.func @transform_7(%arg0: i32, %arg1: i32) -> (i32, i32, i32, i32) {
    %c0_i32 = arith.constant 0 : i32
    %c0_i32_0 = arith.constant 0 : i32
    %c0_i32_1 = arith.constant 0 : i32
    return %arg0, %arg1, %c0_i32, %c0_i32_0 : i32, i32, i32, i32
  }
}

</mosaic_0001>

<bundles_post_ra>
// kernel: tpu_custom_call.1
= control target key start
LH: loop header
LB: loop body
LE: loop exit
PB: predicated region body
PF: predicated region fallthrough
CT: control target
= control target key end

     0   :  { %s3329_s0 = inlined_call_operand.hbm [shape: f32[2,3,16,32], index: 0, kind: input, shape index: {}]   ;;  %s3330_s1 = inlined_call_operand.hbm [shape: f32[2,3,1,16], index: 1, kind: input, shape index: {}]   ;;  %s3331_s2 = inlined_call_operand.hbm [shape: f32[2,4,16,16], index: 2, kind: input, shape index: {}]   ;;  %s3332_s3 = inlined_call_operand.hbm [shape: f32[32,128], index: 3, kind: input, shape index: {}]   ;;  %s3333_s4 = inlined_call_operand.hbm [shape: f32[1,32], index: 4, kind: input, shape index: {}]   ;;  %s3334_s5 = inlined_call_operand.hbm [shape: f32[32,128], index: 5, kind: input, shape index: {}]   ;;  %s3335_s6 = inlined_call_operand.hbm [shape: f32[1,128], index: 6, kind: input, shape index: {}]   ;;  %s3336_s7 = inlined_call_operand.hbm [shape: f32[2,3,16,128], index: 7, kind: output, shape index: {}]  }
   0x1   :  { %3353 = sst [smem:[#allocation30_spill]] %s3329_s0 }
   0x2   :  { %3354 = sst [smem:[#allocation31_spill]] %s3331_s2 }
   0x3   :  { %3355 = sst [smem:[#allocation32_spill]] %s3332_s3 }
   0x4   :  { %3356 = sst [smem:[#allocation33_spill]] %s3333_s4 }
   0x5   :  { %3357 = sst [smem:[#allocation34_spill]] %s3334_s5 }
   0x6   :  { %3358 = sst [smem:[#allocation35_spill]] %s3335_s6 }
   0x7   :  { %3359 = sst [smem:[#allocation36_spill]] %s3336_s7 }
   0x8   :  { %12 = vsyncpa [#allocation4], 0 }
   0x9   :  { %14 = vsyncpa [#allocation4 + $0x1], 0 }
   0xa   :  { %15 = vsyncpa [#allocation7], 0 }
   0xb   :  { %17 = vsyncpa [#allocation7 + $0x1], 0 }
   0xc   :  { %18 = vsyncpa [#allocation10], 0 }
   0xd   :  { %19 = vsyncpa [#allocation13], 0 }
   0xe   :  { %20 = vsyncpa [#allocation5], 0 }
   0xf   :  { %22 = vsyncpa [#allocation5 + $0x1], 0  ;;  %s2723_s24 = smov 0   ;;  %s2725_s25 = smov 0  }
  0x10   :  { %s2727_s26 = smov 0   ;;  %s2729_s27 = smov 0  }
  0x11   :  { %s2731_s28 = smov 0   ;;  %s2733_s29 = smov 0  }
  0x12   :  { %s2735_s30 = smov 0   ;;  %s2737_s8 = smov 0  }
  0x13   :  { %s2739_s9 = smov 0   ;;  %s2741_s10 = smov 0  }
  0x14   :  { %s2743_s11 = smov 0  }
  0x15 LB: > { %3360 = sst [smem:[#allocation22_spill]] %s2621_s25  ;;  %s2777_s12 = sadd.s32 4294967295, %s2657_s11   ;;  %s2657_s11 = sphi %s2743_s11, %s28_s11   ;;  %s2653_s10 = sphi %s2741_s10, %s3415_s10   ;;  %s2649_s9 = sphi %s2739_s9, %s3414_s9   ;;  %s2645_s8 = sphi %s2737_s8, %s3413_s8   ;;  %s2641_s30 = sphi %s2735_s30, %s3412_s30   ;;  %s2637_s29 = sphi %s2733_s29, %s3405_s29   ;;  %s2633_s28 = sphi %s2731_s28, %s3411_s28   ;;  %s2629_s27 = sphi %s2729_s27, %s3410_s27   ;;  %s2625_s26 = sphi %s2727_s26, %s3409_s26   ;;  %s2621_s25 = sphi %s2725_s25, %s3408_s25   ;;  %s2617_s24 = sphi %s2723_s24, %s3403_s24  }
  0x16   : > { %3361 = sst [smem:[#allocation23_spill]] %s2637_s29  ;;  %p116_p0 = scmp.ne.s32.totalorder %s2621_s25, %s2617_s24 }
  0x17   : > { %3362 = sst [smem:[#allocation24_spill]] %s2641_s30  ;;  %p3339_p1 = scmp.eq.s32.totalorder %s2777_s12, 0 }
  0x18   : > { %3363 = sst [smem:[#allocation25_spill]] %s2645_s8  ;;  %p1795_p2 = scmp.ge.s32.totalorder %s2657_s11, 1 }
  0x19   : > { %p239_p3 = scmp.lt.s32.totalorder %s2657_s11, 7  ;;  %s1861_s13 = sshll.u32 %s2645_s8, 10 }
  0x1a   : > { %p2786_p4 = por %p116_p0, %p3339_p1  ;;  %s3366_s2 = sld [smem:[#allocation31_spill]] }
  0x1b   : > { %p2795_p5 = pnand %p1795_p2, %p239_p3  ;;  %s2659_s19 = smov [#allocation8]  }
  0x1c   : > { %s3364_s14 = scalar_select %p2786_p4, 1, 0 }
  0x1d   : > { %s3367_s18 = scalar_select %p2795_p5, 1, 0 }
  0x1e   : > { %3365 = sst [smem:[#allocation26_spill]] %s3364_s14  ;;  %s254_s20 = sshll.u32 %s2659_s19, 4  ;;  %s2801_s20 = int_to_ptr.vmem [resolvable:$true] %s254_s20 }
  0x1f   : > { %p2067_p6 = pneg %p2795_p5  ;;  %s2660_s23 = smov [#allocation9]  }
  0x20   : > { %s2793_s17 = scalar_lea.hbm %s3366_s2, %s1861_s13  ;;  %s2815_s24 = sshll.u32 %s2660_s23, 4  ;;  %s268_s24 = int_to_ptr.vmem [resolvable:$true] %s2815_s24 }
  0x21   : > { %p2805_p7 = pnand %p2067_p6, %p2786_p4  ;;  %p2811_p8 = pnand %p2067_p6, %p3339_p1 }
  0x22   : > { %s2317_s13 = scalar_lea.hbm %s2793_s17, 1024  ;;  %s2322_s19 = scalar_lea.hbm %s3366_s2, 2048 }
  0x23   : > { %s3369_s22 = scalar_select %p2811_p8, 1, 0 }
  0x24   : > { %p2318_p9 = scmp.ne.s32.totalorder %s2793_s17, %s2317_s13  ;;  %p2319_p10 = pneg %p2805_p7 }
  0x25   : > { %p2323_p13 = scmp.lt.u32.totalorder %s2793_s17, %s3366_s2  ;;  %p2324_p0 = scmp.lt.u32.totalorder %s2322_s19, %s2317_s13 }
  0x26   : > { %p2320_p11 = pnand %p2319_p10, %p2318_p9  ;;  %p2326_p3 = scmp.lt.u32.totalorder %s2317_s13, %s2793_s17 }
  0x27   : > { %p2325_p2 = por %p2324_p0, %p2323_p13 }
  0x28   : > { %p2321_p12 = pneg %p2320_p11 }
  0x29   : > { %p2327_p6 = por %p2326_p3, %p2325_p2 }
  0x2b   : > { %p2328_p1 = pnand %p2327_p6, %p2321_p12 }
  0x2d   : > { %2331 = shalt.err (!%p2328_p1)
}
  0x2e   : > { %s2332_s23 = scalar_lea.vmem %s2801_s20, 1024  ;;  %p2340_p5 = scmp.lt.s32.totalorder %s2801_s20, %s2801_s20 }
  0x2f   : > { %p2333_p9 = scmp.ne.s32.totalorder %s2801_s20, %s2332_s23  ;;  %p2341_p8 = scmp.lt.s32.totalorder %s2332_s23, %s2332_s23 }
  0x31   : > { %p2335_p11 = pnand %p2333_p9, %p2319_p10  ;;  %p2342_p0 = por %p2341_p8, %p2340_p5 }
  0x33   : > { %p2336_p4 = pneg %p2335_p11 }
  0x35   : > { %p2343_p13 = pnand %p2342_p0, %p2336_p4 }
  0x37   : > { %2346 = shalt.err (!%p2343_p13)
}
  0x38   : > { %s3347_s7 = smov 128   ;;  %s3348_s25 = smov 8  }
  0x39   : > { %2070 = dma.hbm_to_vmem [thread:$0]  (!%p2805_p7), %s2793_s17, 1024, %s2801_s20, [#allocation7], %s3347_s7, %s3347_s7, %s3348_s25  }
  0x3a   : > { %s3370_s3 = sld [smem:[#allocation32_spill]]  ;;  %p3371_p4 = scmp.ne.s32.totalorder %s3369_s22, 0 }
  0x3c   : > { %p2855_p5 = pneg %p3371_p4 }
  0x40   : > { %s2347_s16 = scalar_lea.hbm %s3370_s3, 512 }
  0x41   : > { %p2348_p1 = scmp.ne.s32.totalorder %s3370_s3, %s2347_s16  ;;  %p2354_p7 = scmp.lt.u32.totalorder %s2347_s16, %s3370_s3 }
  0x43   : > { %p2350_p8 = pnand %p2855_p5, %p2348_p1 }
  0x45   : > { %p2351_p10 = pneg %p2350_p8 }
  0x47   : > { %p2356_p12 = pnand %p2354_p7, %p2351_p10 }
  0x49   : > { %2359 = shalt.err (!%p2356_p12)
}
  0x4a   : > { %s2360_s20 = scalar_lea.vmem %s268_s24, 512  ;;  %p2368_p9 = scmp.lt.s32.totalorder %s268_s24, %s268_s24 }
  0x4b   : > { %p2361_p2 = scmp.ne.s32.totalorder %s268_s24, %s2360_s20  ;;  %p2369_p11 = scmp.lt.s32.totalorder %s2360_s20, %s2360_s20 }
  0x4d   : > { %p2363_p3 = pnand %p2361_p2, %p2855_p5  ;;  %p2370_p0 = por %p2369_p11, %p2368_p9 }
  0x4f   : > { %p2364_p6 = pneg %p2363_p3 }
  0x51   : > { %p2371_p13 = pnand %p2370_p0, %p2364_p6 }
  0x53   : > { %2374 = shalt.err (!%p2371_p13)
}
  0x54   : > { %2073 = dma.hbm_to_vmem [thread:$0]  (!%p3371_p4), %s3370_s3, 512, %s268_s24, [#allocation10], %s3347_s7, %s3347_s7, %s3348_s25  }
  0x55   : > { %s2663_s16 = smov [#allocation12]   ;;  %s2664_s23 = smov [#allocation11]  }
  0x56   : > { %s291_s19 = sshll.u32 %s2663_s16, 4  ;;  %s281_s21 = sshll.u32 %s2664_s23, 4  ;;  %s292_s19 = int_to_ptr.vmem [resolvable:$true] %s291_s19  ;;  %s2874_s21 = int_to_ptr.vmem [resolvable:$true] %s281_s21 }
  0x57   : > { %s3373_s5 = sld [smem:[#allocation34_spill]] }
  0x5d   : > { %s2375_s30 = scalar_lea.hbm %s3373_s5, 512 }
  0x5e   : > { %p2376_p1 = scmp.ne.s32.totalorder %s3373_s5, %s2375_s30  ;;  %p2382_p7 = scmp.lt.u32.totalorder %s2375_s30, %s3373_s5 }
  0x60   : > { %p2378_p8 = pnand %p2376_p1, %p2855_p5 }
  0x62   : > { %p2379_p10 = pneg %p2378_p8 }
  0x64   : > { %p2384_p12 = pnand %p2382_p7, %p2379_p10 }
  0x66   : > { %2387 = shalt.err (!%p2384_p12)
}
  0x67   : > { %s2388_s15 = scalar_lea.vmem %s292_s19, 512  ;;  %p2396_p9 = scmp.lt.s32.totalorder %s292_s19, %s292_s19 }
  0x68   : > { %p2389_p2 = scmp.ne.s32.totalorder %s292_s19, %s2388_s15  ;;  %p2397_p11 = scmp.lt.s32.totalorder %s2388_s15, %s2388_s15 }
  0x6a   : > { %p2391_p3 = pnand %p2389_p2, %p2855_p5  ;;  %p2398_p0 = por %p2397_p11, %p2396_p9 }
  0x6c   : > { %p2392_p6 = pneg %p2391_p3 }
  0x6e   : > { %p2399_p13 = pnand %p2398_p0, %p2392_p6 }
  0x70   : > { %2402 = shalt.err (!%p2399_p13)
}
  0x71   : > { %2079 = dma.hbm_to_vmem [thread:$0]  (!%p3371_p4), %s3373_s5, 512, %s292_s19, [#allocation13], %s3347_s7, %s3347_s7, %s3348_s25  }
  0x72   : > { %s3374_s4 = sld [smem:[#allocation33_spill]] }
  0x78   : > { %s2403_s23 = scalar_lea.hbm %s3374_s4, 16 }
  0x79   : > { %p2404_p1 = scmp.ne.s32.totalorder %s3374_s4, %s2403_s23  ;;  %p2410_p7 = scmp.lt.u32.totalorder %s2403_s23, %s3374_s4 }
  0x7b   : > { %p2406_p8 = pnand %p2404_p1, %p2855_p5 }
  0x7d   : > { %p2407_p10 = pneg %p2406_p8 }
  0x7f   : > { %p2412_p12 = pnand %p2410_p7, %p2407_p10 }
  0x81   : > { %2415 = shalt.err (!%p2412_p12)
}
  0x82   : > { %s2416_s19 = scalar_lea.vmem %s2874_s21, 16  ;;  %s2423_s15 = scalar_lea.vmem %s2874_s21, 32 }
  0x83   : > { %p2417_p2 = scmp.ne.s32.totalorder %s2874_s21, %s2416_s19  ;;  %p2424_p9 = scmp.lt.s32.totalorder %s2874_s21, %s2874_s21 }
  0x84   : > { %p2425_p11 = scmp.lt.s32.totalorder %s2423_s15, %s2416_s19 }
  0x85   : > { %p2419_p3 = pnand %p2417_p2, %p2855_p5 }
  0x86   : > { %p2426_p0 = por %p2425_p11, %p2424_p9 }
  0x87   : > { %p2420_p6 = pneg %p2419_p3 }
  0x89   : > { %p2427_p13 = pnand %p2426_p0, %p2420_p6 }
  0x8b   : > { %2430 = shalt.err (!%p2427_p13)
}
  0x8c   : > { %2076 = dma.hbm_to_vmem [thread:$0]  (!%p3371_p4), %s3374_s4, 16, %s2874_s21, [#allocation10]  }
  0x8d   : > { %s2665_s14 = smov [#allocation14]   ;;  %s3375_s6 = sld [smem:[#allocation35_spill]] }
  0x8e   : > { %s305_s16 = sshll.u32 %s2665_s14, 4  ;;  %s306_s16 = int_to_ptr.vmem [resolvable:$true] %s305_s16 }
  0x93   : > { %s2431_s20 = scalar_lea.hbm %s3375_s6, 16 }
  0x94   : > { %p2432_p1 = scmp.ne.s32.totalorder %s3375_s6, %s2431_s20  ;;  %p2438_p7 = scmp.lt.u32.totalorder %s2431_s20, %s3375_s6 }
  0x96   : > { %p2434_p8 = pnand %p2432_p1, %p2855_p5 }
  0x98   : > { %p2435_p10 = pneg %p2434_p8 }
  0x9a   : > { %p2440_p12 = pnand %p2438_p7, %p2435_p10 }
  0x9c   : > { %2443 = shalt.err (!%p2440_p12)
}
  0x9d   : > { %s2444_s21 = scalar_lea.vmem %s306_s16, 16  ;;  %s2451_s8 = scalar_lea.vmem %s306_s16, 32 }
  0x9e   : > { %p2445_p2 = scmp.ne.s32.totalorder %s306_s16, %s2444_s21  ;;  %p2452_p9 = scmp.lt.s32.totalorder %s306_s16, %s306_s16 }
  0x9f   : > { %p2453_p11 = scmp.lt.s32.totalorder %s2451_s8, %s2444_s21 }
  0xa0   : > { %p2447_p3 = pnand %p2445_p2, %p2855_p5 }
  0xa1   : > { %p2454_p0 = por %p2453_p11, %p2452_p9 }
  0xa2   : > { %p2448_p6 = pneg %p2447_p3 }
  0xa4   : > { %p2455_p13 = pnand %p2454_p0, %p2448_p6 }
  0xa6   : > { %2458 = shalt.err (!%p2455_p13)
}
  0xa7   : > { %2082 = dma.hbm_to_vmem [thread:$0]  (!%p3371_p4), %s3375_s6, 16, %s306_s16, [#allocation13]  }
  0xa8   : > { %s1794_s2 = sadd.s32 4294967294, %s2657_s11   ;;  %s37_s22 = sadd.s32 1, %s2649_s9 }
  0xa9   : > { %s40_s23 = sadd.s32 1, %s2653_s10  ;;  %p38_p5 = scmp.ge.s32.totalorder %s37_s22, 3 }
  0xaa   : > { %s49_s17 = sadd.s32 1, %s2637_s29  ;;  %p56_p1 = scmp.ne.s32.totalorder %s2637_s29, %s2633_s28 }
  0xab   : > { %p57_p8 = scmp.eq.s32.totalorder %s2657_s11, 0  ;;  %s3417_s22 = smov (%p38_p5, %s37_s22), 0 }
  0xac   : > { %3376 = sst [smem:[#allocation27_spill]] %s3417_s22  ;;  %s3419_s23 = smov (!%p38_p5, %s40_s23), %s2653_s10 }
  0xad   : > { %s45_s20 = ssub.s32 %s2649_s9, %s3417_s22  ;;  %p2951_p10 = por %p57_p8, %p56_p1 }
  0xae   : > { %p42_p4 = scmp.ge.s32.totalorder %s3419_s23, 2  ;;  %p62_p7 = scmp.ne.s32.totalorder %s2633_s28, %s2629_s27 }
  0xaf   : > { %s103_s16 = sadd.s32 1, %s2625_s26  ;;  %p226_p12 = scmp.eq.s32.totalorder %s2777_s12, 5 }
  0xb0   : > { %s3421_s23 = smov (%p42_p4, %s3419_s23), 0  ;;  %p3379_p2 = scmp.eq.s32.totalorder %s2777_s12, 0 }
  0xb1   : > { %3378 = sst [smem:[#allocation28_spill]] %s3421_s23  ;;  %p2967_p6 = por %p226_p12, %p56_p1 }
  0xb2   : > { %p2963_p3 = por %p3379_p2, %p62_p7  ;;  %s44_s15 = ssub.s32 %s2653_s10, %s3421_s23 }
  0xb3   : > { %s3381_s19 = scalar_select %p2967_p6, 1, 0 }
  0xb4   : > { %p232_p9 = scmp.eq.s32.totalorder %s1794_s2, 5  ;;  %s46_s21 = sor.u32 %s45_s20, %s44_s15 }
  0xb5   : > { %p101_p11 = scmp.eq.s32.totalorder %s44_s15, 0  ;;  %p47_p0 = scmp.eq.s32.totalorder %s46_s21, 0 }
  0xb6   : > { %p2973_p13 = por %p232_p9, %p62_p7  ;;  %p2098_p5 = scmp.lt.s32.totalorder %s2657_s11, 6 }
  0xb7   : > { %s2978_s30 = scalar_select %p101_p11, %s2625_s26, %s103_s16  }
  0xb8   : > { %s3382_s8 = scalar_select %p2973_p13, 1, 0 }
  0xb9   : > { %s2981_s14 = scalar_select %p47_p0, %s2637_s29, %s49_s17  }
  0xba   : > { %s2985_s7 = sand.u32 1, %s2637_s29   ;;  %s1804_s3 = sshll.u32 %s2649_s9, 1 }
  0xbb   : > { %3383 = sst [smem:[#allocation29_spill]] %s2981_s14  ;;  %s1803_s25 = sshll.u32 %s2985_s7, 4 }
  0xbc   : > { %s2040_s2 = smul.u32 6, %s2653_s10  ;;  %s320_s20 = scalar_lea.vmem [#allocation3], %s1803_s25 }
  0xbd   : > { %s329_s15 = sshll.u32 %s320_s20, 4  ;;  %p2992_p1 = pnand %p2098_p5, %p2951_p10  ;;  %s2996_s15 = int_to_ptr.vmem [resolvable:$true] %s329_s15 }
  0xbe   : > { %s326_s16 = sadd.s32 %s2040_s2, %s1804_s3  ;;  %s3385_s0 = sld [smem:[#allocation30_spill]] }
  0xbf   : > { %s1805_s17 = sshll.u32 %s326_s16, 7  ;;  %s317_s13 = scalar_lea.sflag [#allocation4], %s2985_s7 }
  0xc0   : > { %p2461_p10 = pneg %p2992_p1 }
  0xc4   : > { %s3001_s6 = scalar_lea.hbm %s3385_s0, %s1805_s17  ;;  %s2464_s4 = scalar_lea.hbm %s3385_s0, 1536 }
  0xc5   : > { %s2459_s20 = scalar_lea.hbm %s3001_s6, 256  ;;  %p2465_p12 = scmp.lt.u32.totalorder %s3001_s6, %s3385_s0 }
  0xc6   : > { %p2460_p8 = scmp.ne.s32.totalorder %s3001_s6, %s2459_s20  ;;  %p2466_p2 = scmp.lt.u32.totalorder %s2464_s4, %s2459_s20 }
  0xc7   : > { %p2468_p11 = scmp.lt.u32.totalorder %s2459_s20, %s3001_s6 }
  0xc8   : > { %p2462_p4 = pnand %p2461_p10, %p2460_p8  ;;  %p2467_p9 = por %p2466_p2, %p2465_p12 }
  0xca   : > { %p2463_p7 = pneg %p2462_p4  ;;  %p2469_p0 = por %p2468_p11, %p2467_p9 }
  0xcc   : > { %p2470_p5 = pnand %p2469_p0, %p2463_p7 }
  0xce   : > { %2473 = shalt.err (!%p2470_p5)
}
  0xcf   : > { %s2474_s17 = scalar_lea.vmem %s2996_s15, 256  ;;  %s2666_s3 = smov [#allocation3]  }
  0xd0   : > { %p2475_p8 = scmp.ne.s32.totalorder %s2996_s15, %s2474_s17  ;;  %s2479_s2 = sshll.u32 %s2666_s3, 4  ;;  %s2480_s2 = int_to_ptr.vmem [resolvable:$false] %s2479_s2 }
  0xd1   : > { %s2481_s5 = scalar_lea.vmem %s2480_s2, 512  ;;  %p2482_p6 = scmp.lt.s32.totalorder %s2996_s15, %s2480_s2 }
  0xd2   : > { %p2477_p4 = pnand %p2475_p8, %p2461_p10  ;;  %p2483_p12 = scmp.lt.s32.totalorder %s2481_s5, %s2474_s17 }
  0xd4   : > { %p2478_p13 = pneg %p2477_p4  ;;  %p2484_p2 = por %p2483_p12, %p2482_p6 }
  0xd6   : > { %p2485_p9 = pnand %p2484_p2, %p2478_p13 }
  0xd8   : > { %2488 = shalt.err (!%p2485_p9)
}
  0xd9   : > { %s3386_s20 = smov 8   ;;  %s3387_s4 = smov 128  }
  0xda   : > { %2086 = dma.hbm_to_vmem [thread:$0]  (!%p2992_p1), %s3001_s6, 256, %s2996_s15, %s317_s13, %s3387_s4, %s3387_s4, %s3386_s20  }
  0xdb   : > { %s2041_s16 = smul.u32 3, %s2653_s10  ;;  %s342_s17 = scalar_lea.vmem [#allocation6], %s2985_s7 }
  0xdc   : > { %s351_s3 = sshll.u32 %s342_s17, 4  ;;  %s3388_s22 = sand.u32 1, %s2657_s11   ;;  %s3038_s3 = int_to_ptr.vmem [resolvable:$true] %s351_s3 }
  0xdd   : > { %s347_s2 = sadd.s32 %s2649_s9, %s2041_s16  ;;  %s340_s14 = scalar_lea.sflag [#allocation7], %s3388_s22 }
  0xde   : > { %s1806_s5 = sshll.u32 %s347_s2, 4  ;;  %s2494_s7 = scalar_lea.hbm %s3330_s1, 96 }
  0xdf   : > { %s349_s23 = scalar_lea.hbm %s3330_s1, %s1806_s5 }
  0xe0   : > { %s2489_s29 = scalar_lea.hbm %s349_s23, 16  ;;  %p2495_p11 = scmp.lt.u32.totalorder %s349_s23, %s3330_s1 }
  0xe1   : > { %p2490_p6 = scmp.ne.s32.totalorder %s349_s23, %s2489_s29  ;;  %p2496_p0 = scmp.lt.u32.totalorder %s2494_s7, %s2489_s29 }
  0xe2   : > { %p2498_p8 = scmp.lt.u32.totalorder %s2489_s29, %s349_s23 }
  0xe3   : > { %p2492_p13 = pnand %p2490_p6, %p2461_p10  ;;  %p2497_p5 = por %p2496_p0, %p2495_p11 }
  0xe5   : > { %p2493_p7 = pneg %p2492_p13  ;;  %p2499_p4 = por %p2498_p8, %p2497_p5 }
  0xe7   : > { %p2500_p12 = pnand %p2499_p4, %p2493_p7 }
  0xe9   : > { %2503 = shalt.err (!%p2500_p12)
}
  0xea   : > { %s2504_s0 = scalar_lea.vmem %s3038_s3, 16  ;;  %s2667_s22 = smov [#allocation6]  }
  0xeb   : > { %p2505_p2 = scmp.ne.s32.totalorder %s3038_s3, %s2504_s0  ;;  %s2509_s25 = sshll.u32 %s2667_s22, 4  ;;  %s2510_s25 = int_to_ptr.vmem [resolvable:$false] %s2509_s25 }
  0xec   : > { %s2511_s4 = scalar_lea.vmem %s2510_s25, 32  ;;  %p2512_p13 = scmp.lt.s32.totalorder %s3038_s3, %s2510_s25 }
  0xed   : > { %p2507_p9 = pnand %p2505_p2, %p2461_p10  ;;  %p2513_p11 = scmp.lt.s32.totalorder %s2511_s4, %s2504_s0 }
  0xef   : > { %p2508_p6 = pneg %p2507_p9  ;;  %p2514_p0 = por %p2513_p11, %p2512_p13 }
  0xf1   : > { %p2515_p5 = pnand %p2514_p0, %p2508_p6 }
  0xf3   : > { %2518 = shalt.err (!%p2515_p5)
}
  0xf4   : > { %2089 = dma.hbm_to_vmem [thread:$0]  (!%p2992_p1), %s349_s23, 16, %s3038_s3, %s340_s14  }
  0xf5   : > { %p3389_p7 = scmp.ne.s32.totalorder %s3367_s18, 0 }
  0xf6   : > { %s3066_s29 = sand.u32 (!%p3389_p7), 1, %s2633_s28  }
  0xf7   : > { %360 = sbr.rel (%p3389_p7) target bundleno = 2841 (0xb19), region = 48  ;;  %s1808_s16 = sshll.u32 (!%p3389_p7), %s3066_s29, 4 }
  0xf8   : > { %s363_s17 = scalar_lea.sflag (!%p3389_p7), [#allocation4], %s3066_s29  ;;  %s366_s2 = scalar_lea.vmem (!%p3389_p7), [#allocation3], %s1808_s16 }
  0xfe   : > { %2592 = dma.done.wait (%p2963_p3), %s363_s17, 256  }
  0xff   : > { %2594 = vsyncadd (%p2963_p3), %s363_s17, 4294967040  ;;  %s371_s18 = sand.u32 1, %s2777_s12   ;;  %s374_s14 = scalar_lea.vmem [#allocation6], %s3066_s29 }
 0x100   : > { %s372_s23 = scalar_lea.sflag [#allocation7], %s371_s18 }
 0x101   : > { %2596 = dma.done.wait (%p2963_p3), %s372_s23, 16  }
 0x102   : > { %2598 = vsyncadd (%p2963_p3), %s372_s23, 4294967280  ;;  %s3390_s21 = sld [smem:[#allocation26_spill]] }
 0x108   : > { %p3391_p1 = scmp.ne.s32.totalorder %s3390_s21, 0 }
 0x10a   : > { %2600 = dma.done.wait (%p3391_p1), [#allocation7], 1024  }
 0x10b   : > { %2602 = vsyncadd (%p3391_p1), [#allocation7], 4294966272  ;;  %p3392_p10 = scmp.eq.s32.totalorder %s2777_s12, 0 }
 0x10d   : > { %2604 = dma.done.wait (%p3392_p10), [#allocation10], 528   ;;  %p3393_p8 = pmov %p3392_p10 }
 0x10f   : > { %2606 = vsyncadd (%p3393_p8), [#allocation10], 4294966768  ;;  %p3394_p4 = pmov %p3393_p8 }
 0x111   : > { %2608 = dma.done.wait (%p3394_p4), [#allocation13], 528   ;;  %p3395_p12 = pmov %p3394_p4 }
 0x112   : > { %vm435_vm0 = vcmask 261120   ;;  %v431_v0 = vld [vmem:[#allocation9] sm:$0xff]  ;;  %v432_v1 = vld [vmem:[#allocation9 + $0x8] sm:$0xff]  ;;  %v433_v2 = vld [vmem:[#allocation9 + $0x10] sm:$0xff]  ;;  %vm532_vm1 = vcmask 64512   ;;  %s2668_s12 = smov 96   ;;  %v521_v16 = vlaneseq }
 0x113   : > { %2610 = vsyncadd (%p3395_p12), [#allocation13], 4294966768  ;;  %v1984_v3 = vpack.c.bf16 %v432_v1, %v431_v0  ;;  %v434_v4 = vld [vmem:[#allocation9 + $0x18] sm:$0xff]  ;;  %v517_v17 = vld [vmem:[%s374_s14] sm:$0x1]  ;;  %vm620_vm3 = vcmask 130048  }
 0x114   : > { %v429_v5 = vld [vmem:[%s366_s2] sm:$0xff]  ;;  %v1988_v6 = vpack.c.bf16 %v434_v4, %v433_v2  ;;  %v430_v7 = vld [vmem:[%s366_s2 + $0x8] sm:$0xff]  ;;  %vm3110_vm2 = vmpackc.low %vm532_vm1, %vm532_vm1  ;;  %v1816_v18 = vadd.f32 -1.0, %v517_v17  ;;  %v522_v19 = vshrl.u32 %v521_v16, 7  ;;  %s2669_s24 = smov 64   ;;  %s2670_s3 = smov 88  }
 0x115   : > { %1914 = vmatprep.mubr.msk.f32.mxu0 %vm435_vm0, %v429_v5  ;;  %1985 = vmatprep.subr.bf16.mxu0 %v1984_v3  ;;  %v617_v24 = vld [vmem:[#allocation8 + $0x8] sm:$0xff]  ;;  %v616_v27 = vld [vmem:[#allocation8] sm:$0xff]  ;;  %s2671_s5 = smov 120   ;;  %v866_v54 = vld [vmem:[#allocation8 + $0x18] sm:$0xff]  ;;  %s2672_s6 = smov 48   ;;  %vm1019_vm4 = vcmask 130112  }
 0x116   : > { %1987 = vmatpush3.bf16.msra.mxu0 %v1984_v3  ;;  %v519_v20 = vmul.f32 1e+09, %v1816_v18  ;;  %v523_v21 = vsub.s32 0, %v522_v19  ;;  %v865_v57 = vld [vmem:[#allocation8 + $0x10] sm:$0xff]  ;;  %s2673_s15 = smov 56   ;;  %s2674_s7 = smov 72  }
 0x117   : > { %1989 = vmatprep.subr.bf16.mxu0 %v1988_v6  ;;  %s2675_s13 = smov 80   ;;  %s2676_s20 = smov 112   ;;  %vm1268_vm5 = vcmask 195712   ;;  %vm1517_vm6 = vcmask 261312  }
 0x118   : > { %v3122_v22 = vrot.slane %v519_v20, %v523_v21  ;;  %s2677_s0 = smov 104   ;;  %s2678_s22 = smov 40  }
 0x119   : > { %s2679_s25 = smov 32   ;;  %s3398_s4 = sld [smem:[#allocation25_spill]] }
 0x11a   : > { %1991 = vmatpush3.bf16.msra.mxu0 %v1988_v6  ;;  %s3399_s17 = sld [smem:[#allocation24_spill]]  ;;  %s428_s14 = scalar_lea.vmem [#allocation15], %s1808_s16 }
 0x11b   : > { %s1632_s21 = sshll.u32 %s428_s14, 4  ;;  %s1617_s16 = scalar_lea.sflag [#allocation5], %s3066_s29  ;;  %s3261_s21 = int_to_ptr.vmem [resolvable:$true] %s1632_s21 }
 0x11c   : > { %p3401_p2 = scmp.ne.s32.totalorder %s3381_s19, 0 }
 0x11d   : > { %1915 = vmatmul.mubr.msk.f32.vlgmr.msra.gmra.mrb[0].mxu0 %vm435_vm0, %v430_v7 }
 0x11f   : > { %s2042_s2 = smul.u32 6, %s3398_s4 }
 0x120   : > { %s1857_s18 = sshll.u32 %s3399_s17, 1 }
 0x121   : > { %s1629_s23 = sadd.s32 %s2042_s2, %s1857_s18 }
 0x1f0   : > { %v3096_v8 = vpop.f32.mrb[0].mxu0 }
 0x1f1   : > { %v3098_v9 = vpop.f32.mrb[1].mxu0 }
 0x1f2   : > { %1921 = vmatprep.mubr.msk.f32.mxu1 %vm532_vm1, %v3098_v9  ;;  %v3104_v10 = vpack.i.bf16 %v3096_v8, %v3098_v9 }
 0x1f4   : > { %2214 = vrot.lane.b32.xlu0 %v3104_v10, %s2668_s12 }
 0x266   : > { %v2215_v11 = vpop.permute.xlu0 %2214 }
 0x267   : > { %v2217_v12 = vunpack.i.h.bf16 %v2215_v11  ;;  %v2216_v13 = vunpack.i.l.bf16 %v2215_v11 }
 0x269   : > { %v1992_v15 = vpack.c.bf16 %v2217_v12, %v2216_v13 }
 0x26b   : > { %1994 = vmatprep.subr.msk.bf16.mxu1 %vm3110_vm2, %v1992_v15 }
 0x26c   : > { %1997 = vmatpush3.bf16.xpose.msk.msra.mxu1 %vm3110_vm2, %v1992_v15 }
 0x273   : > { %1922 = vmatmul.mubr.msk.f32.vlgmr.msra.gmra.mrb[0].mxu1 %vm532_vm1, %v3096_v8 }
 0x346   : > { %v1923_v23 = vpop.f32.mrb[0].mxu1 }
 0x347   : > { %v613_v25 = vadd.f32 %v1923_v23, %v3122_v22  ;;  %v607_v26 = vpop.f32.mrb[1].mxu1 }
 0x348   : > { %v608_v28 = vadd.f32 %v607_v26, %v3122_v22 }
 0x349   : > { %v619_v29 = vadd.f32 %v617_v24, %v613_v25 }
 0x34a   : > { %v618_v30 = vadd.f32 %v616_v27, %v608_v28 }
 0x34b   : > { %v624_v31 = vsel %vm620_vm3, %v619_v29, -inf }
 0x34c   : > { %625 = vmax.xlane.f32.xlu1 %v624_v31  ;;  %v621_v32 = vsel %vm620_vm3, %v618_v30, -inf }
 0x34d   : > { %622 = vmax.xlane.f32.xlu0 %v621_v32 }
 0x35d   : > { %2219 = vrot.lane.b32.xlu1 %v3104_v10, %s2669_s24 }
 0x361   : > { %2224 = vrot.lane.b32.xlu1 %v3104_v10, %s2670_s3 }
 0x365   : > { %773 = vrot.lane.b32.xlu1 %v3098_v9, %s2671_s5 }
 0x369   : > { %775 = vrot.lane.b32.xlu1 %v3096_v8, %s2671_s5 }
 0x3d9   : > { %v626_v33 = vpop.xlane.xlu1 %625 }
 0x3da   : > { %v628_v34 = vsub.f32 %v619_v29, %v626_v33  ;;  %v623_v35 = vpop.xlane.xlu0 %622  ;;  %v1115_v33 = vld [vmem:[#allocation8 + $0x28] sm:$0xff] }
 0x3db   : > { %v627_v36 = vsub.f32 %v618_v30, %v623_v35 }
 0x3dc   : > { %v631_v37 = vmul.f32 1.442695, %v628_v34 }
 0x3dd   : > { %v629_v38 = vmul.f32 1.442695, %v627_v36  ;;  %v2220_v39 = vpop.permute.xlu1 %2219  ;;  %v1114_v36 = vld [vmem:[#allocation8 + $0x20] sm:$0xff] }
 0x3de   : > { %v2222_v40 = vunpack.i.h.bf16 %v2220_v39  ;;  %v2221_v41 = vunpack.i.l.bf16 %v2220_v39 }
 0x3df   : > { %2253 = vpow2.f32 %v629_v38 }
 0x3e0   : > { %2255 = vpow2.f32 %v631_v37  ;;  %v1998_v42 = vpack.c.bf16 %v2222_v40, %v2221_v41 }
 0x3e1   : > { %v2225_v43 = vpop.permute.xlu1 %2224 }
 0x3e2   : > { %v2227_v44 = vunpack.i.h.bf16 %v2225_v43  ;;  %v2226_v45 = vunpack.i.l.bf16 %v2225_v43  ;;  %1999 = vmatprep.subr.bf16.mxu1 %v1998_v42 }
 0x3e3   : > { %2001 = vmatpush3.bf16.msra.mxu1 %v1998_v42 }
 0x3e4   : > { %v2002_v46 = vpack.c.bf16 %v2227_v44, %v2226_v45 }
 0x3e5   : > { %v774_v49 = vpop.permute.xlu1 %773 }
 0x3e6   : > { %2004 = vmatprep.subr.msk.bf16.mxu1 %vm3110_vm2, %v2002_v46 }
 0x3e9   : > { %v3136_v47 = vpop.eup %2253  ;;  %v776_v50 = vpop.permute.xlu1 %775 }
 0x3ea   : > { %v3138_v48 = vpop.eup %2255  ;;  %1928 = vmatprep.mubr.msk.f32.mxu1 %vm620_vm3, %v3136_v47 }
 0x3eb   : > { %1929 = vmatmul.mubr.msk.f32.vlgmr.msra.gmra.mrb[2].mxu1 %vm620_vm3, %v3138_v48 }
 0x3ec   : > { %2007 = vmatpush3.bf16.xpose.msk.msra.mxu1 %vm3110_vm2, %v2002_v46  ;;  %1935 = vmatprep.mubr.msk.f32.mxu1 %vm532_vm1, %v774_v49 }
 0x3f3   : > { %1936 = vmatmul.mubr.msk.f32.vlgmr.msra.gmra.mrb[4].mxu1 %vm532_vm1, %v776_v50 }
 0x4be   : > { %v3148_v51 = vpop.f32.mrb[2].mxu1 }
 0x4bf   : > { %v3150_v52 = vpop.f32.mrb[3].mxu1 }
 0x4c6   : > { %v1937_v53 = vpop.f32.mrb[4].mxu1 }
 0x4c7   : > { %v861_v55 = vadd.f32 %v1937_v53, %v3122_v22  ;;  %v855_v56 = vpop.f32.mrb[5].mxu1 }
 0x4c8   : > { %v856_v58 = vadd.f32 %v855_v56, %v3122_v22 }
 0x4c9   : > { %v868_v59 = vadd.f32 %v866_v54, %v861_v55 }
 0x4ca   : > { %v867_v60 = vadd.f32 %v865_v57, %v856_v58 }
 0x4cb   : > { %v872_v61 = vsel %vm620_vm3, %v868_v59, -inf }
 0x4cc   : > { %873 = vmax.xlane.f32.xlu0 %v872_v61  ;;  %v869_v62 = vsel %vm620_vm3, %v867_v60, -inf }
 0x4cd   : > { %870 = vmax.xlane.f32.xlu1 %v869_v62  ;;  %v1363_v62 = vld [vmem:[#allocation8 + $0x30] sm:$0xff] }
 0x4de   : > { %2239 = vrot.lane.b32.xlu1 %v3104_v10, %s2672_s6 }
 0x4e2   : > { %2229 = vrot.lane.b32.xlu0 %v3104_v10, %s2673_s15  ;;  %2244 = vrot.lane.b32.xlu1 %v3104_v10, %s2674_s7  ;;  %s2519_s15 = scalar_lea.vmem %s3261_s21, 256  ;;  %s2680_s7 = smov [#allocation15]  }
 0x4e3   : > { %p2520_p3 = scmp.ne.s32.totalorder %s3261_s21, %s2519_s15 }
 0x4e5   : > { %p2521_p9 = pnand %p2520_p3, %p3401_p2 }
 0x4e6   : > { %2234 = vrot.lane.b32.xlu0 %v3104_v10, %s2675_s13  ;;  %s2523_s13 = sshll.u32 %s2680_s7, 4  ;;  %s2524_s13 = int_to_ptr.vmem [resolvable:$false] %s2523_s13 }
 0x4e7   : > { %p2522_p6 = pneg %p2521_p9  ;;  %p2526_p13 = scmp.lt.s32.totalorder %s3261_s21, %s2524_s13 }
 0x4ea   : > { %1022 = vrot.lane.b32.xlu0 %v3098_v9, %s2676_s20 }
 0x4ee   : > { %1024 = vrot.lane.b32.xlu0 %v3096_v8, %s2676_s20 }
 0x559   : > { %v874_v63 = vpop.xlane.xlu0 %873 }
 0x55a   : > { %v876_v0 = vsub.f32 %v868_v59, %v874_v63  ;;  %v871_v1 = vpop.xlane.xlu1 %870  ;;  %v1364_v59 = vld [vmem:[#allocation8 + $0x38] sm:$0xff] }
 0x55b   : > { %v875_v2 = vsub.f32 %v867_v60, %v871_v1 }
 0x55c   : > { %v879_v3 = vmul.f32 1.442695, %v876_v0 }
 0x55d   : > { %v877_v4 = vmul.f32 1.442695, %v875_v2  ;;  %v2230_v5 = vpop.permute.xlu0 %2229 }
 0x55e   : > { %v2232_v6 = vunpack.i.h.bf16 %v2230_v5  ;;  %v2231_v7 = vunpack.i.l.bf16 %v2230_v5  ;;  %v2240_v11 = vpop.permute.xlu1 %2239 }
 0x55f   : > { %2257 = vpow2.f32 %v877_v4  ;;  %v2242_v12 = vunpack.i.h.bf16 %v2240_v11  ;;  %v2241_v13 = vunpack.i.l.bf16 %v2240_v11 }
 0x560   : > { %2259 = vpow2.f32 %v879_v3  ;;  %v2008_v15 = vpack.c.bf16 %v2232_v6, %v2231_v7  ;;  %v636_v3 = vsel %vm620_vm3, %v3138_v48, 0.0  ;;  %v633_v7 = vsel %vm620_vm3, %v3136_v47, 0.0 }
 0x561   : > { %v2018_v16 = vpack.c.bf16 %v2242_v12, %v2241_v13  ;;  %v2235_v17 = vpop.permute.xlu0 %2234 }
 0x562   : > { %v2237_v18 = vunpack.i.h.bf16 %v2235_v17  ;;  %v2236_v19 = vunpack.i.l.bf16 %v2235_v17  ;;  %2009 = vmatprep.subr.bf16.mxu0 %v2008_v15  ;;  %v2245_v20 = vpop.permute.xlu1 %2244 }
 0x563   : > { %v2247_v21 = vunpack.i.h.bf16 %v2245_v20  ;;  %v2246_v23 = vunpack.i.l.bf16 %v2245_v20  ;;  %2011 = vmatpush3.bf16.msra.mxu0 %v2008_v15  ;;  %2019 = vmatprep.subr.bf16.mxu1 %v2018_v16 }
 0x564   : > { %v2012_v24 = vpack.c.bf16 %v2237_v18, %v2236_v19  ;;  %2021 = vmatpush3.bf16.msra.mxu1 %v2018_v16 }
 0x565   : > { %v2022_v25 = vpack.c.bf16 %v2247_v21, %v2246_v23  ;;  %v1023_v28 = vpop.permute.xlu0 %1022 }
 0x566   : > { %2014 = vmatprep.subr.msk.bf16.mxu0 %vm3110_vm2, %v2012_v24 }
 0x567   : > { %2024 = vmatprep.subr.msk.bf16.mxu1 %vm3110_vm2, %v2022_v25 }
 0x569   : > { %v2258_v26 = vpop.eup %2257  ;;  %v1025_v29 = vpop.permute.xlu0 %1024 }
 0x56a   : > { %v2260_v27 = vpop.eup %2259  ;;  %1942 = vmatprep.mubr.msk.f32.mxu0 %vm620_vm3, %v2258_v26  ;;  %v881_v4 = vsel %vm620_vm3, %v2258_v26, 0.0 }
 0x56b   : > { %1943 = vmatmul.mubr.msk.f32.vlgmr.msra.gmra.mrb[2].mxu0 %vm620_vm3, %v2260_v27  ;;  %v884_v5 = vsel %vm620_vm3, %v2260_v27, 0.0 }
 0x56c   : > { %2017 = vmatpush3.bf16.xpose.msk.msra.mxu0 %vm3110_vm2, %v2012_v24  ;;  %1949 = vmatprep.mubr.msk.f32.mxu0 %vm532_vm1, %v1023_v28  ;;  %v1823_v28 = vld [vmem:[#allocation11] ss:$0 sm:$0xff] }
 0x573   : > { %1950 = vmatmul.mubr.msk.f32.vlgmr.msra.gmra.mrb[4].mxu0 %vm532_vm1, %v1025_v29 }
 0x63e   : > { %v3174_v30 = vpop.f32.mrb[2].mxu0 }
 0x63f   : > { %v3176_v31 = vpop.f32.mrb[3].mxu0 }
 0x646   : > { %v1951_v32 = vpop.f32.mrb[4].mxu0 }
 0x647   : > { %v1110_v34 = vadd.f32 %v1951_v32, %v3122_v22  ;;  %v1104_v35 = vpop.f32.mrb[5].mxu0 }
 0x648   : > { %v1105_v37 = vadd.f32 %v1104_v35, %v3122_v22 }
 0x649   : > { %v1117_v38 = vadd.f32 %v1115_v33, %v1110_v34 }
 0x64a   : > { %v1116_v39 = vadd.f32 %v1114_v36, %v1105_v37 }
 0x64b   : > { %v1121_v40 = vsel %vm620_vm3, %v1117_v38, -inf }
 0x64c   : > { %1122 = vmax.xlane.f32.xlu0 %v1121_v40  ;;  %v1118_v41 = vsel %vm620_vm3, %v1116_v39, -inf }
 0x64d   : > { %1119 = vmax.xlane.f32.xlu1 %v1118_v41 }
 0x65e   : > { %1271 = vrot.lane.b32.xlu1 %v3098_v9, %s2677_s0 }
 0x662   : > { %1273 = vrot.lane.b32.xlu1 %v3096_v8, %s2677_s0 }
 0x6d9   : > { %v1123_v42 = vpop.xlane.xlu0 %1122 }
 0x6da   : > { %v1125_v43 = vsub.f32 %v1117_v38, %v1123_v42  ;;  %v1120_v44 = vpop.xlane.xlu1 %1119 }
 0x6db   : > { %v1124_v45 = vsub.f32 %v1116_v39, %v1120_v44 }
 0x6dc   : > { %v1128_v46 = vmul.f32 1.442695, %v1125_v43 }
 0x6dd   : > { %v1126_v49 = vmul.f32 1.442695, %v1124_v45 }
 0x6de   : > { %v1272_v54 = vpop.permute.xlu1 %1271 }
 0x6df   : > { %2261 = vpow2.f32 %v1126_v49 }
 0x6e0   : > { %2263 = vpow2.f32 %v1128_v46 }
 0x6e2   : > { %v1274_v55 = vpop.permute.xlu1 %1273 }
 0x6e9   : > { %v2262_v50 = vpop.eup %2261 }
 0x6ea   : > { %v2264_v53 = vpop.eup %2263  ;;  %1956 = vmatprep.mubr.msk.f32.mxu1 %vm620_vm3, %v2262_v50 }
 0x6eb   : > { %1957 = vmatmul.mubr.msk.f32.vlgmr.msra.gmra.mrb[6].mxu1 %vm620_vm3, %v2264_v53  ;;  %v1133_v6 = vsel %vm620_vm3, %v2264_v53, 0.0 }
 0x6ec   : > { %2027 = vmatpush3.bf16.xpose.msk.msra.mxu1 %vm3110_vm2, %v2022_v25  ;;  %1963 = vmatprep.mubr.msk.f32.mxu1 %vm532_vm1, %v1272_v54 }
 0x6f3   : > { %1964 = vmatmul.mubr.msk.f32.vlgmr.msra.gmra.mrb[8].mxu1 %vm532_vm1, %v1274_v55 }
 0x7be   : > { %v3192_v56 = vpop.f32.mrb[6].mxu1 }
 0x7bf   : > { %v3194_v57 = vpop.f32.mrb[7].mxu1 }
 0x7c6   : > { %v1965_v58 = vpop.f32.mrb[8].mxu1 }
 0x7c7   : > { %v1359_v60 = vadd.f32 %v1965_v58, %v3122_v22  ;;  %v1353_v61 = vpop.f32.mrb[9].mxu1 }
 0x7c8   : > { %v1354_v63 = vadd.f32 %v1353_v61, %v3122_v22  ;;  %v1130_v22 = vsel %vm620_vm3, %v2262_v50, 0.0 }
 0x7c9   : > { %v1366_v0 = vadd.f32 %v1364_v59, %v1359_v60 }
 0x7ca   : > { %v1365_v14 = vadd.f32 %v1363_v62, %v1354_v63 }
 0x7cb   : > { %v1370_v1 = vsel %vm620_vm3, %v1366_v0, -inf }
 0x7cc   : > { %1371 = vmax.xlane.f32.xlu0 %v1370_v1  ;;  %v1367_v2 = vsel %vm620_vm3, %v1365_v14, -inf }
 0x7cd   : > { %1368 = vmax.xlane.f32.xlu1 %v1367_v2 }
 0x7d1   : > { %637 = vadd.xlane.f32.xlu1 %v636_v3 }
 0x7d5   : > { %882 = vadd.xlane.f32.xlu1 %v881_v4 }
 0x7d9   : > { %885 = vadd.xlane.f32.xlu1 %v884_v5 }
 0x7dd   : > { %1131 = vadd.xlane.f32.xlu1 %v1130_v22 }
 0x7e1   : > { %1134 = vadd.xlane.f32.xlu1 %v1133_v6 }
 0x7e2   : > { %2249 = vrot.lane.b32.xlu0 %v3104_v10, %s2678_s22 }
 0x801   : > { %634 = vadd.xlane.f32.xlu0 %v633_v7 }
 0x859   : > { %v1372_v48 = vpop.xlane.xlu0 %1371 }
 0x85a   : > { %v1374_v11 = vsub.f32 %v1366_v0, %v1372_v48  ;;  %v1369_v12 = vpop.xlane.xlu1 %1368 }
 0x85b   : > { %v1373_v13 = vsub.f32 %v1365_v14, %v1369_v12 }
 0x85c   : > { %v1377_v15 = vmul.f32 1.442695, %v1374_v11 }
 0x85d   : > { %v1375_v16 = vmul.f32 1.442695, %v1373_v13  ;;  %v2250_v17 = vpop.permute.xlu0 %2249 }
 0x85e   : > { %2265 = vpow2.f32 %v1377_v15  ;;  %v2252_v18 = vunpack.i.h.bf16 %v2250_v17  ;;  %v2251_v19 = vunpack.i.l.bf16 %v2250_v17  ;;  %v638_v21 = vpop.xlane.xlu1 %637 }
 0x85f   : > { %2267 = vpow2.f32 %v1375_v16 }
 0x860   : > { %v2028_v20 = vpack.c.bf16 %v2252_v18, %v2251_v19  ;;  %2269 = vrcp.f32 %v638_v21 }
 0x862   : > { %2029 = vmatprep.subr.bf16.mxu0 %v2028_v20  ;;  %v883_v25 = vpop.xlane.xlu1 %882 }
 0x863   : > { %2031 = vmatpush3.bf16.msra.mxu0 %v2028_v20 }
 0x866   : > { %v886_v26 = vpop.xlane.xlu1 %885 }
 0x867   : > { %2271 = vrcp.f32 %v886_v26 }
 0x868   : > { %v2266_v10 = vpop.eup %2265 }
 0x869   : > { %v2268_v23 = vpop.eup %2267  ;;  %v1382_v47 = vsel %vm620_vm3, %v2266_v10, 0.0 }
 0x86a   : > { %1970 = vmatprep.mubr.msk.f32.mxu0 %vm620_vm3, %v2268_v23  ;;  %1383 = vadd.xlane.f32.xlu0 %v1382_v47  ;;  %v1379_v24 = vsel %vm620_vm3, %v2268_v23, 0.0  ;;  %v1132_v27 = vpop.xlane.xlu1 %1131  ;;  %v2270_v32 = vpop.eup %2269 }
 0x86b   : > { %1971 = vmatmul.mubr.msk.f32.vlgmr.msra.gmra.mrb[6].mxu0 %vm620_vm3, %v2266_v10  ;;  %1380 = vadd.xlane.f32.xlu1 %v1379_v24  ;;  %v729_v33 = vmul.f32 %v2270_v32, %v3148_v51 }
 0x86e   : > { %v1135_v29 = vpop.xlane.xlu1 %1134 }
 0x86f   : > { %2273 = vrcp.f32 %v1135_v29 }
 0x871   : > { %v2272_v34 = vpop.eup %2271 }
 0x872   : > { %v977_v35 = vmul.f32 %v2272_v34, %v3174_v30 }
 0x879   : > { %v2274_v36 = vpop.eup %2273 }
 0x87a   : > { %v1226_v38 = vmul.f32 %v2274_v36, %v3192_v56 }
 0x87c   : > { %736 = vrot.lane.b32.xlu1 %v1823_v28, %s2668_s12 }
 0x880   : > { %1233 = vrot.lane.b32.xlu1 %v1823_v28, %s2668_s12  ;;  %984 = vrot.lane.b32.xlu0 %v1823_v28, %s2668_s12 }
 0x884   : > { %1482 = vrot.lane.b32.xlu1 %v1823_v28, %s2668_s12 }
 0x888   : > { %757 = vrot.lane.b32.xlu1 %v729_v33, %s2668_s12 }
 0x88c   : > { %1005 = vrot.lane.b32.xlu1 %v977_v35, %s2677_s0 }
 0x88e   : > { %v635_v37 = vpop.xlane.xlu0 %634 }
 0x88f   : > { %2275 = vrcp.f32 %v635_v37 }
 0x890   : > { %1254 = vrot.lane.b32.xlu1 %v1226_v38, %s2676_s20  ;;  %2277 = vrcp.f32 %v883_v25 }
 0x891   : > { %2279 = vrcp.f32 %v1132_v27 }
 0x899   : > { %v2276_v39 = vpop.eup %2275 }
 0x89a   : > { %v728_v40 = vmul.f32 %v2276_v39, %v3150_v52  ;;  %v2278_v51 = vpop.eup %2277 }
 0x89b   : > { %v976_v41 = vmul.f32 %v2278_v51, %v3176_v31  ;;  %v2280_v30 = vpop.eup %2279 }
 0x89c   : > { %755 = vrot.lane.b32.xlu0 %v728_v40, %s2668_s12  ;;  %v1225_v42 = vmul.f32 %v2280_v30, %v3194_v57  ;;  %v1522_v30 = vld [vmem:[#allocation12] sm:$0xff]  ;;  %s1858_s12 = sshll.u32 %s1629_s23, 7 }
 0x8a0   : > { %1003 = vrot.lane.b32.xlu0 %v976_v41, %s2677_s0 }
 0x8a4   : > { %1252 = vrot.lane.b32.xlu0 %v1225_v42, %s2676_s20  ;;  %v1523_v42 = vld [vmem:[#allocation12 + $0x8] sm:$0xff]  ;;  %s2525_s20 = scalar_lea.vmem %s2524_s13, 512 }
 0x8a5   : > { %p2527_p11 = scmp.lt.s32.totalorder %s2525_s20, %s2519_s15 }
 0x8a7   : > { %p2528_p0 = por %p2527_p11, %p2526_p13 }
 0x8a9   : > { %p2529_p5 = pnand %p2528_p0, %p2522_p6 }
 0x8f7   : > { %v1384_v50 = vpop.xlane.xlu0 %1383 }
 0x8f8   : > { %v1381_v43 = vpop.xlane.xlu1 %1380 }
 0x8fb   : > { %v985_v53 = vpop.permute.xlu0 %984 }
 0x8fc   : > { %v737_v44 = vpop.permute.xlu1 %736  ;;  %v988_v55 = vadd.f32 %v3096_v8, %v985_v53  ;;  %v987_v57 = vadd.f32 %v985_v53, %v3098_v9 }
 0x8fd   : > { %v740_v31 = vadd.f32 %v3096_v8, %v737_v44  ;;  %v739_v54 = vadd.f32 %v737_v44, %v3098_v9  ;;  %v2032_v44 = vpack.c.bf16 %v1523_v42, %v1522_v30 }
 0x8fe   : > { %v1834_v59 = vmul.f32 -1.442695, %v988_v55  ;;  %v1833_v61 = vmul.f32 -1.442695, %v987_v57 }
 0x8ff   : > { %v1825_v56 = vmul.f32 -1.442695, %v740_v31  ;;  %v1824_v58 = vmul.f32 -1.442695, %v739_v54  ;;  %2033 = vmatprep.subr.bf16.mxu0 %v2032_v44 }
 0x900   : > { %v1234_v45 = vpop.permute.xlu1 %1233  ;;  %2035 = vmatpush3.bf16.msra.mxu0 %v2032_v44 }
 0x901   : > { %2281 = vpow2.f32 %v1825_v56  ;;  %v1237_v60 = vadd.f32 %v3096_v8, %v1234_v45  ;;  %v1236_v62 = vadd.f32 %v1234_v45, %v3098_v9  ;;  %v1525_v45 = vld [vmem:[#allocation12 + $0x18] sm:$0xff] }
 0x902   : > { %2283 = vpow2.f32 %v1824_v58 }
 0x903   : > { %2285 = vpow2.f32 %v1834_v59  ;;  %v1843_v63 = vmul.f32 -1.442695, %v1237_v60  ;;  %v1842_v0 = vmul.f32 -1.442695, %v1236_v62 }
 0x904   : > { %v1483_v46 = vpop.permute.xlu1 %1482  ;;  %2287 = vpow2.f32 %v1833_v61 }
 0x905   : > { %v3230_v49 = vadd.f32 %v1483_v46, %v3098_v9  ;;  %v3233_v52 = vadd.f32 %v3096_v8, %v1483_v46  ;;  %2289 = vpow2.f32 %v1843_v63 }
 0x906   : > { %2291 = vpow2.f32 %v1842_v0 }
 0x907   : > { %2293 = vrcp.f32 %v1384_v50  ;;  %v1852_v37 = vmul.f32 -1.442695, %v3233_v52  ;;  %v1851_v38 = vmul.f32 -1.442695, %v3230_v49 }
 0x908   : > { %2295 = vrcp.f32 %v1381_v43  ;;  %v758_v12 = vpop.permute.xlu1 %757  ;;  %v1524_v43 = vld [vmem:[#allocation12 + $0x10] sm:$0xff] }
 0x909   : > { %v2036_v46 = vpack.c.bf16 %v1525_v45, %v1524_v43 }
 0x90b   : > { %v2282_v14 = vpop.eup %2281  ;;  %2037 = vmatprep.subr.bf16.mxu0 %v2036_v46 }
 0x90c   : > { %v2284_v1 = vpop.eup %2283  ;;  %v748_v2 = vadd.f32 1.0, %v2282_v14  ;;  %v1006_v47 = vpop.permute.xlu1 %1005  ;;  %2039 = vmatpush3.bf16.msra.mxu0 %v2036_v46  ;;  %v1853_v14 = vld [vmem:[#allocation14] ss:$0 sm:$0xff] }
 0x90d   : > { %v2286_v3 = vpop.eup %2285  ;;  %v747_v4 = vadd.f32 1.0, %v2284_v1 }
 0x90e   : > { %v2288_v5 = vpop.eup %2287  ;;  %v996_v22 = vadd.f32 1.0, %v2286_v3  ;;  %2297 = vrcp.f32 %v748_v2  ;;  %v756_v16 = vpop.permute.xlu0 %755 }
 0x90f   : > { %v2290_v8 = vpop.eup %2289  ;;  %v995_v6 = vadd.f32 1.0, %v2288_v5  ;;  %2299 = vrcp.f32 %v747_v4 }
 0x910   : > { %v2292_v9 = vpop.eup %2291  ;;  %2301 = vrcp.f32 %v996_v22  ;;  %v1245_v7 = vadd.f32 1.0, %v2290_v8  ;;  %v1255_v33 = vpop.permute.xlu1 %1254 }
 0x911   : > { %2303 = vrcp.f32 %v995_v6  ;;  %v1244_v48 = vadd.f32 1.0, %v2292_v9  ;;  %v2294_v11 = vpop.eup %2293 }
 0x912   : > { %2305 = vrcp.f32 %v1245_v7  ;;  %v2296_v15 = vpop.eup %2295  ;;  %v1004_v26 = vpop.permute.xlu0 %1003 }
 0x913   : > { %2307 = vrcp.f32 %v1244_v48 }
 0x914   : > { %2309 = vpow2.f32 %v1852_v37 }
 0x915   : > { %2311 = vpow2.f32 %v1851_v38 }
 0x916   : > { %v1253_v35 = vpop.permute.xlu0 %1252 }
 0x918   : > { %v2298_v19 = vpop.eup %2297 }
 0x919   : > { %v2300_v21 = vpop.eup %2299  ;;  %v762_v10 = vmul.f32 %v2298_v19, %v758_v12 }
 0x91a   : > { %v2302_v23 = vpop.eup %2301  ;;  %v761_v24 = vmul.f32 %v2300_v21, %v756_v16 }
 0x91b   : > { %v2304_v25 = vpop.eup %2303  ;;  %v1010_v27 = vmul.f32 %v2302_v23, %v1006_v47 }
 0x91c   : > { %v2306_v28 = vpop.eup %2305  ;;  %v1009_v29 = vmul.f32 %v2304_v25, %v1004_v26 }
 0x91d   : > { %v2308_v32 = vpop.eup %2307  ;;  %v1259_v34 = vmul.f32 %v2306_v28, %v1255_v33 }
 0x91e   : > { %v1258_v36 = vmul.f32 %v2308_v32, %v1253_v35  ;;  %v2310_v39 = vpop.eup %2309 }
 0x91f   : > { %v2312_v40 = vpop.eup %2311  ;;  %v1494_v51 = vadd.f32 1.0, %v2310_v39 }
 0x920   : > { %v1493_v41 = vadd.f32 1.0, %v2312_v40 }
 0x921   : > { %2313 = vrcp.f32 %v1494_v51 }
 0x922   : > { %2315 = vrcp.f32 %v1493_v41 }
 0x92b   : > { %v2314_v52 = vpop.eup %2313 }
 0x92c   : > { %v2316_v50 = vpop.eup %2315 }
 0x93e   : > { %v1972_v13 = vpop.f32.mrb[6].mxu0 }
 0x93f   : > { %v1475_v17 = vmul.f32 %v2294_v11, %v1972_v13  ;;  %v1463_v18 = vpop.f32.mrb[7].mxu0 }
 0x940   : > { %v1474_v20 = vmul.f32 %v2296_v15, %v1463_v18 }
 0x941   : > { %1503 = vrot.lane.b32.xlu1 %v1475_v17, %s2671_s5 }
 0x942   : > { %1501 = vrot.lane.b32.xlu0 %v1474_v20, %s2671_s5  ;;  %s3400_s5 = sld [smem:[#allocation36_spill]] }
 0x945   : > { %767 = vrot.lane.b32.xlu1 %v762_v10, %s2679_s25 }
 0x946   : > { %765 = vrot.lane.b32.xlu0 %v761_v24, %s2679_s25 }
 0x948   : > { %s3266_s6 = scalar_lea.hbm %s3400_s5, %s1858_s12 }
 0x949   : > { %1015 = vrot.lane.b32.xlu1 %v1010_v27, %s2679_s25 }
 0x94a   : > { %1013 = vrot.lane.b32.xlu0 %v1009_v29, %s2679_s25 }
 0x94d   : > { %1264 = vrot.lane.b32.xlu1 %v1259_v34, %s2679_s25 }
 0x94e   : > { %1262 = vrot.lane.b32.xlu0 %v1258_v36, %s2679_s25 }
 0x9b3   : > { %v1504_v49 = vpop.permute.xlu1 %1503 }
 0x9b4   : > { %v1508_v31 = vmul.f32 %v2314_v52, %v1504_v49  ;;  %v1502_v53 = vpop.permute.xlu0 %1501 }
 0x9b5   : > { %v1507_v54 = vmul.f32 %v2316_v50, %v1502_v53 }
 0x9b6   : > { %1513 = vrot.lane.b32.xlu1 %v1508_v31, %s2679_s25 }
 0x9b7   : > { %v768_v55 = vpop.permute.xlu1 %767  ;;  %1511 = vrot.lane.b32.xlu0 %v1507_v54, %s2679_s25 }
 0x9b8   : > { %772 = vst.msk [vmem:[#allocation2 + $0x8] sm:$0xff] %vm532_vm1, %v768_v55  ;;  %v766_v56 = vpop.permute.xlu0 %765 }
 0x9b9   : > { %771 = vst.msk [vmem:[#allocation2] sm:$0xff] %vm532_vm1, %v766_v56 }
 0x9bb   : > { %v1016_v57 = vpop.permute.xlu1 %1015 }
 0x9bc   : > { %1021 = vst.msk [vmem:[#allocation2 + $0x8] sm:$0xff] %vm1019_vm4, %v1016_v57  ;;  %v1014_v58 = vpop.permute.xlu0 %1013 }
 0x9bd   : > { %1020 = vst.msk [vmem:[#allocation2] sm:$0xff] %vm1019_vm4, %v1014_v58 }
 0x9bf   : > { %v1265_v59 = vpop.permute.xlu1 %1264 }
 0x9c0   : > { %1270 = vst.msk [vmem:[#allocation2 + $0x8] sm:$0xff] %vm1268_vm5, %v1265_v59  ;;  %v1263_v60 = vpop.permute.xlu0 %1262 }
 0x9c1   : > { %1269 = vst.msk [vmem:[#allocation2] sm:$0xff] %vm1268_vm5, %v1263_v60 }
 0xa28   : > { %v1514_v61 = vpop.permute.xlu1 %1513 }
 0xa29   : > { %1519 = vst.msk [vmem:[#allocation2 + $0x8] sm:$0xff] %vm1517_vm6, %v1514_v61  ;;  %v1512_v62 = vpop.permute.xlu0 %1511 }
 0xa2a   : > { %1518 = vst.msk [vmem:[#allocation2] sm:$0xff] %vm1517_vm6, %v1512_v62 }
 0xa30   : > { %v1521_v0 = vld [vmem:[#allocation2 + $0x8] sm:$0xff] }
 0xa31   : > { %v1520_v63 = vld [vmem:[#allocation2] sm:$0xff] }
 0xa32   : > { %1981 = vmatprep.mubr.msk.f32.mxu0 %vm435_vm0, %v1520_v63 }
 0xa33   : > { %1982 = vmatmul.mubr.msk.f32.vlgmr.msra.gmra.mrb[8].mxu0 %vm435_vm0, %v1521_v0 }
 0xb06   : > { %v1983_v1 = vpop.f32.mrb[8].mxu0 }
 0xb07   : > { %v1611_v2 = vadd.f32 %v1983_v1, %v1853_v14  ;;  %v1605_v3 = vpop.f32.mrb[9].mxu0 }
 0xb08   : > { %v1606_v4 = vadd.f32 %v1853_v14, %v1605_v3 }
 0xb09   : > { %1615 = vst [vmem:[%s428_s14 + $0x8] sm:$0xff] %v1611_v2 }
 0xb0a   : > { %1614 = vst [vmem:[%s428_s14] sm:$0xff] %v1606_v4 }
 0xb0b   : > { %2532 = shalt.err (!%p2529_p5)
}
 0xb0c   : > { %s2533_s0 = scalar_lea.hbm %s3266_s6, 256  ;;  %s2537_s4 = scalar_lea.hbm %s3400_s5, 1536 }
 0xb0d   : > { %p2534_p7 = scmp.ne.s32.totalorder %s3266_s6, %s2533_s0  ;;  %p2538_p8 = scmp.lt.u32.totalorder %s3266_s6, %s3400_s5 }
 0xb0e   : > { %p2539_p4 = scmp.lt.u32.totalorder %s2537_s4, %s2533_s0  ;;  %p2541_p3 = scmp.lt.u32.totalorder %s2533_s0, %s3266_s6 }
 0xb0f   : > { %p2535_p1 = pnand %p2534_p7, %p3401_p2 }
 0xb10   : > { %p2540_p12 = por %p2539_p4, %p2538_p8 }
 0xb11   : > { %p2536_p10 = pneg %p2535_p1 }
 0xb12   : > { %p2542_p9 = por %p2541_p3, %p2540_p12 }
 0xb14   : > { %p2543_p6 = pnand %p2542_p9, %p2536_p10 }
 0xb16   : > { %2546 = shalt.err (!%p2543_p6)
}
 0xb17   : > { %s2681_s18 = smov 128   ;;  %s2682_s23 = smov 8  }
 0xb18   : > { %2065 = dma.vmem_to_hbm [thread:$0]  (%p3401_p2), %s3261_s21, 256, %s3266_s6, %s1617_s16, %s2681_s18, %s2681_s18, %s2682_s23  }
 0xb19 PF: > { %p2103_p13 = scmp.ge.s32.totalorder %s2657_s11, 2  ;;  %s1647_s14 = sand.u32 1, %s2629_s27  }
 0xb1a   : > { %p3402_p11 = scmp.ne.s32.totalorder %s3382_s8, 0  ;;  %s1648_s12 = scalar_lea.sflag [#allocation5], %s1647_s14 }
 0xb1c   : > { %p2091_p0 = pnand %p2103_p13, %p3402_p11 }
 0xb1e   : > { %2612 = dma.done.wait (!%p2091_p0), %s1648_s12, 256  }
 0xb1f   : > { %2614 = vsyncadd (!%p2091_p0), %s1648_s12, 4294967040  ;;  %s28_s11 = sadd.s32 1, %s2657_s11   ;;  %s3403_s24 = sld [smem:[#allocation22_spill]] }
 0xb20   : > { %p25_p5 = scmp.ge.s32.totalorder %s28_s11, 8   ;;  %s3404_s19 = sld [smem:[#allocation23_spill]] }
 0xb21   : > { %s3405_s29 = sld [smem:[#allocation29_spill]]  ;;  %s3406_s21 = sld [smem:[#allocation27_spill]] }
 0xb22   : > { %s3407_s3 = sld [smem:[#allocation28_spill]]  ;;  %s3408_s25 = smov %s2625_s26 }
 0xb23   : > { %s3409_s26 = smov %s2978_s30  ;;  %s3410_s27 = smov %s2633_s28 }
 0xb24   : > { %s3412_s30 = smov %s2649_s9  ;;  %s3413_s8 = smov %s2653_s10 }
 0xb25   :  { %27 = sbr.rel (!%p25_p5) target bundleno = 21 (0x15), region = 130 }
 0xb26   : > { %s3411_s28 = smov %s3404_s19 }
 0xb27   : > { %s3414_s9 = smov %s3406_s21 }
 0xb28   : > { %s3415_s10 = smov %s3407_s3 }
 0xb2c   :  { %1653 = vsyncpa [#allocation4], 1 }
 0xb2d   :  { %1655 = vsyncpa [#allocation4 + $0x1], 1 }
 0xb2e   :  { %1656 = vsyncpa [#allocation7], 1 }
 0xb2f   :  { %1658 = vsyncpa [#allocation7 + $0x1], 1 }
 0xb30   :  { %1659 = vsyncpa [#allocation10], 1 }
 0xb31   :  { %1660 = vsyncpa [#allocation13], 1 }
 0xb32   :  { %1661 = vsyncpa [#allocation5], 1 }
 0xb33   :  { %1663 = vsyncpa [#allocation5 + $0x1], 1 }

// kernel: tpu_custom_call.1
= control target key start
LH: loop header
LB: loop body
LE: loop exit
PB: predicated region body
PF: predicated region fallthrough
CT: control target
= control target key end

     0   :  { %s3411_s0 = inlined_call_operand.hbm [shape: f32[2,3,16,32], index: 0, kind: input, shape index: {}]   ;;  %s3412_s1 = inlined_call_operand.hbm [shape: f32[2,3,1,16], index: 1, kind: input, shape index: {}]   ;;  %s3413_s2 = inlined_call_operand.hbm [shape: f32[2,4,16,16], index: 2, kind: input, shape index: {}]   ;;  %s3414_s3 = inlined_call_operand.hbm [shape: f32[32,128], index: 3, kind: input, shape index: {}]   ;;  %s3415_s4 = inlined_call_operand.hbm [shape: f32[1,32], index: 4, kind: input, shape index: {}]   ;;  %s3416_s5 = inlined_call_operand.hbm [shape: f32[32,128], index: 5, kind: input, shape index: {}]   ;;  %s3417_s6 = inlined_call_operand.hbm [shape: f32[1,128], index: 6, kind: input, shape index: {}]   ;;  %s3418_s7 = inlined_call_operand.hbm [shape: f32[2,3,16,128], index: 7, kind: output, shape index: {}]  }
   0x1   :  { %3446 = sst [smem:[#allocation32_spill]] %s3412_s1 }
   0x2   :  { %3447 = sst [smem:[#allocation33_spill]] %s3413_s2 }
   0x3   :  { %3448 = sst [smem:[#allocation34_spill]] %s3414_s3 }
   0x4   :  { %3449 = sst [smem:[#allocation35_spill]] %s3416_s5 }
   0x5   :  { %3450 = sst [smem:[#allocation36_spill]] %s3418_s7 }
   0x6   :  { %12 = vsyncpa [#allocation4], 0 }
   0x7   :  { %14 = vsyncpa [#allocation4 + $0x1], 0 }
   0x8   :  { %15 = vsyncpa [#allocation7], 0 }
   0x9   :  { %17 = vsyncpa [#allocation7 + $0x1], 0 }
   0xa   :  { %18 = vsyncpa [#allocation10], 0 }
   0xb   :  { %19 = vsyncpa [#allocation13], 0 }
   0xc   :  { %20 = vsyncpa [#allocation5], 0 }
   0xd   :  { %22 = vsyncpa [#allocation5 + $0x1], 0  ;;  %s2754_s24 = smov 0   ;;  %s2756_s25 = smov 0  }
   0xe   :  { %s2758_s26 = smov 0   ;;  %s2760_s27 = smov 0  }
   0xf   :  { %s2762_s28 = smov 0   ;;  %s2764_s29 = smov 0  }
  0x10   :  { %s2766_s30 = smov 0   ;;  %s2768_s8 = smov 0  }
  0x11   :  { %s2770_s9 = smov 0   ;;  %s2772_s10 = smov 0  }
  0x12   :  { %s2774_s11 = smov 0  }
  0x13 LB: > { %3451 = sst [smem:[#allocation22_spill]] %s2660_s27  ;;  %s2810_s12 = sadd.s32 4294967295, %s2688_s11   ;;  %s2688_s11 = sphi %s2774_s11, %s28_s11   ;;  %s2684_s10 = sphi %s2772_s10, %s3520_s10   ;;  %s2680_s9 = sphi %s2770_s9, %s3519_s9   ;;  %s2676_s8 = sphi %s2768_s8, %s3518_s8   ;;  %s2672_s30 = sphi %s2766_s30, %s3517_s30   ;;  %s2668_s29 = sphi %s2764_s29, %s3509_s29   ;;  %s2664_s28 = sphi %s2762_s28, %s3516_s28   ;;  %s2660_s27 = sphi %s2760_s27, %s3515_s27   ;;  %s2656_s26 = sphi %s2758_s26, %s3514_s26   ;;  %s2652_s25 = sphi %s2756_s25, %s3513_s25   ;;  %s2648_s24 = sphi %s2754_s24, %s3512_s24  }
  0x14   : > { %3452 = sst [smem:[#allocation23_spill]] %s2668_s29  ;;  %p1819_p0 = scmp.ge.s32.totalorder %s2688_s11, 1 }
  0x15   : > { %3453 = sst [smem:[#allocation24_spill]] %s2672_s30  ;;  %p3420_p1 = scmp.eq.s32.totalorder %s2810_s12, 0 }
  0x16   : > { %3454 = sst [smem:[#allocation25_spill]] %s2676_s8  ;;  %p239_p2 = scmp.lt.s32.totalorder %s2688_s11, 7 }
  0x17   : > { %s2690_s14 = smov [#allocation9]   ;;  %s2691_s17 = smov [#allocation12]  }
  0x18   : > { %p2815_p3 = pnand %p1819_p0, %p239_p2  ;;  %s251_s15 = sshll.u32 %s2690_s14, 4  ;;  %s252_s15 = int_to_ptr.vmem [resolvable:$true] %s251_s15 }
  0x19   : > { %s275_s18 = sshll.u32 %s2691_s17, 4  ;;  %s3458_s3 = sld [smem:[#allocation34_spill]]  ;;  %s2827_s18 = int_to_ptr.vmem [resolvable:$true] %s275_s18 }
  0x1a   : > { %s3455_s13 = scalar_select %p2815_p3, 1, 0 }
  0x1b   : > { %p2099_p4 = pneg %p2815_p3 }
  0x1c   : > { %3456 = sst [smem:[#allocation26_spill]] %s3455_s13 }
  0x1d   : > { %p2823_p5 = pnand %p2099_p4, %p3420_p1 }
  0x1f   : > { %s3457_s16 = scalar_select %p2823_p5, 1, 0 }
  0x20   : > { %s2348_s21 = scalar_lea.hbm %s3458_s3, 512  ;;  %p2837_p7 = pneg %p2823_p5 }
  0x21   : > { %p2349_p6 = scmp.ne.s32.totalorder %s3458_s3, %s2348_s21  ;;  %p2355_p10 = scmp.lt.u32.totalorder %s2348_s21, %s3458_s3 }
  0x22   : > { %s3459_s14 = scalar_select %p2837_p7, 1, 0 }
  0x23   : > { %p2351_p8 = pnand %p2837_p7, %p2349_p6 }
  0x25   : > { %p2352_p9 = pneg %p2351_p8 }
  0x27   : > { %p2357_p11 = pnand %p2355_p10, %p2352_p9 }
  0x29   : > { %2360 = shalt.err (!%p2357_p11)
}
  0x2a   : > { %s2361_s19 = scalar_lea.vmem %s252_s15, 512  ;;  %p2369_p2 = scmp.lt.s32.totalorder %s252_s15, %s252_s15 }
  0x2b   : > { %p2362_p12 = scmp.ne.s32.totalorder %s252_s15, %s2361_s19  ;;  %p2370_p4 = scmp.lt.s32.totalorder %s2361_s19, %s2361_s19 }
  0x2d   : > { %p2364_p13 = pnand %p2362_p12, %p2837_p7  ;;  %p2371_p1 = por %p2370_p4, %p2369_p2 }
  0x2f   : > { %p2365_p0 = pneg %p2364_p13 }
  0x31   : > { %p2372_p3 = pnand %p2371_p1, %p2365_p0 }
  0x33   : > { %2375 = shalt.err (!%p2372_p3)
}
  0x34   : > { %s3424_s20 = smov 128   ;;  %s3426_s22 = smov 8  }
  0x35   : > { %2102 = dma.hbm_to_vmem [thread:$0]  (!%p2823_p5), %s3458_s3, 512, %s252_s15, [#allocation10], %s3424_s20, %s3424_s20, %s3426_s22  }
  0x36   : > { %s3460_s5 = sld [smem:[#allocation35_spill]] }
  0x3c   : > { %s2376_s30 = scalar_lea.hbm %s3460_s5, 512 }
  0x3d   : > { %p2377_p1 = scmp.ne.s32.totalorder %s3460_s5, %s2376_s30  ;;  %p2383_p8 = scmp.lt.u32.totalorder %s2376_s30, %s3460_s5 }
  0x3f   : > { %p2379_p3 = pnand %p2377_p1, %p2837_p7 }
  0x41   : > { %p2380_p6 = pneg %p2379_p3 }
  0x43   : > { %p2385_p9 = pnand %p2383_p8, %p2380_p6 }
  0x45   : > { %2388 = shalt.err (!%p2385_p9)
}
  0x46   : > { %s2389_s15 = scalar_lea.vmem %s2827_s18, 512  ;;  %p2397_p13 = scmp.lt.s32.totalorder %s2827_s18, %s2827_s18 }
  0x47   : > { %p2390_p10 = scmp.ne.s32.totalorder %s2827_s18, %s2389_s15  ;;  %p2398_p0 = scmp.lt.s32.totalorder %s2389_s15, %s2389_s15 }
  0x49   : > { %p2392_p11 = pnand %p2390_p10, %p2837_p7  ;;  %p2399_p2 = por %p2398_p0, %p2397_p13 }
  0x4b   : > { %p2393_p12 = pneg %p2392_p11 }
  0x4d   : > { %p2400_p4 = pnand %p2399_p2, %p2393_p12 }
  0x4f   : > { %2403 = shalt.err (!%p2400_p4)
}
  0x50   : > { %2108 = dma.hbm_to_vmem [thread:$0]  (!%p2823_p5), %s3460_s5, 512, %s2827_s18, [#allocation13], %s3424_s20, %s3424_s20, %s3426_s22  }
  0x51   : > { %s1818_s8 = sadd.s32 4294967294, %s2688_s11   ;;  %s37_s13 = sadd.s32 1, %s2680_s9 }
  0x52   : > { %p38_p1 = scmp.ge.s32.totalorder %s37_s13, 3  ;;  %s40_s7 = sadd.s32 1, %s2684_s10 }
  0x53   : > { %s49_s21 = sadd.s32 1, %s2668_s29  ;;  %p3429_p3 = scmp.ne.s32.totalorder %s2668_s29, %s2664_s28 }
  0x54   : > { %s3522_s13 = smov (%p38_p1, %s37_s13), 0  ;;  %s3524_s7 = smov (!%p38_p1, %s40_s7), %s2684_s10 }
  0x55   : > { %3461 = sst [smem:[#allocation27_spill]] %s3522_s13  ;;  %s45_s18 = ssub.s32 %s2680_s9, %s3522_s13 }
  0x56   : > { %p57_p6 = scmp.eq.s32.totalorder %s2688_s11, 0  ;;  %p42_p8 = scmp.ge.s32.totalorder %s3524_s7, 2 }
  0x57   : > { %p3428_p9 = scmp.ne.s32.totalorder %s2664_s28, %s2660_s27  ;;  %s103_s17 = sadd.s32 1, %s2656_s26 }
  0x58   : > { %p2901_p10 = por %p57_p6, %p3429_p3  ;;  %s3526_s7 = smov (%p42_p8, %s3524_s7), 0 }
  0x59   : > { %3463 = sst [smem:[#allocation28_spill]] %s3526_s7  ;;  %p3464_p11 = scmp.eq.s32.totalorder %s2810_s12, 0 }
  0x5a   : > { %p110_p13 = scmp.ne.s32.totalorder %s2656_s26, %s2652_s25  ;;  %s44_s15 = ssub.s32 %s2684_s10, %s3526_s7 }
  0x5b   : > { %p2913_p12 = por %p3464_p11, %p3428_p9  ;;  %p116_p0 = scmp.ne.s32.totalorder %s2652_s25, %s2648_s24 }
  0x5c   : > { %s46_s2 = sor.u32 %s45_s18, %s44_s15  ;;  %p101_p2 = scmp.eq.s32.totalorder %s44_s15, 0 }
  0x5d   : > { %s3465_s19 = scalar_select %p2913_p12, 1, 0 }
  0x5e   : > { %p47_p4 = scmp.eq.s32.totalorder %s46_s2, 0  ;;  %p2925_p1 = por %p110_p13, %p57_p6 }
  0x5f   : > { %s2930_s20 = scalar_select %p101_p2, %s2656_s26, %s103_s17  }
  0x60   : > { %s2933_s22 = scalar_select %p47_p4, %s2668_s29, %s49_s21  }
  0x61   : > { %3467 = sst [smem:[#allocation29_spill]] %s2930_s20  ;;  %p3469_p8 = pmov %p3464_p11 }
  0x62   : > { %3468 = sst [smem:[#allocation30_spill]] %s2933_s22  ;;  %p226_p9 = scmp.eq.s32.totalorder %s2810_s12, 5 }
  0x63   : > { %p2937_p11 = por %p116_p0, %p3469_p8  ;;  %p232_p3 = scmp.eq.s32.totalorder %s1818_s8, 5 }
  0x64   : > { %p2130_p12 = scmp.lt.s32.totalorder %s2688_s11, 6  ;;  %p3471_p5 = scmp.ne.s32.totalorder %s2668_s29, %s2664_s28 }
  0x65   : > { %s3470_s3 = scalar_select %p2937_p11, 1, 0 }
  0x66   : > { %p2946_p7 = por %p226_p9, %p3471_p5  ;;  %s2951_s18 = sand.u32 1, %s2668_s29  }
  0x67   : > { %p3473_p6 = scmp.ne.s32.totalorder %s2664_s28, %s2660_s27  ;;  %p2963_p0 = pnand %p2130_p12, %p2901_p10 }
  0x68   : > { %s3472_s24 = scalar_select %p2946_p7, 1, 0 }
  0x69   : > { %p2956_p13 = por %p232_p3, %p3473_p6  ;;  %s323_s8 = sand.u32 1, %s2688_s11  }
  0x6a   : > { %s3476_s15 = scalar_select %p2963_p0, 1, 0 }
  0x6b   : > { %s3474_s21 = scalar_select %p2956_p13, 1, 0 }
  0x6c   : > { %s2073_s2 = smul.u32 3, %s2684_s10  ;;  %s326_s5 = scalar_lea.vmem [#allocation6], %s2951_s18 }
  0x6d   : > { %3475 = sst [smem:[#allocation31_spill]] %s3474_s21  ;;  %s335_s7 = sshll.u32 %s326_s5, 4  ;;  %s2970_s7 = int_to_ptr.vmem [resolvable:$true] %s335_s7 }
  0x6e   : > { %p2974_p5 = pnand %p2130_p12, %p2925_p1  ;;  %s331_s22 = sadd.s32 %s2680_s9, %s2073_s2 }
  0x6f   : > { %s1828_s17 = sshll.u32 %s331_s22, 4  ;;  %s3478_s1 = sld [smem:[#allocation32_spill]] }
  0x70   : > { %s3477_s13 = scalar_select %p2974_p5, 1, 0 }
  0x71   : > { %s2694_s21 = smov [#allocation11]   ;;  %s2986_s27 = scalar_lea.sflag [#allocation7], %s323_s8 }
  0x72   : > { %s2984_s5 = sshll.u32 %s2694_s21, 4  ;;  %p3442_p9 = pneg %p2963_p0  ;;  %s266_s5 = int_to_ptr.vmem [resolvable:$true] %s2984_s5 }
  0x75   : > { %s2982_s20 = scalar_lea.hbm %s3478_s1, %s1828_s17  ;;  %s2409_s17 = scalar_lea.hbm %s3478_s1, 96 }
  0x76   : > { %s2404_s30 = scalar_lea.hbm %s2982_s20, 16  ;;  %p2410_p2 = scmp.lt.u32.totalorder %s2982_s20, %s3478_s1 }
  0x77   : > { %p2405_p3 = scmp.ne.s32.totalorder %s2982_s20, %s2404_s30  ;;  %p2411_p4 = scmp.lt.u32.totalorder %s2409_s17, %s2404_s30 }
  0x78   : > { %p2413_p8 = scmp.lt.u32.totalorder %s2404_s30, %s2982_s20 }
  0x79   : > { %p2407_p10 = pnand %p3442_p9, %p2405_p3  ;;  %p2412_p1 = por %p2411_p4, %p2410_p2 }
  0x7b   : > { %p2408_p12 = pneg %p2407_p10  ;;  %p2414_p6 = por %p2413_p8, %p2412_p1 }
  0x7d   : > { %p2415_p13 = pnand %p2414_p6, %p2408_p12 }
  0x7f   : > { %2418 = shalt.err (!%p2415_p13)
}
  0x80   : > { %s2419_s21 = scalar_lea.vmem %s2970_s7, 16  ;;  %s2695_s8 = smov [#allocation6]  }
  0x81   : > { %p2420_p3 = scmp.ne.s32.totalorder %s2970_s7, %s2419_s21  ;;  %s2424_s29 = sshll.u32 %s2695_s8, 4  ;;  %s2425_s29 = int_to_ptr.vmem [resolvable:$false] %s2424_s29 }
  0x82   : > { %s2426_s22 = scalar_lea.vmem %s2425_s29, 32  ;;  %p2427_p11 = scmp.lt.s32.totalorder %s2970_s7, %s2425_s29 }
  0x83   : > { %p2422_p10 = pnand %p2420_p3, %p3442_p9  ;;  %p2428_p2 = scmp.lt.s32.totalorder %s2426_s22, %s2419_s21 }
  0x85   : > { %p2423_p7 = pneg %p2422_p10  ;;  %p2429_p4 = por %p2428_p2, %p2427_p11 }
  0x87   : > { %p2430_p1 = pnand %p2429_p4, %p2423_p7 }
  0x89   : > { %2433 = shalt.err (!%p2430_p1)
}
  0x8a   : > { %2118 = dma.hbm_to_vmem [thread:$0]  (!%p2963_p0), %s2982_s20, 16, %s2970_s7, %s2986_s27  }
  0x8b   : > { %s2434_s2 = scalar_lea.hbm %s3415_s4, 16  ;;  %p3479_p11 = scmp.ne.s32.totalorder %s3459_s14, 0 }
  0x8c   : > { %p2435_p13 = scmp.ne.s32.totalorder %s3415_s4, %s2434_s2  ;;  %p2441_p8 = scmp.lt.u32.totalorder %s2434_s2, %s3415_s4 }
  0x8e   : > { %p2437_p7 = pnand %p2435_p13, %p3479_p11 }
  0x90   : > { %p2438_p12 = pneg %p2437_p7 }
  0x92   : > { %p2443_p6 = pnand %p2441_p8, %p2438_p12 }
  0x94   : > { %2446 = shalt.err (!%p2443_p6)
}
  0x95   : > { %s2447_s22 = scalar_lea.vmem %s266_s5, 16  ;;  %s2454_s20 = scalar_lea.vmem %s266_s5, 32 }
  0x96   : > { %p2448_p3 = scmp.ne.s32.totalorder %s266_s5, %s2447_s22  ;;  %p2455_p4 = scmp.lt.s32.totalorder %s266_s5, %s266_s5 }
  0x97   : > { %p2456_p1 = scmp.lt.s32.totalorder %s2454_s20, %s2447_s22 }
  0x98   : > { %p2450_p10 = pnand %p2448_p3, %p3479_p11 }
  0x99   : > { %p2457_p9 = por %p2456_p1, %p2455_p4 }
  0x9a   : > { %p2451_p2 = pneg %p2450_p10 }
  0x9c   : > { %p2458_p5 = pnand %p2457_p9, %p2451_p2 }
  0x9e   : > { %2461 = shalt.err (!%p2458_p5)
}
  0x9f   : > { %p3480_p13 = scmp.ne.s32.totalorder %s3457_s16, 0  ;;  %s2696_s17 = smov [#allocation14]  }
  0xa0   : > { %s289_s2 = sshll.u32 %s2696_s17, 4  ;;  %s1826_s23 = sshll.u32 %s2680_s9, 1  ;;  %s290_s2 = int_to_ptr.vmem [resolvable:$true] %s289_s2 }
  0xa1   : > { %2105 = dma.hbm_to_vmem [thread:$0]  (!%p3480_p13), %s3415_s4, 16, %s266_s5, [#allocation10]  }
  0xa2   : > { %s2462_s29 = scalar_lea.hbm %s3417_s6, 16 }
  0xa3   : > { %p2463_p5 = scmp.ne.s32.totalorder %s3417_s6, %s2462_s29  ;;  %p2469_p12 = scmp.lt.u32.totalorder %s2462_s29, %s3417_s6 }
  0xa5   : > { %p2465_p9 = pnand %p2463_p5, %p3479_p11 }
  0xa7   : > { %p2466_p7 = pneg %p2465_p9 }
  0xa9   : > { %p2471_p8 = pnand %p2469_p12, %p2466_p7 }
  0xab   : > { %2474 = shalt.err (!%p2471_p8)
}
  0xac   : > { %s2475_s5 = scalar_lea.vmem %s290_s2, 16  ;;  %s2482_s30 = scalar_lea.vmem %s290_s2, 32 }
  0xad   : > { %p2476_p6 = scmp.ne.s32.totalorder %s290_s2, %s2475_s5  ;;  %p2483_p2 = scmp.lt.s32.totalorder %s290_s2, %s290_s2 }
  0xae   : > { %p2484_p4 = scmp.lt.s32.totalorder %s2482_s30, %s2475_s5 }
  0xaf   : > { %p2478_p3 = pnand %p2476_p6, %p3479_p11 }
  0xb0   : > { %p2485_p1 = por %p2484_p4, %p2483_p2 }
  0xb1   : > { %p2479_p10 = pneg %p2478_p3 }
  0xb3   : > { %p2486_p0 = pnand %p2485_p1, %p2479_p10 }
  0xb5   : > { %2489 = shalt.err (!%p2486_p0)
}
  0xb6   : > { %2111 = dma.hbm_to_vmem [thread:$0]  (!%p3480_p13), %s3417_s6, 16, %s290_s2, [#allocation13]  }
  0xb7   : > { %s2072_s1 = smul.u32 6, %s2684_s10  ;;  %s3481_s14 = sshll.u32 %s2951_s18, 4 }
  0xb8   : > { %s304_s21 = scalar_lea.vmem [#allocation3], %s3481_s14  ;;  %s344_s22 = sand.u32 1, %s2656_s26  }
  0xb9   : > { %s313_s29 = sshll.u32 %s304_s21, 4  ;;  %s310_s20 = sadd.s32 %s2072_s1, %s1826_s23  ;;  %s3055_s29 = int_to_ptr.vmem [resolvable:$true] %s313_s29 }
  0xba   : > { %s3058_s7 = sshll.u32 %s344_s22, 6  ;;  %s1827_s16 = sshll.u32 %s310_s20, 7 }
  0xbb   : > { %s3063_s17 = scalar_lea.hbm %s3411_s0, %s1827_s16  ;;  %s1893_s2 = sshll.u32 %s2684_s10, 10 }
  0xbc   : > { %s301_s8 = scalar_lea.sflag [#allocation4], %s2951_s18  ;;  %s2490_s14 = scalar_lea.hbm %s3063_s17, 256 }
  0xbd   : > { %p2491_p0 = scmp.ne.s32.totalorder %s3063_s17, %s2490_s14  ;;  %p3482_p11 = scmp.ne.s32.totalorder %s3476_s15, 0 }
  0xbe   : > { %s2495_s21 = scalar_lea.hbm %s3411_s0, 1536  ;;  %p2496_p7 = scmp.lt.u32.totalorder %s3063_s17, %s3411_s0 }
  0xbf   : > { %p3483_p13 = pneg %p3482_p11  ;;  %p2497_p12 = scmp.lt.u32.totalorder %s2495_s21, %s2490_s14 }
  0xc0   : > { %p2499_p6 = scmp.lt.u32.totalorder %s2490_s14, %s3063_s17 }
  0xc1   : > { %p2493_p5 = pnand %p2491_p0, %p3483_p13  ;;  %p2498_p8 = por %p2497_p12, %p2496_p7 }
  0xc3   : > { %p2494_p9 = pneg %p2493_p5  ;;  %p2500_p3 = por %p2499_p6, %p2498_p8 }
  0xc5   : > { %p2501_p10 = pnand %p2500_p3, %p2494_p9 }
  0xc7   : > { %2504 = shalt.err (!%p2501_p10)
}
  0xc8   : > { %s2505_s16 = scalar_lea.vmem %s3055_s29, 256  ;;  %p3484_p4 = pmov %p3483_p13 }
  0xc9   : > { %p2506_p2 = scmp.ne.s32.totalorder %s3055_s29, %s2505_s16  ;;  %s2697_s5 = smov [#allocation3]  }
  0xca   : > { %s2510_s30 = sshll.u32 %s2697_s5, 4  ;;  %s2511_s30 = int_to_ptr.vmem [resolvable:$false] %s2510_s30 }
  0xcb   : > { %p2508_p1 = pnand %p2506_p2, %p3484_p4  ;;  %s2512_s23 = scalar_lea.vmem %s2511_s30, 512 }
  0xcc   : > { %p2513_p13 = scmp.lt.s32.totalorder %s3055_s29, %s2511_s30  ;;  %p2514_p5 = scmp.lt.s32.totalorder %s2512_s23, %s2505_s16 }
  0xcd   : > { %p2509_p0 = pneg %p2508_p1 }
  0xce   : > { %p2515_p7 = por %p2514_p5, %p2513_p13 }
  0xd0   : > { %p2516_p12 = pnand %p2515_p7, %p2509_p0 }
  0xd2   : > { %2519 = shalt.err (!%p2516_p12)
}
  0xd3   : > { %s3485_s14 = smov 8   ;;  %s3486_s1 = smov 128  }
  0xd4   : > { %2115 = dma.hbm_to_vmem [thread:$0]  (!%p3482_p11), %s3063_s17, 256, %s3055_s29, %s301_s8, %s3486_s1, %s3486_s1, %s3485_s14  }
  0xd5   : > { %s3487_s20 = sld [smem:[#allocation33_spill]]  ;;  %s346_s15 = scalar_lea.vmem [#allocation8], %s3058_s7 }
  0xd6   : > { %s353_s5 = sshll.u32 %s346_s15, 4  ;;  %p3488_p8 = scmp.ne.s32.totalorder %s3477_s13, 0  ;;  %s3103_s5 = int_to_ptr.vmem [resolvable:$true] %s353_s5 }
  0xd8   : > { %p2522_p6 = pneg %p3488_p8 }
  0xdb   : > { %s3100_s16 = scalar_lea.hbm %s3487_s20, %s1893_s2  ;;  %s2525_s2 = scalar_lea.hbm %s3487_s20, 2048 }
  0xdc   : > { %s2520_s18 = scalar_lea.hbm %s3100_s16, 1024  ;;  %p2526_p10 = scmp.lt.u32.totalorder %s3100_s16, %s3487_s20 }
  0xdd   : > { %p2521_p9 = scmp.ne.s32.totalorder %s3100_s16, %s2520_s18  ;;  %p2527_p2 = scmp.lt.u32.totalorder %s2525_s2, %s2520_s18 }
  0xde   : > { %p2529_p1 = scmp.lt.u32.totalorder %s2520_s18, %s3100_s16 }
  0xdf   : > { %p2523_p11 = pnand %p2522_p6, %p2521_p9  ;;  %p2528_p4 = por %p2527_p2, %p2526_p10 }
  0xe1   : > { %p2524_p3 = pneg %p2523_p11  ;;  %p2530_p0 = por %p2529_p1, %p2528_p4 }
  0xe3   : > { %p2531_p13 = pnand %p2530_p0, %p2524_p3 }
  0xe5   : > { %2534 = shalt.err (!%p2531_p13)
}
  0xe6   : > { %s2535_s7 = scalar_lea.vmem %s3103_s5, 1024  ;;  %s2698_s23 = smov [#allocation8]  }
  0xe7   : > { %p2536_p5 = scmp.ne.s32.totalorder %s3103_s5, %s2535_s7  ;;  %s2540_s21 = sshll.u32 %s2698_s23, 4  ;;  %s2541_s21 = int_to_ptr.vmem [resolvable:$false] %s2540_s21 }
  0xe8   : > { %s2542_s22 = scalar_lea.vmem %s2541_s21, 2048  ;;  %p2543_p9 = scmp.lt.s32.totalorder %s3103_s5, %s2541_s21 }
  0xe9   : > { %p2538_p7 = pnand %p2536_p5, %p2522_p6  ;;  %p2544_p11 = scmp.lt.s32.totalorder %s2542_s22, %s2535_s7 }
  0xeb   : > { %p2539_p12 = pneg %p2538_p7  ;;  %p2545_p10 = por %p2544_p11, %p2543_p9 }
  0xed   : > { %p2546_p2 = pnand %p2545_p10, %p2539_p12 }
  0xef   : > { %2549 = shalt.err (!%p2546_p2)
}
  0xf0   : > { %2121 = dma.hbm_to_vmem [thread:$0]  (!%p3488_p8), %s3100_s16, 1024, %s3103_s5, %s2986_s27, %s3486_s1, %s3486_s1, %s3485_s14  }
  0xf1   : > { %s3489_s15 = sld [smem:[#allocation26_spill]] }
  0xf7   : > { %p3490_p6 = scmp.ne.s32.totalorder %s3489_s15, 0 }
  0xf8   : > { %s3137_s18 = sand.u32 (!%p3490_p6), 1, %s2664_s28   ;;  %p3491_p3 = scmp.ne.s32.totalorder (!%p3490_p6), %s3465_s19, 0 }
  0xf9   : > { %365 = sbr.rel (%p3490_p6) target bundleno = 2838 (0xb16), region = 48  ;;  %s1833_s29 = sshll.u32 (!%p3490_p6), %s3137_s18, 4 }
  0xfa   : > { %s368_s17 = scalar_lea.sflag (!%p3490_p6), [#allocation4], %s3137_s18  ;;  %s371_s13 = scalar_lea.vmem (!%p3490_p6), [#allocation3], %s1833_s29 }
 0x100   : > { %2623 = dma.done.wait (%p3491_p3), %s368_s17, 256  }
 0x101   : > { %2625 = vsyncadd (%p3491_p3), %s368_s17, 4294967040  ;;  %s376_s27 = sand.u32 1, %s2810_s12   ;;  %s379_s1 = scalar_lea.vmem [#allocation6], %s3137_s18 }
 0x102   : > { %s377_s14 = scalar_lea.sflag [#allocation7], %s376_s27 }
 0x103   : > { %2627 = dma.done.wait (%p3491_p3), %s377_s14, 16  }
 0x104   : > { %2629 = vsyncadd (%p3491_p3), %s377_s14, 4294967280  ;;  %s386_s16 = sand.u32 1, %s2652_s25   ;;  %p3492_p8 = scmp.ne.s32.totalorder %s3470_s3, 0 }
 0x105   : > { %s1834_s5 = sshll.u32 %s386_s16, 6 }
 0x106   : > { %s3154_s2 = scalar_lea.vmem [#allocation8], %s1834_s5 }
 0x107   : > { %2631 = dma.done.wait (%p3492_p8), %s377_s14, 1024  }
 0x108   : > { %2633 = vsyncadd (%p3492_p8), %s377_s14, 4294966272  ;;  %p3493_p4 = scmp.eq.s32.totalorder %s2810_s12, 0 }
 0x10a   : > { %2635 = dma.done.wait (%p3493_p4), [#allocation10], 528   ;;  %p3494_p1 = pmov %p3493_p4 }
 0x10c   : > { %2637 = vsyncadd (%p3494_p1), [#allocation10], 4294966768  ;;  %p3495_p0 = pmov %p3494_p1 }
 0x10e   : > { %2639 = dma.done.wait (%p3495_p0), [#allocation13], 528   ;;  %p3496_p13 = pmov %p3495_p0 }
 0x10f   : > { %vm450_vm0 = vcmask 261120   ;;  %v446_v0 = vld [vmem:[#allocation9] sm:$0xff]  ;;  %v447_v1 = vld [vmem:[#allocation9 + $0x8] sm:$0xff]  ;;  %v448_v2 = vld [vmem:[#allocation9 + $0x10] sm:$0xff]  ;;  %vm547_vm1 = vcmask 64512   ;;  %s2699_s3 = smov 96   ;;  %v536_v16 = vlaneseq }
 0x110   : > { %2641 = vsyncadd (%p3496_p13), [#allocation13], 4294966768  ;;  %v2016_v3 = vpack.c.bf16 %v447_v1, %v446_v0  ;;  %v449_v4 = vld [vmem:[#allocation9 + $0x18] sm:$0xff]  ;;  %v532_v17 = vld [vmem:[%s379_s1] sm:$0x1]  ;;  %vm635_vm3 = vcmask 130048  }
 0x111   : > { %v444_v5 = vld [vmem:[%s371_s13] sm:$0xff]  ;;  %v2020_v6 = vpack.c.bf16 %v449_v4, %v448_v2  ;;  %v445_v7 = vld [vmem:[%s371_s13 + $0x8] sm:$0xff]  ;;  %vm3184_vm2 = vmpackc.low %vm547_vm1, %vm547_vm1  ;;  %v1842_v18 = vadd.f32 -1.0, %v532_v17  ;;  %v537_v19 = vshrl.u32 %v536_v16, 7  ;;  %s2700_s12 = smov 64   ;;  %s2701_s19 = smov 88  }
 0x112   : > { %1946 = vmatprep.mubr.msk.f32.mxu0 %vm450_vm0, %v444_v5  ;;  %2017 = vmatprep.subr.bf16.mxu0 %v2016_v3  ;;  %v632_v24 = vld [vmem:[%s3154_s2 + $0x8] sm:$0xff]  ;;  %v631_v27 = vld [vmem:[%s3154_s2] sm:$0xff]  ;;  %s2702_s8 = smov 120   ;;  %v1857_v54 = vld [vmem:[%s3154_s2 + $0x18] sm:$0xff]  ;;  %s2703_s30 = smov 48   ;;  %vm1034_vm4 = vcmask 130112  }
 0x113   : > { %2019 = vmatpush3.bf16.msra.mxu0 %v2016_v3  ;;  %v534_v20 = vmul.f32 1e+09, %v1842_v18  ;;  %v538_v21 = vsub.s32 0, %v537_v19  ;;  %v1856_v57 = vld [vmem:[%s3154_s2 + $0x10] sm:$0xff]  ;;  %s2704_s7 = smov 56   ;;  %s2705_s23 = smov 72  }
 0x114   : > { %2021 = vmatprep.subr.bf16.mxu0 %v2020_v6  ;;  %s2706_s21 = smov 80   ;;  %s2707_s22 = smov 112   ;;  %vm1283_vm5 = vcmask 195712   ;;  %vm1532_vm6 = vcmask 261312  }
 0x115   : > { %v3196_v22 = vrot.slane %v534_v20, %v538_v21  ;;  %s2708_s15 = smov 104   ;;  %s2709_s17 = smov 40  }
 0x116   : > { %s2710_s13 = smov 32   ;;  %s3499_s27 = sld [smem:[#allocation25_spill]] }
 0x117   : > { %2023 = vmatpush3.bf16.msra.mxu0 %v2020_v6  ;;  %s3500_s14 = sld [smem:[#allocation24_spill]]  ;;  %p3503_p7 = scmp.ne.s32.totalorder %s3472_s24, 0 }
 0x11a   : > { %1947 = vmatmul.mubr.msk.f32.vlgmr.msra.gmra.mrb[0].mxu0 %vm450_vm0, %v445_v7 }
 0x11c   : > { %s2074_s1 = smul.u32 6, %s3499_s27 }
 0x11d   : > { %s1889_s16 = sshll.u32 %s3500_s14, 1 }
 0x11e   : > { %s1644_s5 = sadd.s32 %s2074_s1, %s1889_s16 }
 0x1ed   : > { %v3170_v8 = vpop.f32.mrb[0].mxu0 }
 0x1ee   : > { %v3172_v9 = vpop.f32.mrb[1].mxu0 }
 0x1ef   : > { %1953 = vmatprep.mubr.msk.f32.mxu1 %vm547_vm1, %v3172_v9  ;;  %v3178_v10 = vpack.i.bf16 %v3170_v8, %v3172_v9 }
 0x1f1   : > { %2245 = vrot.lane.b32.xlu0 %v3178_v10, %s2699_s3 }
 0x263   : > { %v2246_v11 = vpop.permute.xlu0 %2245 }
 0x264   : > { %v2248_v12 = vunpack.i.h.bf16 %v2246_v11  ;;  %v2247_v13 = vunpack.i.l.bf16 %v2246_v11 }
 0x266   : > { %v2024_v15 = vpack.c.bf16 %v2248_v12, %v2247_v13 }
 0x268   : > { %2026 = vmatprep.subr.msk.bf16.mxu1 %vm3184_vm2, %v2024_v15 }
 0x269   : > { %2029 = vmatpush3.bf16.xpose.msk.msra.mxu1 %vm3184_vm2, %v2024_v15 }
 0x270   : > { %1954 = vmatmul.mubr.msk.f32.vlgmr.msra.gmra.mrb[0].mxu1 %vm547_vm1, %v3170_v8 }
 0x343   : > { %v1955_v23 = vpop.f32.mrb[0].mxu1 }
 0x344   : > { %v628_v25 = vadd.f32 %v1955_v23, %v3196_v22  ;;  %v622_v26 = vpop.f32.mrb[1].mxu1 }
 0x345   : > { %v623_v28 = vadd.f32 %v622_v26, %v3196_v22 }
 0x346   : > { %v634_v29 = vadd.f32 %v632_v24, %v628_v25 }
 0x347   : > { %v633_v30 = vadd.f32 %v631_v27, %v623_v28 }
 0x348   : > { %v639_v31 = vsel %vm635_vm3, %v634_v29, -inf }
 0x349   : > { %640 = vmax.xlane.f32.xlu1 %v639_v31  ;;  %v636_v32 = vsel %vm635_vm3, %v633_v30, -inf }
 0x34a   : > { %637 = vmax.xlane.f32.xlu0 %v636_v32 }
 0x35a   : > { %2250 = vrot.lane.b32.xlu1 %v3178_v10, %s2700_s12  ;;  %s1890_s12 = sshll.u32 %s1644_s5, 7 }
 0x35e   : > { %2255 = vrot.lane.b32.xlu1 %v3178_v10, %s2701_s19 }
 0x362   : > { %788 = vrot.lane.b32.xlu1 %v3172_v9, %s2702_s8 }
 0x366   : > { %790 = vrot.lane.b32.xlu1 %v3170_v8, %s2702_s8 }
 0x3d6   : > { %v641_v33 = vpop.xlane.xlu1 %640 }
 0x3d7   : > { %v643_v34 = vsub.f32 %v634_v29, %v641_v33  ;;  %v638_v35 = vpop.xlane.xlu0 %637  ;;  %v1868_v33 = vld [vmem:[%s3154_s2 + $0x28] sm:$0xff] }
 0x3d8   : > { %v642_v36 = vsub.f32 %v633_v30, %v638_v35 }
 0x3d9   : > { %v646_v37 = vmul.f32 1.442695, %v643_v34 }
 0x3da   : > { %v644_v38 = vmul.f32 1.442695, %v642_v36  ;;  %v2251_v39 = vpop.permute.xlu1 %2250  ;;  %v1867_v36 = vld [vmem:[%s3154_s2 + $0x20] sm:$0xff] }
 0x3db   : > { %v2253_v40 = vunpack.i.h.bf16 %v2251_v39  ;;  %v2252_v41 = vunpack.i.l.bf16 %v2251_v39 }
 0x3dc   : > { %2284 = vpow2.f32 %v644_v38 }
 0x3dd   : > { %2286 = vpow2.f32 %v646_v37  ;;  %v2030_v42 = vpack.c.bf16 %v2253_v40, %v2252_v41 }
 0x3de   : > { %v2256_v43 = vpop.permute.xlu1 %2255 }
 0x3df   : > { %v2258_v44 = vunpack.i.h.bf16 %v2256_v43  ;;  %v2257_v45 = vunpack.i.l.bf16 %v2256_v43  ;;  %2031 = vmatprep.subr.bf16.mxu1 %v2030_v42 }
 0x3e0   : > { %2033 = vmatpush3.bf16.msra.mxu1 %v2030_v42 }
 0x3e1   : > { %v2034_v46 = vpack.c.bf16 %v2258_v44, %v2257_v45 }
 0x3e2   : > { %v789_v49 = vpop.permute.xlu1 %788 }
 0x3e3   : > { %2036 = vmatprep.subr.msk.bf16.mxu1 %vm3184_vm2, %v2034_v46 }
 0x3e6   : > { %v3212_v47 = vpop.eup %2284  ;;  %v791_v50 = vpop.permute.xlu1 %790 }
 0x3e7   : > { %v3214_v48 = vpop.eup %2286  ;;  %1960 = vmatprep.mubr.msk.f32.mxu1 %vm635_vm3, %v3212_v47 }
 0x3e8   : > { %1961 = vmatmul.mubr.msk.f32.vlgmr.msra.gmra.mrb[2].mxu1 %vm635_vm3, %v3214_v48 }
 0x3e9   : > { %2039 = vmatpush3.bf16.xpose.msk.msra.mxu1 %vm3184_vm2, %v2034_v46  ;;  %1967 = vmatprep.mubr.msk.f32.mxu1 %vm547_vm1, %v789_v49 }
 0x3f0   : > { %1968 = vmatmul.mubr.msk.f32.vlgmr.msra.gmra.mrb[4].mxu1 %vm547_vm1, %v791_v50 }
 0x4bb   : > { %v3224_v51 = vpop.f32.mrb[2].mxu1 }
 0x4bc   : > { %v3226_v52 = vpop.f32.mrb[3].mxu1 }
 0x4c3   : > { %v1969_v53 = vpop.f32.mrb[4].mxu1 }
 0x4c4   : > { %v876_v55 = vadd.f32 %v1969_v53, %v3196_v22  ;;  %v870_v56 = vpop.f32.mrb[5].mxu1 }
 0x4c5   : > { %v871_v58 = vadd.f32 %v870_v56, %v3196_v22 }
 0x4c6   : > { %v883_v59 = vadd.f32 %v1857_v54, %v876_v55 }
 0x4c7   : > { %v882_v60 = vadd.f32 %v1856_v57, %v871_v58 }
 0x4c8   : > { %v887_v61 = vsel %vm635_vm3, %v883_v59, -inf }
 0x4c9   : > { %888 = vmax.xlane.f32.xlu0 %v887_v61  ;;  %v884_v62 = vsel %vm635_vm3, %v882_v60, -inf }
 0x4ca   : > { %885 = vmax.xlane.f32.xlu1 %v884_v62  ;;  %v1878_v62 = vld [vmem:[%s3154_s2 + $0x30] sm:$0xff] }
 0x4db   : > { %2270 = vrot.lane.b32.xlu1 %v3178_v10, %s2703_s30  ;;  %s3501_s30 = sld [smem:[#allocation36_spill]] }
 0x4df   : > { %2260 = vrot.lane.b32.xlu0 %v3178_v10, %s2704_s7  ;;  %2275 = vrot.lane.b32.xlu1 %v3178_v10, %s2705_s23 }
 0x4e1   : > { %s3502_s7 = smov %s3501_s30  ;;  %s3348_s23 = scalar_lea.hbm %s3501_s30, %s1890_s12 }
 0x4e3   : > { %2265 = vrot.lane.b32.xlu0 %v3178_v10, %s2706_s21 }
 0x4e7   : > { %1037 = vrot.lane.b32.xlu0 %v3172_v9, %s2707_s22 }
 0x4eb   : > { %1039 = vrot.lane.b32.xlu0 %v3170_v8, %s2707_s22 }
 0x556   : > { %v889_v63 = vpop.xlane.xlu0 %888 }
 0x557   : > { %v891_v0 = vsub.f32 %v883_v59, %v889_v63  ;;  %v886_v1 = vpop.xlane.xlu1 %885  ;;  %v1879_v59 = vld [vmem:[%s3154_s2 + $0x38] sm:$0xff]  ;;  %s443_s2 = scalar_lea.vmem [#allocation15], %s1833_s29  ;;  %s1632_s29 = scalar_lea.sflag [#allocation5], %s3137_s18 }
 0x558   : > { %v890_v2 = vsub.f32 %v882_v60, %v886_v1 }
 0x559   : > { %v894_v3 = vmul.f32 1.442695, %v891_v0 }
 0x55a   : > { %v892_v4 = vmul.f32 1.442695, %v890_v2  ;;  %v2261_v5 = vpop.permute.xlu0 %2260 }
 0x55b   : > { %v2263_v6 = vunpack.i.h.bf16 %v2261_v5  ;;  %v2262_v7 = vunpack.i.l.bf16 %v2261_v5  ;;  %v2271_v11 = vpop.permute.xlu1 %2270 }
 0x55c   : > { %2288 = vpow2.f32 %v892_v4  ;;  %v2273_v12 = vunpack.i.h.bf16 %v2271_v11  ;;  %v2272_v13 = vunpack.i.l.bf16 %v2271_v11 }
 0x55d   : > { %2290 = vpow2.f32 %v894_v3  ;;  %v2040_v15 = vpack.c.bf16 %v2263_v6, %v2262_v7  ;;  %v651_v3 = vsel %vm635_vm3, %v3214_v48, 0.0  ;;  %v648_v7 = vsel %vm635_vm3, %v3212_v47, 0.0 }
 0x55e   : > { %v2050_v16 = vpack.c.bf16 %v2273_v12, %v2272_v13  ;;  %v2266_v17 = vpop.permute.xlu0 %2265 }
 0x55f   : > { %v2268_v18 = vunpack.i.h.bf16 %v2266_v17  ;;  %v2267_v19 = vunpack.i.l.bf16 %v2266_v17  ;;  %2041 = vmatprep.subr.bf16.mxu0 %v2040_v15  ;;  %v2276_v20 = vpop.permute.xlu1 %2275 }
 0x560   : > { %v2278_v21 = vunpack.i.h.bf16 %v2276_v20  ;;  %v2277_v23 = vunpack.i.l.bf16 %v2276_v20  ;;  %2043 = vmatpush3.bf16.msra.mxu0 %v2040_v15  ;;  %2051 = vmatprep.subr.bf16.mxu1 %v2050_v16 }
 0x561   : > { %v2044_v24 = vpack.c.bf16 %v2268_v18, %v2267_v19  ;;  %2053 = vmatpush3.bf16.msra.mxu1 %v2050_v16 }
 0x562   : > { %v2054_v25 = vpack.c.bf16 %v2278_v21, %v2277_v23  ;;  %v1038_v28 = vpop.permute.xlu0 %1037 }
 0x563   : > { %2046 = vmatprep.subr.msk.bf16.mxu0 %vm3184_vm2, %v2044_v24 }
 0x564   : > { %2056 = vmatprep.subr.msk.bf16.mxu1 %vm3184_vm2, %v2054_v25 }
 0x566   : > { %v2289_v26 = vpop.eup %2288  ;;  %v1040_v29 = vpop.permute.xlu0 %1039 }
 0x567   : > { %v2291_v27 = vpop.eup %2290  ;;  %1974 = vmatprep.mubr.msk.f32.mxu0 %vm635_vm3, %v2289_v26  ;;  %v896_v4 = vsel %vm635_vm3, %v2289_v26, 0.0 }
 0x568   : > { %1975 = vmatmul.mubr.msk.f32.vlgmr.msra.gmra.mrb[2].mxu0 %vm635_vm3, %v2291_v27  ;;  %v899_v5 = vsel %vm635_vm3, %v2291_v27, 0.0 }
 0x569   : > { %2049 = vmatpush3.bf16.xpose.msk.msra.mxu0 %vm3184_vm2, %v2044_v24  ;;  %1981 = vmatprep.mubr.msk.f32.mxu0 %vm547_vm1, %v1038_v28  ;;  %v1849_v28 = vld [vmem:[#allocation11] ss:$0 sm:$0xff] }
 0x570   : > { %1982 = vmatmul.mubr.msk.f32.vlgmr.msra.gmra.mrb[4].mxu0 %vm547_vm1, %v1040_v29 }
 0x63b   : > { %v3252_v30 = vpop.f32.mrb[2].mxu0 }
 0x63c   : > { %v3254_v31 = vpop.f32.mrb[3].mxu0 }
 0x643   : > { %v1983_v32 = vpop.f32.mrb[4].mxu0 }
 0x644   : > { %v1125_v34 = vadd.f32 %v1983_v32, %v3196_v22  ;;  %v1119_v35 = vpop.f32.mrb[5].mxu0 }
 0x645   : > { %v1120_v37 = vadd.f32 %v1119_v35, %v3196_v22 }
 0x646   : > { %v1132_v38 = vadd.f32 %v1868_v33, %v1125_v34 }
 0x647   : > { %v1131_v39 = vadd.f32 %v1867_v36, %v1120_v37 }
 0x648   : > { %v1136_v40 = vsel %vm635_vm3, %v1132_v38, -inf }
 0x649   : > { %1137 = vmax.xlane.f32.xlu0 %v1136_v40  ;;  %v1133_v41 = vsel %vm635_vm3, %v1131_v39, -inf }
 0x64a   : > { %1134 = vmax.xlane.f32.xlu1 %v1133_v41 }
 0x65b   : > { %1286 = vrot.lane.b32.xlu1 %v3172_v9, %s2708_s15 }
 0x65f   : > { %1288 = vrot.lane.b32.xlu1 %v3170_v8, %s2708_s15 }
 0x6d6   : > { %v1138_v42 = vpop.xlane.xlu0 %1137 }
 0x6d7   : > { %v1140_v43 = vsub.f32 %v1132_v38, %v1138_v42  ;;  %v1135_v44 = vpop.xlane.xlu1 %1134 }
 0x6d8   : > { %v1139_v45 = vsub.f32 %v1131_v39, %v1135_v44 }
 0x6d9   : > { %v1143_v46 = vmul.f32 1.442695, %v1140_v43 }
 0x6da   : > { %v1141_v49 = vmul.f32 1.442695, %v1139_v45 }
 0x6db   : > { %v1287_v54 = vpop.permute.xlu1 %1286 }
 0x6dc   : > { %2292 = vpow2.f32 %v1141_v49 }
 0x6dd   : > { %2294 = vpow2.f32 %v1143_v46 }
 0x6df   : > { %v1289_v55 = vpop.permute.xlu1 %1288 }
 0x6e6   : > { %v2293_v50 = vpop.eup %2292 }
 0x6e7   : > { %v2295_v53 = vpop.eup %2294  ;;  %1988 = vmatprep.mubr.msk.f32.mxu1 %vm635_vm3, %v2293_v50 }
 0x6e8   : > { %1989 = vmatmul.mubr.msk.f32.vlgmr.msra.gmra.mrb[6].mxu1 %vm635_vm3, %v2295_v53  ;;  %v1148_v6 = vsel %vm635_vm3, %v2295_v53, 0.0 }
 0x6e9   : > { %2059 = vmatpush3.bf16.xpose.msk.msra.mxu1 %vm3184_vm2, %v2054_v25  ;;  %1995 = vmatprep.mubr.msk.f32.mxu1 %vm547_vm1, %v1287_v54 }
 0x6f0   : > { %1996 = vmatmul.mubr.msk.f32.vlgmr.msra.gmra.mrb[8].mxu1 %vm547_vm1, %v1289_v55 }
 0x7bb   : > { %v3272_v56 = vpop.f32.mrb[6].mxu1 }
 0x7bc   : > { %v3274_v57 = vpop.f32.mrb[7].mxu1 }
 0x7c3   : > { %v1997_v58 = vpop.f32.mrb[8].mxu1 }
 0x7c4   : > { %v1374_v60 = vadd.f32 %v1997_v58, %v3196_v22  ;;  %v1368_v61 = vpop.f32.mrb[9].mxu1 }
 0x7c5   : > { %v1369_v63 = vadd.f32 %v1368_v61, %v3196_v22  ;;  %v1145_v22 = vsel %vm635_vm3, %v2293_v50, 0.0 }
 0x7c6   : > { %v1381_v0 = vadd.f32 %v1879_v59, %v1374_v60 }
 0x7c7   : > { %v1380_v14 = vadd.f32 %v1878_v62, %v1369_v63 }
 0x7c8   : > { %v1385_v1 = vsel %vm635_vm3, %v1381_v0, -inf }
 0x7c9   : > { %1386 = vmax.xlane.f32.xlu0 %v1385_v1  ;;  %v1382_v2 = vsel %vm635_vm3, %v1380_v14, -inf }
 0x7ca   : > { %1383 = vmax.xlane.f32.xlu1 %v1382_v2 }
 0x7ce   : > { %652 = vadd.xlane.f32.xlu1 %v651_v3 }
 0x7d2   : > { %897 = vadd.xlane.f32.xlu1 %v896_v4 }
 0x7d6   : > { %900 = vadd.xlane.f32.xlu1 %v899_v5 }
 0x7da   : > { %1146 = vadd.xlane.f32.xlu1 %v1145_v22 }
 0x7de   : > { %1149 = vadd.xlane.f32.xlu1 %v1148_v6 }
 0x7df   : > { %2280 = vrot.lane.b32.xlu0 %v3178_v10, %s2709_s17 }
 0x7fe   : > { %649 = vadd.xlane.f32.xlu0 %v648_v7 }
 0x856   : > { %v1387_v48 = vpop.xlane.xlu0 %1386 }
 0x857   : > { %v1389_v11 = vsub.f32 %v1381_v0, %v1387_v48  ;;  %v1384_v12 = vpop.xlane.xlu1 %1383 }
 0x858   : > { %v1388_v13 = vsub.f32 %v1380_v14, %v1384_v12 }
 0x859   : > { %v1392_v15 = vmul.f32 1.442695, %v1389_v11 }
 0x85a   : > { %v1390_v16 = vmul.f32 1.442695, %v1388_v13  ;;  %v2281_v17 = vpop.permute.xlu0 %2280 }
 0x85b   : > { %2296 = vpow2.f32 %v1392_v15  ;;  %v2283_v18 = vunpack.i.h.bf16 %v2281_v17  ;;  %v2282_v19 = vunpack.i.l.bf16 %v2281_v17  ;;  %v653_v21 = vpop.xlane.xlu1 %652 }
 0x85c   : > { %2298 = vpow2.f32 %v1390_v16 }
 0x85d   : > { %v2060_v20 = vpack.c.bf16 %v2283_v18, %v2282_v19  ;;  %2300 = vrcp.f32 %v653_v21 }
 0x85f   : > { %2061 = vmatprep.subr.bf16.mxu0 %v2060_v20  ;;  %v898_v25 = vpop.xlane.xlu1 %897 }
 0x860   : > { %2063 = vmatpush3.bf16.msra.mxu0 %v2060_v20 }
 0x863   : > { %v901_v26 = vpop.xlane.xlu1 %900 }
 0x864   : > { %2302 = vrcp.f32 %v901_v26 }
 0x865   : > { %v2297_v10 = vpop.eup %2296 }
 0x866   : > { %v2299_v23 = vpop.eup %2298  ;;  %v1397_v47 = vsel %vm635_vm3, %v2297_v10, 0.0 }
 0x867   : > { %2002 = vmatprep.mubr.msk.f32.mxu0 %vm635_vm3, %v2299_v23  ;;  %1398 = vadd.xlane.f32.xlu0 %v1397_v47  ;;  %v1394_v24 = vsel %vm635_vm3, %v2299_v23, 0.0  ;;  %v1147_v27 = vpop.xlane.xlu1 %1146  ;;  %v2301_v32 = vpop.eup %2300 }
 0x868   : > { %2003 = vmatmul.mubr.msk.f32.vlgmr.msra.gmra.mrb[6].mxu0 %vm635_vm3, %v2297_v10  ;;  %1395 = vadd.xlane.f32.xlu1 %v1394_v24  ;;  %v744_v33 = vmul.f32 %v2301_v32, %v3224_v51 }
 0x86b   : > { %v1150_v29 = vpop.xlane.xlu1 %1149 }
 0x86c   : > { %2304 = vrcp.f32 %v1150_v29 }
 0x86e   : > { %v2303_v34 = vpop.eup %2302 }
 0x86f   : > { %v992_v35 = vmul.f32 %v2303_v34, %v3252_v30 }
 0x876   : > { %v2305_v36 = vpop.eup %2304 }
 0x877   : > { %v1241_v38 = vmul.f32 %v2305_v36, %v3272_v56 }
 0x879   : > { %751 = vrot.lane.b32.xlu1 %v1849_v28, %s2699_s3 }
 0x87d   : > { %1248 = vrot.lane.b32.xlu1 %v1849_v28, %s2699_s3  ;;  %999 = vrot.lane.b32.xlu0 %v1849_v28, %s2699_s3 }
 0x881   : > { %1497 = vrot.lane.b32.xlu1 %v1849_v28, %s2699_s3 }
 0x885   : > { %772 = vrot.lane.b32.xlu1 %v744_v33, %s2699_s3 }
 0x889   : > { %1020 = vrot.lane.b32.xlu1 %v992_v35, %s2708_s15 }
 0x88b   : > { %v650_v37 = vpop.xlane.xlu0 %649 }
 0x88c   : > { %2306 = vrcp.f32 %v650_v37 }
 0x88d   : > { %1269 = vrot.lane.b32.xlu1 %v1241_v38, %s2707_s22  ;;  %2308 = vrcp.f32 %v898_v25 }
 0x88e   : > { %2310 = vrcp.f32 %v1147_v27 }
 0x896   : > { %v2307_v39 = vpop.eup %2306 }
 0x897   : > { %v743_v40 = vmul.f32 %v2307_v39, %v3226_v52  ;;  %v2309_v51 = vpop.eup %2308 }
 0x898   : > { %v991_v41 = vmul.f32 %v2309_v51, %v3254_v31  ;;  %v2311_v30 = vpop.eup %2310 }
 0x899   : > { %770 = vrot.lane.b32.xlu0 %v743_v40, %s2699_s3  ;;  %v1240_v42 = vmul.f32 %v2311_v30, %v3274_v57  ;;  %v1537_v30 = vld [vmem:[#allocation12] sm:$0xff]  ;;  %s1647_s3 = sshll.u32 %s443_s2, 4  ;;  %s3343_s3 = int_to_ptr.vmem [resolvable:$true] %s1647_s3 }
 0x89a   : > { %s2550_s21 = scalar_lea.vmem %s3343_s3, 256 }
 0x89b   : > { %p2551_p5 = scmp.ne.s32.totalorder %s3343_s3, %s2550_s21 }
 0x89d   : > { %1018 = vrot.lane.b32.xlu0 %v991_v41, %s2708_s15  ;;  %p2552_p12 = pnand %p2551_p5, %p3503_p7 }
 0x89f   : > { %p2553_p9 = pneg %p2552_p12 }
 0x8a1   : > { %1267 = vrot.lane.b32.xlu0 %v1240_v42, %s2707_s22  ;;  %v1538_v42 = vld [vmem:[#allocation12 + $0x8] sm:$0xff]  ;;  %s2711_s22 = smov [#allocation15]  }
 0x8a2   : > { %s2554_s15 = sshll.u32 %s2711_s22, 4  ;;  %s2555_s15 = int_to_ptr.vmem [resolvable:$false] %s2554_s15 }
 0x8a3   : > { %s2556_s17 = scalar_lea.vmem %s2555_s15, 512  ;;  %p2557_p11 = scmp.lt.s32.totalorder %s3343_s3, %s2555_s15 }
 0x8a4   : > { %p2558_p10 = scmp.lt.s32.totalorder %s2556_s17, %s2550_s21 }
 0x8a6   : > { %p2559_p2 = por %p2558_p10, %p2557_p11 }
 0x8a8   : > { %p2560_p6 = pnand %p2559_p2, %p2553_p9 }
 0x8f4   : > { %v1399_v50 = vpop.xlane.xlu0 %1398 }
 0x8f5   : > { %v1396_v43 = vpop.xlane.xlu1 %1395 }
 0x8f8   : > { %v1000_v53 = vpop.permute.xlu0 %999 }
 0x8f9   : > { %v752_v44 = vpop.permute.xlu1 %751  ;;  %v1003_v55 = vadd.f32 %v3170_v8, %v1000_v53  ;;  %v1002_v57 = vadd.f32 %v1000_v53, %v3172_v9 }
 0x8fa   : > { %v755_v31 = vadd.f32 %v3170_v8, %v752_v44  ;;  %v754_v54 = vadd.f32 %v752_v44, %v3172_v9  ;;  %v2064_v44 = vpack.c.bf16 %v1538_v42, %v1537_v30 }
 0x8fb   : > { %v1862_v59 = vmul.f32 -1.442695, %v1003_v55  ;;  %v1861_v61 = vmul.f32 -1.442695, %v1002_v57 }
 0x8fc   : > { %v1851_v56 = vmul.f32 -1.442695, %v755_v31  ;;  %v1850_v58 = vmul.f32 -1.442695, %v754_v54  ;;  %2065 = vmatprep.subr.bf16.mxu0 %v2064_v44 }
 0x8fd   : > { %v1249_v45 = vpop.permute.xlu1 %1248  ;;  %2067 = vmatpush3.bf16.msra.mxu0 %v2064_v44 }
 0x8fe   : > { %2312 = vpow2.f32 %v1851_v56  ;;  %v1252_v60 = vadd.f32 %v3170_v8, %v1249_v45  ;;  %v1251_v62 = vadd.f32 %v1249_v45, %v3172_v9  ;;  %v1540_v45 = vld [vmem:[#allocation12 + $0x18] sm:$0xff] }
 0x8ff   : > { %2314 = vpow2.f32 %v1850_v58 }
 0x900   : > { %2316 = vpow2.f32 %v1862_v59  ;;  %v1873_v63 = vmul.f32 -1.442695, %v1252_v60  ;;  %v1872_v0 = vmul.f32 -1.442695, %v1251_v62 }
 0x901   : > { %v1498_v46 = vpop.permute.xlu1 %1497  ;;  %2318 = vpow2.f32 %v1861_v61 }
 0x902   : > { %v3312_v49 = vadd.f32 %v1498_v46, %v3172_v9  ;;  %v3315_v52 = vadd.f32 %v3170_v8, %v1498_v46  ;;  %2320 = vpow2.f32 %v1873_v63 }
 0x903   : > { %2322 = vpow2.f32 %v1872_v0 }
 0x904   : > { %2324 = vrcp.f32 %v1399_v50  ;;  %v1884_v37 = vmul.f32 -1.442695, %v3315_v52  ;;  %v1883_v38 = vmul.f32 -1.442695, %v3312_v49 }
 0x905   : > { %2326 = vrcp.f32 %v1396_v43  ;;  %v773_v12 = vpop.permute.xlu1 %772  ;;  %v1539_v43 = vld [vmem:[#allocation12 + $0x10] sm:$0xff] }
 0x906   : > { %v2068_v46 = vpack.c.bf16 %v1540_v45, %v1539_v43 }
 0x908   : > { %v2313_v14 = vpop.eup %2312  ;;  %2069 = vmatprep.subr.bf16.mxu0 %v2068_v46 }
 0x909   : > { %v2315_v1 = vpop.eup %2314  ;;  %v763_v2 = vadd.f32 1.0, %v2313_v14  ;;  %v1021_v47 = vpop.permute.xlu1 %1020  ;;  %2071 = vmatpush3.bf16.msra.mxu0 %v2068_v46  ;;  %v1885_v14 = vld [vmem:[#allocation14] ss:$0 sm:$0xff] }
 0x90a   : > { %v2317_v3 = vpop.eup %2316  ;;  %v762_v4 = vadd.f32 1.0, %v2315_v1 }
 0x90b   : > { %v2319_v5 = vpop.eup %2318  ;;  %v1011_v22 = vadd.f32 1.0, %v2317_v3  ;;  %2328 = vrcp.f32 %v763_v2  ;;  %v771_v16 = vpop.permute.xlu0 %770 }
 0x90c   : > { %v2321_v8 = vpop.eup %2320  ;;  %v1010_v6 = vadd.f32 1.0, %v2319_v5  ;;  %2330 = vrcp.f32 %v762_v4 }
 0x90d   : > { %v2323_v9 = vpop.eup %2322  ;;  %2332 = vrcp.f32 %v1011_v22  ;;  %v1260_v7 = vadd.f32 1.0, %v2321_v8  ;;  %v1270_v33 = vpop.permute.xlu1 %1269 }
 0x90e   : > { %2334 = vrcp.f32 %v1010_v6  ;;  %v1259_v48 = vadd.f32 1.0, %v2323_v9  ;;  %v2325_v11 = vpop.eup %2324 }
 0x90f   : > { %2336 = vrcp.f32 %v1260_v7  ;;  %v2327_v15 = vpop.eup %2326  ;;  %v1019_v26 = vpop.permute.xlu0 %1018 }
 0x910   : > { %2338 = vrcp.f32 %v1259_v48 }
 0x911   : > { %2340 = vpow2.f32 %v1884_v37 }
 0x912   : > { %2342 = vpow2.f32 %v1883_v38 }
 0x913   : > { %v1268_v35 = vpop.permute.xlu0 %1267 }
 0x915   : > { %v2329_v19 = vpop.eup %2328 }
 0x916   : > { %v2331_v21 = vpop.eup %2330  ;;  %v777_v10 = vmul.f32 %v2329_v19, %v773_v12 }
 0x917   : > { %v2333_v23 = vpop.eup %2332  ;;  %v776_v24 = vmul.f32 %v2331_v21, %v771_v16 }
 0x918   : > { %v2335_v25 = vpop.eup %2334  ;;  %v1025_v27 = vmul.f32 %v2333_v23, %v1021_v47 }
 0x919   : > { %v2337_v28 = vpop.eup %2336  ;;  %v1024_v29 = vmul.f32 %v2335_v25, %v1019_v26 }
 0x91a   : > { %v2339_v32 = vpop.eup %2338  ;;  %v1274_v34 = vmul.f32 %v2337_v28, %v1270_v33 }
 0x91b   : > { %v1273_v36 = vmul.f32 %v2339_v32, %v1268_v35  ;;  %v2341_v39 = vpop.eup %2340 }
 0x91c   : > { %v2343_v40 = vpop.eup %2342  ;;  %v1509_v51 = vadd.f32 1.0, %v2341_v39 }
 0x91d   : > { %v1508_v41 = vadd.f32 1.0, %v2343_v40 }
 0x91e   : > { %2344 = vrcp.f32 %v1509_v51 }
 0x91f   : > { %2346 = vrcp.f32 %v1508_v41 }
 0x928   : > { %v2345_v52 = vpop.eup %2344 }
 0x929   : > { %v2347_v50 = vpop.eup %2346 }
 0x93b   : > { %v2004_v13 = vpop.f32.mrb[6].mxu0 }
 0x93c   : > { %v1490_v17 = vmul.f32 %v2325_v11, %v2004_v13  ;;  %v1478_v18 = vpop.f32.mrb[7].mxu0 }
 0x93d   : > { %v1489_v20 = vmul.f32 %v2327_v15, %v1478_v18 }
 0x93e   : > { %1518 = vrot.lane.b32.xlu1 %v1490_v17, %s2702_s8 }
 0x93f   : > { %1516 = vrot.lane.b32.xlu0 %v1489_v20, %s2702_s8 }
 0x942   : > { %782 = vrot.lane.b32.xlu1 %v777_v10, %s2710_s13 }
 0x943   : > { %780 = vrot.lane.b32.xlu0 %v776_v24, %s2710_s13 }
 0x946   : > { %1030 = vrot.lane.b32.xlu1 %v1025_v27, %s2710_s13 }
 0x947   : > { %1028 = vrot.lane.b32.xlu0 %v1024_v29, %s2710_s13 }
 0x94a   : > { %1279 = vrot.lane.b32.xlu1 %v1274_v34, %s2710_s13 }
 0x94b   : > { %1277 = vrot.lane.b32.xlu0 %v1273_v36, %s2710_s13 }
 0x9b0   : > { %v1519_v49 = vpop.permute.xlu1 %1518 }
 0x9b1   : > { %v1523_v31 = vmul.f32 %v2345_v52, %v1519_v49  ;;  %v1517_v53 = vpop.permute.xlu0 %1516 }
 0x9b2   : > { %v1522_v54 = vmul.f32 %v2347_v50, %v1517_v53 }
 0x9b3   : > { %1528 = vrot.lane.b32.xlu1 %v1523_v31, %s2710_s13 }
 0x9b4   : > { %v783_v55 = vpop.permute.xlu1 %782  ;;  %1526 = vrot.lane.b32.xlu0 %v1522_v54, %s2710_s13 }
 0x9b5   : > { %787 = vst.msk [vmem:[#allocation2 + $0x8] sm:$0xff] %vm547_vm1, %v783_v55  ;;  %v781_v56 = vpop.permute.xlu0 %780 }
 0x9b6   : > { %786 = vst.msk [vmem:[#allocation2] sm:$0xff] %vm547_vm1, %v781_v56 }
 0x9b8   : > { %v1031_v57 = vpop.permute.xlu1 %1030 }
 0x9b9   : > { %1036 = vst.msk [vmem:[#allocation2 + $0x8] sm:$0xff] %vm1034_vm4, %v1031_v57  ;;  %v1029_v58 = vpop.permute.xlu0 %1028 }
 0x9ba   : > { %1035 = vst.msk [vmem:[#allocation2] sm:$0xff] %vm1034_vm4, %v1029_v58 }
 0x9bc   : > { %v1280_v59 = vpop.permute.xlu1 %1279 }
 0x9bd   : > { %1285 = vst.msk [vmem:[#allocation2 + $0x8] sm:$0xff] %vm1283_vm5, %v1280_v59  ;;  %v1278_v60 = vpop.permute.xlu0 %1277 }
 0x9be   : > { %1284 = vst.msk [vmem:[#allocation2] sm:$0xff] %vm1283_vm5, %v1278_v60 }
 0xa25   : > { %v1529_v61 = vpop.permute.xlu1 %1528 }
 0xa26   : > { %1534 = vst.msk [vmem:[#allocation2 + $0x8] sm:$0xff] %vm1532_vm6, %v1529_v61  ;;  %v1527_v62 = vpop.permute.xlu0 %1526 }
 0xa27   : > { %1533 = vst.msk [vmem:[#allocation2] sm:$0xff] %vm1532_vm6, %v1527_v62 }
 0xa2d   : > { %v1536_v0 = vld [vmem:[#allocation2 + $0x8] sm:$0xff] }
 0xa2e   : > { %v1535_v63 = vld [vmem:[#allocation2] sm:$0xff] }
 0xa2f   : > { %2013 = vmatprep.mubr.msk.f32.mxu0 %vm450_vm0, %v1535_v63 }
 0xa30   : > { %2014 = vmatmul.mubr.msk.f32.vlgmr.msra.gmra.mrb[8].mxu0 %vm450_vm0, %v1536_v0 }
 0xb03   : > { %v2015_v1 = vpop.f32.mrb[8].mxu0 }
 0xb04   : > { %v1626_v2 = vadd.f32 %v2015_v1, %v1885_v14  ;;  %v1620_v3 = vpop.f32.mrb[9].mxu0 }
 0xb05   : > { %v1621_v4 = vadd.f32 %v1885_v14, %v1620_v3 }
 0xb06   : > { %1630 = vst [vmem:[%s443_s2 + $0x8] sm:$0xff] %v1626_v2 }
 0xb07   : > { %1629 = vst [vmem:[%s443_s2] sm:$0xff] %v1621_v4 }
 0xb08   : > { %2563 = shalt.err (!%p2560_p6)
}
 0xb09   : > { %s2564_s13 = scalar_lea.hbm %s3348_s23, 256  ;;  %s2568_s1 = scalar_lea.hbm %s3502_s7, 1536 }
 0xb0a   : > { %p2565_p3 = scmp.ne.s32.totalorder %s3348_s23, %s2564_s13  ;;  %p2569_p1 = scmp.lt.u32.totalorder %s3348_s23, %s3502_s7 }
 0xb0b   : > { %p2570_p0 = scmp.lt.u32.totalorder %s2568_s1, %s2564_s13  ;;  %p2572_p5 = scmp.lt.u32.totalorder %s2564_s13, %s3348_s23 }
 0xb0c   : > { %p2566_p8 = pnand %p2565_p3, %p3503_p7 }
 0xb0d   : > { %p2571_p13 = por %p2570_p0, %p2569_p1 }
 0xb0e   : > { %p2567_p4 = pneg %p2566_p8 }
 0xb0f   : > { %p2573_p12 = por %p2572_p5, %p2571_p13 }
 0xb11   : > { %p2574_p9 = pnand %p2573_p12, %p2567_p4 }
 0xb13   : > { %2577 = shalt.err (!%p2574_p9)
}
 0xb14   : > { %s2712_s2 = smov 128   ;;  %s2713_s12 = smov 8  }
 0xb15   : > { %2097 = dma.vmem_to_hbm [thread:$0]  (%p3503_p7), %s3343_s3, 256, %s3348_s23, %s1632_s29, %s2712_s2, %s2712_s2, %s2713_s12  }
 0xb16 PF: > { %s3504_s19 = sld [smem:[#allocation22_spill]]  ;;  %s3505_s8 = sld [smem:[#allocation31_spill]] }
 0xb17   : > { %p2135_p11 = scmp.ge.s32.totalorder %s2688_s11, 2 }
 0xb1c   : > { %s1662_s30 = sand.u32 1, %s3504_s19   ;;  %p3506_p10 = scmp.ne.s32.totalorder %s3505_s8, 0 }
 0xb1d   : > { %s1663_s21 = scalar_lea.sflag [#allocation5], %s1662_s30 }
 0xb1e   : > { %p2123_p2 = pnand %p2135_p11, %p3506_p10 }
 0xb20   : > { %2643 = dma.done.wait (!%p2123_p2), %s1663_s21, 256  }
 0xb21   : > { %2645 = vsyncadd (!%p2123_p2), %s1663_s21, 4294967040  ;;  %s28_s11 = sadd.s32 1, %s2688_s11   ;;  %s3507_s22 = sld [smem:[#allocation29_spill]] }
 0xb22   : > { %p25_p6 = scmp.ge.s32.totalorder %s28_s11, 8   ;;  %s3508_s18 = sld [smem:[#allocation23_spill]] }
 0xb23   : > { %s3509_s29 = sld [smem:[#allocation30_spill]]  ;;  %s3510_s3 = sld [smem:[#allocation27_spill]] }
 0xb24   : > { %s3511_s23 = sld [smem:[#allocation28_spill]]  ;;  %s3512_s24 = smov %s2652_s25 }
 0xb25   : > { %s3513_s25 = smov %s2656_s26  ;;  %s3515_s27 = smov %s2664_s28 }
 0xb26   : > { %s3517_s30 = smov %s2680_s9  ;;  %s3518_s8 = smov %s2684_s10 }
 0xb27   : > { %s3514_s26 = smov %s3507_s22  ;;  %27 = sbr.rel (!%p25_p6) target bundleno = 19 (0x13), region = 136 }
 0xb28   : > { %s3516_s28 = smov %s3508_s18 }
 0xb29   : > { %s3519_s9 = smov %s3510_s3 }
 0xb2a   : > { %s3520_s10 = smov %s3511_s23 }
 0xb2e   :  { %1668 = vsyncpa [#allocation4], 1 }
 0xb2f   :  { %1670 = vsyncpa [#allocation4 + $0x1], 1 }
 0xb30   :  { %1671 = vsyncpa [#allocation7], 1 }
 0xb31   :  { %1673 = vsyncpa [#allocation7 + $0x1], 1 }
 0xb32   :  { %1674 = vsyncpa [#allocation10], 1 }
 0xb33   :  { %1675 = vsyncpa [#allocation13], 1 }
 0xb34   :  { %1676 = vsyncpa [#allocation5], 1 }
 0xb35   :  { %1678 = vsyncpa [#allocation5 + $0x1], 1 }

</bundles_post_ra>
